<compile_context>
chip_gen: v5e
topology: v5e:2x2
jax: 0.10.0
libtpu: 0.0.40
codegen_flags: <defaults>
</compile_context>

<pallas_src>
import math
import functools

import jax
import jax.numpy as jnp
from jax.experimental import pallas as pl
from jax.experimental.pallas import tpu as pltpu

N_MELS = 128
TARGET_DIM = 2
VMEM_LIMIT_BYTES = 32 * 1024 * 1024   # safe on v5e/v6e/v7x, above v5e's 16 MiB default


def _round_up(n, m):
    return ((n + m - 1) // m) * m


# ----------------------------------------------------------------------------
# Kernel 1: fused conv stack  (conv1+BN+ReLU -> conv2+BN+ReLU -> conv3+BN+ReLU
#                              -> max over time), tiled over chunks.
# ----------------------------------------------------------------------------
def conv_stack_kernel(x_ref, w1_ref, w2_ref, w3_ref, b1_ref, b2_ref, b3_ref,
                      o_ref, y1_scr, y2_scr, *, H1, H2, H3):
    """x_ref: (T, CT, N_MELS) bf16 time-major chunk tile.
       w1:(3,M,D1) w2:(4,D1,D2) w3:(4,D2,D4) bf16 (BN scale folded in).
       b*: (1, Dk) f32 shifts.  y1_scr:(H1,CT,D1)  y2_scr:(H2,CT,D2) bf16.
       o_ref: (CT, D4) f32 chunk features."""
    f32 = jnp.float32

    def conv_step(src, w_ref, bias, h, k):
        # sum_kh  src[2*h + kh] @ w[kh]  : rows = chunk tile -> MXU-friendly M dim
        acc = jnp.dot(src[2 * h], w_ref[0], preferred_element_type=f32)
        for kh in range(1, k):
            acc = acc + jnp.dot(src[2 * h + kh], w_ref[kh],
                                preferred_element_type=f32)
        return jnp.maximum(acc + bias, 0.0)          # f32 epilogue (BN shift + ReLU)

    b1 = b1_ref[...]
    for h in range(H1):                               # conv1: k=3, stride 2, full mel
        y1_scr[h] = conv_step(x_ref, w1_ref, b1, h, 3).astype(y1_scr.dtype)

    b2 = b2_ref[...]
    for h in range(H2):                               # conv2: k=4, stride 2
        y2_scr[h] = conv_step(y1_scr, w2_ref, b2, h, 4).astype(y2_scr.dtype)

    b3 = b3_ref[...]
    mx = None
    for h in range(H3):                               # conv3: k=4, stride 2, + max_t
        r = conv_step(y2_scr, w3_ref, b3, h, 4)
        mx = r if mx is None else jnp.maximum(mx, r)
    o_ref[...] = mx


def conv_stack(xt, w1, w2, w3, b1, b2, b3, *, ct, H1, H2, H3):
    T, BLp, M = xt.shape
    D1, D2, D4 = w1.shape[2], w2.shape[2], w3.shape[2]
    kernel = functools.partial(conv_stack_kernel, H1=H1, H2=H2, H3=H3)
    return pl.pallas_call(
        kernel,
        out_shape=jax.ShapeDtypeStruct((BLp, D4), jnp.float32),
        grid_spec=pltpu.PrefetchScalarGridSpec(
            num_scalar_prefetch=0,
            grid=(BLp // ct,),
            in_specs=[
                pl.BlockSpec((T, ct, M), lambda i: (0, i, 0)),      # chunk tile
                pl.BlockSpec((3, M, D1), lambda i: (0, 0, 0)),      # resident weights
                pl.BlockSpec((4, D1, D2), lambda i: (0, 0, 0)),
                pl.BlockSpec((4, D2, D4), lambda i: (0, 0, 0)),
                pl.BlockSpec((1, D1), lambda i: (0, 0)),
                pl.BlockSpec((1, D2), lambda i: (0, 0)),
                pl.BlockSpec((1, D4), lambda i: (0, 0)),
            ],
            out_specs=pl.BlockSpec((ct, D4), lambda i: (i, 0)),
            scratch_shapes=[
                pltpu.VMEM((H1, ct, D1), jnp.bfloat16),             # y1 stays in VMEM
                pltpu.VMEM((H2, ct, D2), jnp.bfloat16),             # y2 stays in VMEM
            ],
        ),
        compiler_params=pltpu.CompilerParams(
            dimension_semantics=("parallel",),
            vmem_limit_bytes=VMEM_LIMIT_BYTES),
    )(xt, w1, w2, w3, b1, b2, b3)


# ----------------------------------------------------------------------------
# Kernel 2: fused tail  (PE add + attn MLP + masked softmax + weighted pooling
#                        + regression head).  lengths via SMEM scalar prefetch.
# ----------------------------------------------------------------------------
def tail_kernel(len_ref, h_ref, pe_ref,
                aw1_ref, ab1_ref, aw2_ref, ab2_ref, aw3_ref, ab3_ref,
                rw1_ref, rb1_ref, rw2_ref, rb2_ref,
                pred_ref, alpha_ref, wf_scr, *, B, L):
    f32 = jnp.float32
    h = h_ref[...]                                        # (B*L, F) f32 chunk features
    x = (h + pe_ref[...]).astype(jnp.bfloat16)            # positional-encoding add

    # attention MLP: Linear -> ReLU -> (Dropout=id) -> Linear -> Tanh -> (Dropout=id) -> Linear(F,1)
    a1 = jnp.dot(x, aw1_ref[...], preferred_element_type=f32) + ab1_ref[...]
    a1 = jnp.maximum(a1, 0.0).astype(jnp.bfloat16)
    a2 = jnp.dot(a1, aw2_ref[...], preferred_element_type=f32) + ab2_ref[...]
    a2 = jnp.tanh(a2)
    logits = jnp.sum(a2 * aw3_ref[...], axis=1, keepdims=True) + ab3_ref[...]   # (B*L, 1)

    # masked softmax over L per batch + weighted pooling of h_t (all kept in VMEM)
    for b in range(B):                                    # B is small & static
        lg = logits[b * L:(b + 1) * L, :]                 # (L, 1)
        pos = jax.lax.broadcasted_iota(jnp.int32, (L, 1), 0)
        lg = jnp.where(pos >= len_ref[b], -jnp.inf, lg)
        m = jnp.max(lg, axis=0, keepdims=True)
        e = jnp.exp(lg - m)
        s = jnp.sum(e, axis=0, keepdims=True)
        # NOTE: length==0 yields NaN, matching torch.softmax over all -inf.
        a = e * pl.reciprocal(s, approx=True)             # (L, 1)
        alpha_ref[pl.ds(b * L, L), :] = a
        hb = h[b * L:(b + 1) * L, :]                      # pooling uses h_t (no PE)
        wf_scr[pl.ds(b, 1), :] = jnp.sum(a * hb, axis=0, keepdims=True)

    # regression head: Linear -> ReLU -> (Dropout=id) -> Linear -> Sigmoid
    wf = wf_scr[...].astype(jnp.bfloat16)                 # (B, F)
    r1 = jnp.dot(wf, rw1_ref[...], preferred_element_type=f32) + rb1_ref[...]
    r1 = jnp.maximum(r1, 0.0).astype(jnp.bfloat16)
    r2 = jnp.dot(r1, rw2_ref[...], preferred_element_type=f32) + rb2_ref[...]
    pred_ref[...] = jax.nn.sigmoid(r2)


def attention_tail(h2d, pe2d, lengths, params, *, B, L):
    BL, F = h2d.shape
    H = params["rw1"].shape[1]
    z2 = lambda i, lens: (0, 0)                           # whole-array blocks (tiny tensors)
    kernel = functools.partial(tail_kernel, B=B, L=L)
    pred, alpha_col = pl.pallas_call(
        kernel,
        out_shape=(jax.ShapeDtypeStruct((B, TARGET_DIM), jnp.float32),
                   jax.ShapeDtypeStruct((BL, 1), jnp.float32)),
        grid_spec=pltpu.PrefetchScalarGridSpec(
            num_scalar_prefetch=1,                         # lengths -> SMEM scalars
            grid=(1,),
            in_specs=[
                pl.BlockSpec((BL, F), z2),                 # h_t
                pl.BlockSpec((BL, F), z2),                 # positional encoding (tiled)
                pl.BlockSpec((F, F), z2), pl.BlockSpec((1, F), z2),
                pl.BlockSpec((F, F), z2), pl.BlockSpec((1, F), z2),
                pl.BlockSpec((1, F), z2), pl.BlockSpec((1, 1), z2),
                pl.BlockSpec((F, H), z2), pl.BlockSpec((1, H), z2),
                pl.BlockSpec((H, TARGET_DIM), z2), pl.BlockSpec((1, TARGET_DIM), z2),
            ],
            out_specs=(pl.BlockSpec((B, TARGET_DIM), z2),
                       pl.BlockSpec((BL, 1), z2)),
            scratch_shapes=[pltpu.VMEM((B, F), jnp.float32)],
        ),
        compiler_params=pltpu.CompilerParams(
            dimension_semantics=("arbitrary",),
            vmem_limit_bytes=VMEM_LIMIT_BYTES),
    )(
        lengths.astype(jnp.int32), h2d, pe2d,
        params["aw1"].astype(jnp.bfloat16), params["ab1"].reshape(1, F),
        params["aw2"].astype(jnp.bfloat16), params["ab2"].reshape(1, F),
        params["aw3"].reshape(1, F), params["ab3"].reshape(1, 1),
        params["rw1"].astype(jnp.bfloat16), params["rb1"].reshape(1, H),
        params["rw2"].astype(jnp.bfloat16), params["rb2"].reshape(1, TARGET_DIM),
    )
    return pred, alpha_col


# ----------------------------------------------------------------------------
# Plain-JAX glue: positional encoding, BN folding, parameter init
# ----------------------------------------------------------------------------
def positional_encoding(L, D):
    pos = jnp.arange(L, dtype=jnp.float32)[:, None]
    div = jnp.exp(jnp.arange(0, D, 2, dtype=jnp.float32) * (-math.log(10000.0) / D))
    pe = jnp.zeros((L, D), dtype=jnp.float32)
    pe = pe.at[:, 0::2].set(jnp.sin(pos * div))
    pe = pe.at[:, 1::2].set(jnp.cos(pos * div))
    return pe


def fold_bn(conv_bias, bn, eps=1e-5):
    scale = bn["gamma"] / jnp.sqrt(bn["var"] + eps)
    shift = (conv_bias - bn["mean"]) * scale + bn["beta"]
    return scale, shift


def _fold_conv_weights(params, dim):
    """PyTorch conv weight layouts -> per-tap (kh, in_c, out_c) bf16 weights with
       the BatchNorm scale folded in; BN shift stays as a (1, oc) f32 bias."""
    feat_dim = dim * 4
    s1, sh1 = fold_bn(params["b1"], params["bn1"])
    s2, sh2 = fold_bn(params["b2"], params["bn2"])
    s3, sh3 = fold_bn(params["b3"], params["bn3"])
    w1 = jnp.transpose(params["w1"][:, 0, :, :], (1, 2, 0)) * s1[None, None, :]  # (3, M, dim)
    w2 = jnp.transpose(params["w2"][:, :, :, 0], (2, 1, 0)) * s2[None, None, :]  # (4, dim, 2dim)
    w3 = jnp.transpose(params["w3"][:, :, :, 0], (2, 1, 0)) * s3[None, None, :]  # (4, 2dim, 4dim)
    return (w1.astype(jnp.bfloat16), w2.astype(jnp.bfloat16), w3.astype(jnp.bfloat16),
            sh1.reshape(1, dim), sh2.reshape(1, 2 * dim), sh3.reshape(1, feat_dim))


def init_params(key, dim):
    feat_dim = dim * 4
    keys = iter(jax.random.split(key, 40))

    def nrm(shape, s=0.05):
        return s * jax.random.normal(next(keys), shape, dtype=jnp.float32)

    def bn_params(c):
        return dict(
            gamma=1.0 + nrm((c,), 0.1),
            beta=nrm((c,), 0.1),
            mean=nrm((c,), 0.1),
            var=1.0 + jnp.abs(nrm((c,), 0.1)),
        )

    p = {}
    # conv blocks (PyTorch conv weight layout: (out_c, in_c, kh, kw))
    p["w1"] = nrm((dim, 1, 3, N_MELS));           p["b1"] = nrm((dim,), 0.01)
    p["bn1"] = bn_params(dim)
    p["w2"] = nrm((2 * dim, dim, 4, 1));          p["b2"] = nrm((2 * dim,), 0.01)
    p["bn2"] = bn_params(2 * dim)
    p["w3"] = nrm((feat_dim, 2 * dim, 4, 1));     p["b3"] = nrm((feat_dim,), 0.01)
    p["bn3"] = bn_params(feat_dim)
    # attention MLP (stored as (in, out))
    p["aw1"] = nrm((feat_dim, feat_dim));         p["ab1"] = nrm((feat_dim,), 0.01)
    p["aw2"] = nrm((feat_dim, feat_dim));         p["ab2"] = nrm((feat_dim,), 0.01)
    p["aw3"] = nrm((feat_dim, 1));                p["ab3"] = nrm((1,), 0.01)
    # regression head
    p["rw1"] = nrm((feat_dim, 128));              p["rb1"] = nrm((128,), 0.01)
    p["rw2"] = nrm((128, TARGET_DIM));            p["rb2"] = nrm((TARGET_DIM,), 0.01)
    return p


# ----------------------------------------------------------------------------
# Full forward pass
# ----------------------------------------------------------------------------
def music_highlighter_forward(params, x, lengths, dim, chunk_tile=128):
    feat_dim = dim * 4
    B, L, M, T = x.shape
    assert M == N_MELS
    BL = B * L
    H1 = (T - 3) // 2 + 1
    H2 = (H1 - 4) // 2 + 1
    H3 = (H2 - 4) // 2 + 1
    assert H3 >= 1, "T_chunk too short for the three stride-2 convs"
    assert chunk_tile % 8 == 0

    ct = min(chunk_tile, _round_up(BL, 8))     # chunk-tile rows per grid step
    BLp = _round_up(BL, ct)

    # time-major chunk layout: xt[t, b*L + l, m] == x[b, l, m, t]   (bf16 halves DMA bytes)
    xt = jnp.transpose(x, (3, 0, 1, 2)).reshape(T, BL, M)
    if BLp != BL:
        xt = jnp.pad(xt, ((0, 0), (0, BLp - BL), (0, 0)))
    xt = xt.astype(jnp.bfloat16)

    w1, w2, w3, b1, b2, b3 = _fold_conv_weights(params, dim)
    feats = conv_stack(xt, w1, w2, w3, b1, b2, b3, ct=ct, H1=H1, H2=H2, H3=H3)
    h2d = feats[:BL]                                            # (B*L, feat_dim)

    pe2d = jnp.tile(positional_encoding(L, feat_dim), (B, 1))   # (B*L, feat_dim)

    prediction, alpha_col = attention_tail(h2d, pe2d, lengths, params, B=B, L=L)
    return prediction, alpha_col.reshape(B, L)


# ----------------------------------------------------------------------------
if __name__ == "__main__":
    dim = 16                    # feat_dim = 64 (module default is 64 -> 256)
    B, L_max, T_chunk = 2, 8, 35

    key = jax.random.PRNGKey(0)
    kx, kp = jax.random.split(key)
    x = jax.random.normal(kx, (B, L_max, N_MELS, T_chunk), dtype=jnp.float32)
    lengths = jnp.array([8, 3], dtype=jnp.int32)
    params = init_params(kp, dim=dim)

    # chunk_tile=8 -> grid=(2,) over chunk tiles in the demo (parallel axis).
    fwd = jax.jit(functools.partial(music_highlighter_forward, dim=dim, chunk_tile=8))
    prediction, alpha_t = fwd(params, x, lengths)
    jax.block_until_ready((prediction, alpha_t))

    assert prediction.shape == (B, TARGET_DIM)
    assert alpha_t.shape == (B, L_max)
    assert bool(jnp.all(jnp.isfinite(prediction)))
    print("KERNEL_OK")
</pallas_src>

<mosaic_0001>
module attributes {stable_mosaic.version = 11 : i64} {
  func.func @conv_stack_kernel(%arg0: i32, %arg1: memref<35x8x128xbf16, #tpu.memory_space<vmem>>, %arg2: memref<3x128x16xbf16, #tpu.memory_space<vmem>>, %arg3: memref<4x16x32xbf16, #tpu.memory_space<vmem>>, %arg4: memref<4x32x64xbf16, #tpu.memory_space<vmem>>, %arg5: memref<1x16xf32, #tpu.memory_space<vmem>>, %arg6: memref<1x32xf32, #tpu.memory_space<vmem>>, %arg7: memref<1x64xf32, #tpu.memory_space<vmem>>, %arg8: memref<8x64xf32, #tpu.memory_space<vmem>>, %arg9: memref<17x8x16xbf16, #tpu.memory_space<vmem>>, %arg10: memref<7x8x32xbf16, #tpu.memory_space<vmem>>) attributes {dimension_semantics = [#tpu.dimension_semantics<parallel>], iteration_bounds = array<i64: 2>, scalar_prefetch = 0 : i64, scratch_operands = 2 : i64, tpu.core_type = #tpu.core_type<tc>, window_params = [{transform_indices = @transform_0, window_bounds = array<i64: 35, 8, 128>}, {pipeline_mode = #tpu.pipeline_mode<synchronous>, transform_indices = @transform_1, window_bounds = array<i64: 3, 128, 16>}, {pipeline_mode = #tpu.pipeline_mode<synchronous>, transform_indices = @transform_2, window_bounds = array<i64: 4, 16, 32>}, {pipeline_mode = #tpu.pipeline_mode<synchronous>, transform_indices = @transform_3, window_bounds = array<i64: 4, 32, 64>}, {pipeline_mode = #tpu.pipeline_mode<synchronous>, transform_indices = @transform_4, window_bounds = array<i64: 1, 16>}, {pipeline_mode = #tpu.pipeline_mode<synchronous>, transform_indices = @transform_5, window_bounds = array<i64: 1, 32>}, {pipeline_mode = #tpu.pipeline_mode<synchronous>, transform_indices = @transform_6, window_bounds = array<i64: 1, 64>}, {transform_indices = @transform_7, window_bounds = array<i64: 8, 64>}]} {
    %c0 = arith.constant 0 : index
    %c0_0 = arith.constant 0 : index
    %0 = vector.load %arg5[%c0, %c0_0] : memref<1x16xf32, #tpu.memory_space<vmem>>, vector<1x16xf32>
    %c0_1 = arith.constant 0 : index
    %c0_2 = arith.constant 0 : index
    %c0_3 = arith.constant 0 : index
    %1 = vector.load %arg1[%c0_1, %c0_2, %c0_3] : memref<35x8x128xbf16, #tpu.memory_space<vmem>>, vector<1x8x128xbf16>
    %2 = vector.shape_cast %1 : vector<1x8x128xbf16> to vector<8x128xbf16>
    %c0_4 = arith.constant 0 : index
    %c0_5 = arith.constant 0 : index
    %c0_6 = arith.constant 0 : index
    %3 = vector.load %arg2[%c0_4, %c0_5, %c0_6] : memref<3x128x16xbf16, #tpu.memory_space<vmem>>, vector<1x128x16xbf16>
    %4 = vector.shape_cast %3 : vector<1x128x16xbf16> to vector<128x16xbf16>
    %cst = arith.constant dense<0.000000e+00> : vector<8x16xf32>
    %5 = tpu.matmul %2, %4, %cst {dimension_numbers = #tpu.dot_dimension_numbers<[1], [0], [0], [1], [0, 0, 1, 1], [], []>} : vector<8x128xbf16>, vector<128x16xbf16>, vector<8x16xf32> -> vector<8x16xf32>
    %c1 = arith.constant 1 : index
    %c0_7 = arith.constant 0 : index
    %c0_8 = arith.constant 0 : index
    %6 = vector.load %arg1[%c1, %c0_7, %c0_8] : memref<35x8x128xbf16, #tpu.memory_space<vmem>>, vector<1x8x128xbf16>
    %7 = vector.shape_cast %6 : vector<1x8x128xbf16> to vector<8x128xbf16>
    %c1_9 = arith.constant 1 : index
    %c0_10 = arith.constant 0 : index
    %c0_11 = arith.constant 0 : index
    %8 = vector.load %arg2[%c1_9, %c0_10, %c0_11] : memref<3x128x16xbf16, #tpu.memory_space<vmem>>, vector<1x128x16xbf16>
    %9 = vector.shape_cast %8 : vector<1x128x16xbf16> to vector<128x16xbf16>
    %cst_12 = arith.constant dense<0.000000e+00> : vector<8x16xf32>
    %10 = tpu.matmul %7, %9, %cst_12 {dimension_numbers = #tpu.dot_dimension_numbers<[1], [0], [0], [1], [0, 0, 1, 1], [], []>} : vector<8x128xbf16>, vector<128x16xbf16>, vector<8x16xf32> -> vector<8x16xf32>
    %11 = arith.addf %5, %10 : vector<8x16xf32>
    %c2 = arith.constant 2 : index
    %c0_13 = arith.constant 0 : index
    %c0_14 = arith.constant 0 : index
    %12 = vector.load %arg1[%c2, %c0_13, %c0_14] : memref<35x8x128xbf16, #tpu.memory_space<vmem>>, vector<1x8x128xbf16>
    %13 = vector.shape_cast %12 : vector<1x8x128xbf16> to vector<8x128xbf16>
    %c2_15 = arith.constant 2 : index
    %c0_16 = arith.constant 0 : index
    %c0_17 = arith.constant 0 : index
    %14 = vector.load %arg2[%c2_15, %c0_16, %c0_17] : memref<3x128x16xbf16, #tpu.memory_space<vmem>>, vector<1x128x16xbf16>
    %15 = vector.shape_cast %14 : vector<1x128x16xbf16> to vector<128x16xbf16>
    %cst_18 = arith.constant dense<0.000000e+00> : vector<8x16xf32>
    %16 = tpu.matmul %13, %15, %cst_18 {dimension_numbers = #tpu.dot_dimension_numbers<[1], [0], [0], [1], [0, 0, 1, 1], [], []>} : vector<8x128xbf16>, vector<128x16xbf16>, vector<8x16xf32> -> vector<8x16xf32>
    %17 = arith.addf %11, %16 : vector<8x16xf32>
    %18 = vector.broadcast %0 : vector<1x16xf32> to vector<8x16xf32>
    %19 = arith.addf %17, %18 : vector<8x16xf32>
    %cst_19 = arith.constant 0.000000e+00 : f32
    %20 = vector.broadcast %cst_19 : f32 to vector<8x16xf32>
    %21 = arith.maximumf %19, %20 : vector<8x16xf32>
    %22 = arith.truncf %21 : vector<8x16xf32> to vector<8x16xbf16>
    %c0_20 = arith.constant 0 : index
    %c0_21 = arith.constant 0 : index
    %c0_22 = arith.constant 0 : index
    %23 = vector.load %arg9[%c0_20, %c0_21, %c0_22] : memref<17x8x16xbf16, #tpu.memory_space<vmem>>, vector<1x8x16xbf16>
    %24 = vector.shape_cast %23 : vector<1x8x16xbf16> to vector<8x16xbf16>
    %25 = vector.shape_cast %22 : vector<8x16xbf16> to vector<1x8x16xbf16>
    tpu.vector_store %arg9[%c0_20, %c0_21, %c0_22], %25 {strides = array<i32>} : memref<17x8x16xbf16, #tpu.memory_space<vmem>>, vector<1x8x16xbf16>,
    %c2_23 = arith.constant 2 : index
    %c0_24 = arith.constant 0 : index
    %c0_25 = arith.constant 0 : index
    %26 = vector.load %arg1[%c2_23, %c0_24, %c0_25] : memref<35x8x128xbf16, #tpu.memory_space<vmem>>, vector<1x8x128xbf16>
    %27 = vector.shape_cast %26 : vector<1x8x128xbf16> to vector<8x128xbf16>
    %c0_26 = arith.constant 0 : index
    %c0_27 = arith.constant 0 : index
    %c0_28 = arith.constant 0 : index
    %28 = vector.load %arg2[%c0_26, %c0_27, %c0_28] : memref<3x128x16xbf16, #tpu.memory_space<vmem>>, vector<1x128x16xbf16>
    %29 = vector.shape_cast %28 : vector<1x128x16xbf16> to vector<128x16xbf16>
    %cst_29 = arith.constant dense<0.000000e+00> : vector<8x16xf32>
    %30 = tpu.matmul %27, %29, %cst_29 {dimension_numbers = #tpu.dot_dimension_numbers<[1], [0], [0], [1], [0, 0, 1, 1], [], []>} : vector<8x128xbf16>, vector<128x16xbf16>, vector<8x16xf32> -> vector<8x16xf32>
    %c3 = arith.constant 3 : index
    %c0_30 = arith.constant 0 : index
    %c0_31 = arith.constant 0 : index
    %31 = vector.load %arg1[%c3, %c0_30, %c0_31] : memref<35x8x128xbf16, #tpu.memory_space<vmem>>, vector<1x8x128xbf16>
    %32 = vector.shape_cast %31 : vector<1x8x128xbf16> to vector<8x128xbf16>
    %c1_32 = arith.constant 1 : index
    %c0_33 = arith.constant 0 : index
    %c0_34 = arith.constant 0 : index
    %33 = vector.load %arg2[%c1_32, %c0_33, %c0_34] : memref<3x128x16xbf16, #tpu.memory_space<vmem>>, vector<1x128x16xbf16>
    %34 = vector.shape_cast %33 : vector<1x128x16xbf16> to vector<128x16xbf16>
    %cst_35 = arith.constant dense<0.000000e+00> : vector<8x16xf32>
    %35 = tpu.matmul %32, %34, %cst_35 {dimension_numbers = #tpu.dot_dimension_numbers<[1], [0], [0], [1], [0, 0, 1, 1], [], []>} : vector<8x128xbf16>, vector<128x16xbf16>, vector<8x16xf32> -> vector<8x16xf32>
    %36 = arith.addf %30, %35 : vector<8x16xf32>
    %c4 = arith.constant 4 : index
    %c0_36 = arith.constant 0 : index
    %c0_37 = arith.constant 0 : index
    %37 = vector.load %arg1[%c4, %c0_36, %c0_37] : memref<35x8x128xbf16, #tpu.memory_space<vmem>>, vector<1x8x128xbf16>
    %38 = vector.shape_cast %37 : vector<1x8x128xbf16> to vector<8x128xbf16>
    %c2_38 = arith.constant 2 : index
    %c0_39 = arith.constant 0 : index
    %c0_40 = arith.constant 0 : index
    %39 = vector.load %arg2[%c2_38, %c0_39, %c0_40] : memref<3x128x16xbf16, #tpu.memory_space<vmem>>, vector<1x128x16xbf16>
    %40 = vector.shape_cast %39 : vector<1x128x16xbf16> to vector<128x16xbf16>
    %cst_41 = arith.constant dense<0.000000e+00> : vector<8x16xf32>
    %41 = tpu.matmul %38, %40, %cst_41 {dimension_numbers = #tpu.dot_dimension_numbers<[1], [0], [0], [1], [0, 0, 1, 1], [], []>} : vector<8x128xbf16>, vector<128x16xbf16>, vector<8x16xf32> -> vector<8x16xf32>
    %42 = arith.addf %36, %41 : vector<8x16xf32>
    %43 = vector.broadcast %0 : vector<1x16xf32> to vector<8x16xf32>
    %44 = arith.addf %42, %43 : vector<8x16xf32>
    %cst_42 = arith.constant 0.000000e+00 : f32
    %45 = vector.broadcast %cst_42 : f32 to vector<8x16xf32>
    %46 = arith.maximumf %44, %45 : vector<8x16xf32>
    %47 = arith.truncf %46 : vector<8x16xf32> to vector<8x16xbf16>
    %c1_43 = arith.constant 1 : index
    %c0_44 = arith.constant 0 : index
    %c0_45 = arith.constant 0 : index
    %48 = vector.load %arg9[%c1_43, %c0_44, %c0_45] : memref<17x8x16xbf16, #tpu.memory_space<vmem>>, vector<1x8x16xbf16>
    %49 = vector.shape_cast %48 : vector<1x8x16xbf16> to vector<8x16xbf16>
    %50 = vector.shape_cast %47 : vector<8x16xbf16> to vector<1x8x16xbf16>
    tpu.vector_store %arg9[%c1_43, %c0_44, %c0_45], %50 {strides = array<i32>} : memref<17x8x16xbf16, #tpu.memory_space<vmem>>, vector<1x8x16xbf16>,
    %c4_46 = arith.constant 4 : index
    %c0_47 = arith.constant 0 : index
    %c0_48 = arith.constant 0 : index
    %51 = vector.load %arg1[%c4_46, %c0_47, %c0_48] : memref<35x8x128xbf16, #tpu.memory_space<vmem>>, vector<1x8x128xbf16>
    %52 = vector.shape_cast %51 : vector<1x8x128xbf16> to vector<8x128xbf16>
    %c0_49 = arith.constant 0 : index
    %c0_50 = arith.constant 0 : index
    %c0_51 = arith.constant 0 : index
    %53 = vector.load %arg2[%c0_49, %c0_50, %c0_51] : memref<3x128x16xbf16, #tpu.memory_space<vmem>>, vector<1x128x16xbf16>
    %54 = vector.shape_cast %53 : vector<1x128x16xbf16> to vector<128x16xbf16>
    %cst_52 = arith.constant dense<0.000000e+00> : vector<8x16xf32>
    %55 = tpu.matmul %52, %54, %cst_52 {dimension_numbers = #tpu.dot_dimension_numbers<[1], [0], [0], [1], [0, 0, 1, 1], [], []>} : vector<8x128xbf16>, vector<128x16xbf16>, vector<8x16xf32> -> vector<8x16xf32>
    %c5 = arith.constant 5 : index
    %c0_53 = arith.constant 0 : index
    %c0_54 = arith.constant 0 : index
    %56 = vector.load %arg1[%c5, %c0_53, %c0_54] : memref<35x8x128xbf16, #tpu.memory_space<vmem>>, vector<1x8x128xbf16>
    %57 = vector.shape_cast %56 : vector<1x8x128xbf16> to vector<8x128xbf16>
    %c1_55 = arith.constant 1 : index
    %c0_56 = arith.constant 0 : index
    %c0_57 = arith.constant 0 : index
    %58 = vector.load %arg2[%c1_55, %c0_56, %c0_57] : memref<3x128x16xbf16, #tpu.memory_space<vmem>>, vector<1x128x16xbf16>
    %59 = vector.shape_cast %58 : vector<1x128x16xbf16> to vector<128x16xbf16>
    %cst_58 = arith.constant dense<0.000000e+00> : vector<8x16xf32>
    %60 = tpu.matmul %57, %59, %cst_58 {dimension_numbers = #tpu.dot_dimension_numbers<[1], [0], [0], [1], [0, 0, 1, 1], [], []>} : vector<8x128xbf16>, vector<128x16xbf16>, vector<8x16xf32> -> vector<8x16xf32>
    %61 = arith.addf %55, %60 : vector<8x16xf32>
    %c6 = arith.constant 6 : index
    %c0_59 = arith.constant 0 : index
    %c0_60 = arith.constant 0 : index
    %62 = vector.load %arg1[%c6, %c0_59, %c0_60] : memref<35x8x128xbf16, #tpu.memory_space<vmem>>, vector<1x8x128xbf16>
    %63 = vector.shape_cast %62 : vector<1x8x128xbf16> to vector<8x128xbf16>
    %c2_61 = arith.constant 2 : index
    %c0_62 = arith.constant 0 : index
    %c0_63 = arith.constant 0 : index
    %64 = vector.load %arg2[%c2_61, %c0_62, %c0_63] : memref<3x128x16xbf16, #tpu.memory_space<vmem>>, vector<1x128x16xbf16>
    %65 = vector.shape_cast %64 : vector<1x128x16xbf16> to vector<128x16xbf16>
    %cst_64 = arith.constant dense<0.000000e+00> : vector<8x16xf32>
    %66 = tpu.matmul %63, %65, %cst_64 {dimension_numbers = #tpu.dot_dimension_numbers<[1], [0], [0], [1], [0, 0, 1, 1], [], []>} : vector<8x128xbf16>, vector<128x16xbf16>, vector<8x16xf32> -> vector<8x16xf32>
    %67 = arith.addf %61, %66 : vector<8x16xf32>
    %68 = vector.broadcast %0 : vector<1x16xf32> to vector<8x16xf32>
    %69 = arith.addf %67, %68 : vector<8x16xf32>
    %cst_65 = arith.constant 0.000000e+00 : f32
    %70 = vector.broadcast %cst_65 : f32 to vector<8x16xf32>
    %71 = arith.maximumf %69, %70 : vector<8x16xf32>
    %72 = arith.truncf %71 : vector<8x16xf32> to vector<8x16xbf16>
    %c2_66 = arith.constant 2 : index
    %c0_67 = arith.constant 0 : index
    %c0_68 = arith.constant 0 : index
    %73 = vector.load %arg9[%c2_66, %c0_67, %c0_68] : memref<17x8x16xbf16, #tpu.memory_space<vmem>>, vector<1x8x16xbf16>
    %74 = vector.shape_cast %73 : vector<1x8x16xbf16> to vector<8x16xbf16>
    %75 = vector.shape_cast %72 : vector<8x16xbf16> to vector<1x8x16xbf16>
    tpu.vector_store %arg9[%c2_66, %c0_67, %c0_68], %75 {strides = array<i32>} : memref<17x8x16xbf16, #tpu.memory_space<vmem>>, vector<1x8x16xbf16>,
    %c6_69 = arith.constant 6 : index
    %c0_70 = arith.constant 0 : index
    %c0_71 = arith.constant 0 : index
    %76 = vector.load %arg1[%c6_69, %c0_70, %c0_71] : memref<35x8x128xbf16, #tpu.memory_space<vmem>>, vector<1x8x128xbf16>
    %77 = vector.shape_cast %76 : vector<1x8x128xbf16> to vector<8x128xbf16>
    %c0_72 = arith.constant 0 : index
    %c0_73 = arith.constant 0 : index
    %c0_74 = arith.constant 0 : index
    %78 = vector.load %arg2[%c0_72, %c0_73, %c0_74] : memref<3x128x16xbf16, #tpu.memory_space<vmem>>, vector<1x128x16xbf16>
    %79 = vector.shape_cast %78 : vector<1x128x16xbf16> to vector<128x16xbf16>
    %cst_75 = arith.constant dense<0.000000e+00> : vector<8x16xf32>
    %80 = tpu.matmul %77, %79, %cst_75 {dimension_numbers = #tpu.dot_dimension_numbers<[1], [0], [0], [1], [0, 0, 1, 1], [], []>} : vector<8x128xbf16>, vector<128x16xbf16>, vector<8x16xf32> -> vector<8x16xf32>
    %c7 = arith.constant 7 : index
    %c0_76 = arith.constant 0 : index
    %c0_77 = arith.constant 0 : index
    %81 = vector.load %arg1[%c7, %c0_76, %c0_77] : memref<35x8x128xbf16, #tpu.memory_space<vmem>>, vector<1x8x128xbf16>
    %82 = vector.shape_cast %81 : vector<1x8x128xbf16> to vector<8x128xbf16>
    %c1_78 = arith.constant 1 : index
    %c0_79 = arith.constant 0 : index
    %c0_80 = arith.constant 0 : index
    %83 = vector.load %arg2[%c1_78, %c0_79, %c0_80] : memref<3x128x16xbf16, #tpu.memory_space<vmem>>, vector<1x128x16xbf16>
    %84 = vector.shape_cast %83 : vector<1x128x16xbf16> to vector<128x16xbf16>
    %cst_81 = arith.constant dense<0.000000e+00> : vector<8x16xf32>
    %85 = tpu.matmul %82, %84, %cst_81 {dimension_numbers = #tpu.dot_dimension_numbers<[1], [0], [0], [1], [0, 0, 1, 1], [], []>} : vector<8x128xbf16>, vector<128x16xbf16>, vector<8x16xf32> -> vector<8x16xf32>
    %86 = arith.addf %80, %85 : vector<8x16xf32>
    %c8 = arith.constant 8 : index
    %c0_82 = arith.constant 0 : index
    %c0_83 = arith.constant 0 : index
    %87 = vector.load %arg1[%c8, %c0_82, %c0_83] : memref<35x8x128xbf16, #tpu.memory_space<vmem>>, vector<1x8x128xbf16>
    %88 = vector.shape_cast %87 : vector<1x8x128xbf16> to vector<8x128xbf16>
    %c2_84 = arith.constant 2 : index
    %c0_85 = arith.constant 0 : index
    %c0_86 = arith.constant 0 : index
    %89 = vector.load %arg2[%c2_84, %c0_85, %c0_86] : memref<3x128x16xbf16, #tpu.memory_space<vmem>>, vector<1x128x16xbf16>
    %90 = vector.shape_cast %89 : vector<1x128x16xbf16> to vector<128x16xbf16>
    %cst_87 = arith.constant dense<0.000000e+00> : vector<8x16xf32>
    %91 = tpu.matmul %88, %90, %cst_87 {dimension_numbers = #tpu.dot_dimension_numbers<[1], [0], [0], [1], [0, 0, 1, 1], [], []>} : vector<8x128xbf16>, vector<128x16xbf16>, vector<8x16xf32> -> vector<8x16xf32>
    %92 = arith.addf %86, %91 : vector<8x16xf32>
    %93 = vector.broadcast %0 : vector<1x16xf32> to vector<8x16xf32>
    %94 = arith.addf %92, %93 : vector<8x16xf32>
    %cst_88 = arith.constant 0.000000e+00 : f32
    %95 = vector.broadcast %cst_88 : f32 to vector<8x16xf32>
    %96 = arith.maximumf %94, %95 : vector<8x16xf32>
    %97 = arith.truncf %96 : vector<8x16xf32> to vector<8x16xbf16>
    %c3_89 = arith.constant 3 : index
    %c0_90 = arith.constant 0 : index
    %c0_91 = arith.constant 0 : index
    %98 = vector.load %arg9[%c3_89, %c0_90, %c0_91] : memref<17x8x16xbf16, #tpu.memory_space<vmem>>, vector<1x8x16xbf16>
    %99 = vector.shape_cast %98 : vector<1x8x16xbf16> to vector<8x16xbf16>
    %100 = vector.shape_cast %97 : vector<8x16xbf16> to vector<1x8x16xbf16>
    tpu.vector_store %arg9[%c3_89, %c0_90, %c0_91], %100 {strides = array<i32>} : memref<17x8x16xbf16, #tpu.memory_space<vmem>>, vector<1x8x16xbf16>,
    %c8_92 = arith.constant 8 : index
    %c0_93 = arith.constant 0 : index
    %c0_94 = arith.constant 0 : index
    %101 = vector.load %arg1[%c8_92, %c0_93, %c0_94] : memref<35x8x128xbf16, #tpu.memory_space<vmem>>, vector<1x8x128xbf16>
    %102 = vector.shape_cast %101 : vector<1x8x128xbf16> to vector<8x128xbf16>
    %c0_95 = arith.constant 0 : index
    %c0_96 = arith.constant 0 : index
    %c0_97 = arith.constant 0 : index
    %103 = vector.load %arg2[%c0_95, %c0_96, %c0_97] : memref<3x128x16xbf16, #tpu.memory_space<vmem>>, vector<1x128x16xbf16>
    %104 = vector.shape_cast %103 : vector<1x128x16xbf16> to vector<128x16xbf16>
    %cst_98 = arith.constant dense<0.000000e+00> : vector<8x16xf32>
    %105 = tpu.matmul %102, %104, %cst_98 {dimension_numbers = #tpu.dot_dimension_numbers<[1], [0], [0], [1], [0, 0, 1, 1], [], []>} : vector<8x128xbf16>, vector<128x16xbf16>, vector<8x16xf32> -> vector<8x16xf32>
    %c9 = arith.constant 9 : index
    %c0_99 = arith.constant 0 : index
    %c0_100 = arith.constant 0 : index
    %106 = vector.load %arg1[%c9, %c0_99, %c0_100] : memref<35x8x128xbf16, #tpu.memory_space<vmem>>, vector<1x8x128xbf16>
    %107 = vector.shape_cast %106 : vector<1x8x128xbf16> to vector<8x128xbf16>
    %c1_101 = arith.constant 1 : index
    %c0_102 = arith.constant 0 : index
    %c0_103 = arith.constant 0 : index
    %108 = vector.load %arg2[%c1_101, %c0_102, %c0_103] : memref<3x128x16xbf16, #tpu.memory_space<vmem>>, vector<1x128x16xbf16>
    %109 = vector.shape_cast %108 : vector<1x128x16xbf16> to vector<128x16xbf16>
    %cst_104 = arith.constant dense<0.000000e+00> : vector<8x16xf32>
    %110 = tpu.matmul %107, %109, %cst_104 {dimension_numbers = #tpu.dot_dimension_numbers<[1], [0], [0], [1], [0, 0, 1, 1], [], []>} : vector<8x128xbf16>, vector<128x16xbf16>, vector<8x16xf32> -> vector<8x16xf32>
    %111 = arith.addf %105, %110 : vector<8x16xf32>
    %c10 = arith.constant 10 : index
    %c0_105 = arith.constant 0 : index
    %c0_106 = arith.constant 0 : index
    %112 = vector.load %arg1[%c10, %c0_105, %c0_106] : memref<35x8x128xbf16, #tpu.memory_space<vmem>>, vector<1x8x128xbf16>
    %113 = vector.shape_cast %112 : vector<1x8x128xbf16> to vector<8x128xbf16>
    %c2_107 = arith.constant 2 : index
    %c0_108 = arith.constant 0 : index
    %c0_109 = arith.constant 0 : index
    %114 = vector.load %arg2[%c2_107, %c0_108, %c0_109] : memref<3x128x16xbf16, #tpu.memory_space<vmem>>, vector<1x128x16xbf16>
    %115 = vector.shape_cast %114 : vector<1x128x16xbf16> to vector<128x16xbf16>
    %cst_110 = arith.constant dense<0.000000e+00> : vector<8x16xf32>
    %116 = tpu.matmul %113, %115, %cst_110 {dimension_numbers = #tpu.dot_dimension_numbers<[1], [0], [0], [1], [0, 0, 1, 1], [], []>} : vector<8x128xbf16>, vector<128x16xbf16>, vector<8x16xf32> -> vector<8x16xf32>
    %117 = arith.addf %111, %116 : vector<8x16xf32>
    %118 = vector.broadcast %0 : vector<1x16xf32> to vector<8x16xf32>
    %119 = arith.addf %117, %118 : vector<8x16xf32>
    %cst_111 = arith.constant 0.000000e+00 : f32
    %120 = vector.broadcast %cst_111 : f32 to vector<8x16xf32>
    %121 = arith.maximumf %119, %120 : vector<8x16xf32>
    %122 = arith.truncf %121 : vector<8x16xf32> to vector<8x16xbf16>
    %c4_112 = arith.constant 4 : index
    %c0_113 = arith.constant 0 : index
    %c0_114 = arith.constant 0 : index
    %123 = vector.load %arg9[%c4_112, %c0_113, %c0_114] : memref<17x8x16xbf16, #tpu.memory_space<vmem>>, vector<1x8x16xbf16>
    %124 = vector.shape_cast %123 : vector<1x8x16xbf16> to vector<8x16xbf16>
    %125 = vector.shape_cast %122 : vector<8x16xbf16> to vector<1x8x16xbf16>
    tpu.vector_store %arg9[%c4_112, %c0_113, %c0_114], %125 {strides = array<i32>} : memref<17x8x16xbf16, #tpu.memory_space<vmem>>, vector<1x8x16xbf16>,
    %c10_115 = arith.constant 10 : index
    %c0_116 = arith.constant 0 : index
    %c0_117 = arith.constant 0 : index
    %126 = vector.load %arg1[%c10_115, %c0_116, %c0_117] : memref<35x8x128xbf16, #tpu.memory_space<vmem>>, vector<1x8x128xbf16>
    %127 = vector.shape_cast %126 : vector<1x8x128xbf16> to vector<8x128xbf16>
    %c0_118 = arith.constant 0 : index
    %c0_119 = arith.constant 0 : index
    %c0_120 = arith.constant 0 : index
    %128 = vector.load %arg2[%c0_118, %c0_119, %c0_120] : memref<3x128x16xbf16, #tpu.memory_space<vmem>>, vector<1x128x16xbf16>
    %129 = vector.shape_cast %128 : vector<1x128x16xbf16> to vector<128x16xbf16>
    %cst_121 = arith.constant dense<0.000000e+00> : vector<8x16xf32>
    %130 = tpu.matmul %127, %129, %cst_121 {dimension_numbers = #tpu.dot_dimension_numbers<[1], [0], [0], [1], [0, 0, 1, 1], [], []>} : vector<8x128xbf16>, vector<128x16xbf16>, vector<8x16xf32> -> vector<8x16xf32>
    %c11 = arith.constant 11 : index
    %c0_122 = arith.constant 0 : index
    %c0_123 = arith.constant 0 : index
    %131 = vector.load %arg1[%c11, %c0_122, %c0_123] : memref<35x8x128xbf16, #tpu.memory_space<vmem>>, vector<1x8x128xbf16>
    %132 = vector.shape_cast %131 : vector<1x8x128xbf16> to vector<8x128xbf16>
    %c1_124 = arith.constant 1 : index
    %c0_125 = arith.constant 0 : index
    %c0_126 = arith.constant 0 : index
    %133 = vector.load %arg2[%c1_124, %c0_125, %c0_126] : memref<3x128x16xbf16, #tpu.memory_space<vmem>>, vector<1x128x16xbf16>
    %134 = vector.shape_cast %133 : vector<1x128x16xbf16> to vector<128x16xbf16>
    %cst_127 = arith.constant dense<0.000000e+00> : vector<8x16xf32>
    %135 = tpu.matmul %132, %134, %cst_127 {dimension_numbers = #tpu.dot_dimension_numbers<[1], [0], [0], [1], [0, 0, 1, 1], [], []>} : vector<8x128xbf16>, vector<128x16xbf16>, vector<8x16xf32> -> vector<8x16xf32>
    %136 = arith.addf %130, %135 : vector<8x16xf32>
    %c12 = arith.constant 12 : index
    %c0_128 = arith.constant 0 : index
    %c0_129 = arith.constant 0 : index
    %137 = vector.load %arg1[%c12, %c0_128, %c0_129] : memref<35x8x128xbf16, #tpu.memory_space<vmem>>, vector<1x8x128xbf16>
    %138 = vector.shape_cast %137 : vector<1x8x128xbf16> to vector<8x128xbf16>
    %c2_130 = arith.constant 2 : index
    %c0_131 = arith.constant 0 : index
    %c0_132 = arith.constant 0 : index
    %139 = vector.load %arg2[%c2_130, %c0_131, %c0_132] : memref<3x128x16xbf16, #tpu.memory_space<vmem>>, vector<1x128x16xbf16>
    %140 = vector.shape_cast %139 : vector<1x128x16xbf16> to vector<128x16xbf16>
    %cst_133 = arith.constant dense<0.000000e+00> : vector<8x16xf32>
    %141 = tpu.matmul %138, %140, %cst_133 {dimension_numbers = #tpu.dot_dimension_numbers<[1], [0], [0], [1], [0, 0, 1, 1], [], []>} : vector<8x128xbf16>, vector<128x16xbf16>, vector<8x16xf32> -> vector<8x16xf32>
    %142 = arith.addf %136, %141 : vector<8x16xf32>
    %143 = vector.broadcast %0 : vector<1x16xf32> to vector<8x16xf32>
    %144 = arith.addf %142, %143 : vector<8x16xf32>
    %cst_134 = arith.constant 0.000000e+00 : f32
    %145 = vector.broadcast %cst_134 : f32 to vector<8x16xf32>
    %146 = arith.maximumf %144, %145 : vector<8x16xf32>
    %147 = arith.truncf %146 : vector<8x16xf32> to vector<8x16xbf16>
    %c5_135 = arith.constant 5 : index
    %c0_136 = arith.constant 0 : index
    %c0_137 = arith.constant 0 : index
    %148 = vector.load %arg9[%c5_135, %c0_136, %c0_137] : memref<17x8x16xbf16, #tpu.memory_space<vmem>>, vector<1x8x16xbf16>
    %149 = vector.shape_cast %148 : vector<1x8x16xbf16> to vector<8x16xbf16>
    %150 = vector.shape_cast %147 : vector<8x16xbf16> to vector<1x8x16xbf16>
    tpu.vector_store %arg9[%c5_135, %c0_136, %c0_137], %150 {strides = array<i32>} : memref<17x8x16xbf16, #tpu.memory_space<vmem>>, vector<1x8x16xbf16>,
    %c12_138 = arith.constant 12 : index
    %c0_139 = arith.constant 0 : index
    %c0_140 = arith.constant 0 : index
    %151 = vector.load %arg1[%c12_138, %c0_139, %c0_140] : memref<35x8x128xbf16, #tpu.memory_space<vmem>>, vector<1x8x128xbf16>
    %152 = vector.shape_cast %151 : vector<1x8x128xbf16> to vector<8x128xbf16>
    %c0_141 = arith.constant 0 : index
    %c0_142 = arith.constant 0 : index
    %c0_143 = arith.constant 0 : index
    %153 = vector.load %arg2[%c0_141, %c0_142, %c0_143] : memref<3x128x16xbf16, #tpu.memory_space<vmem>>, vector<1x128x16xbf16>
    %154 = vector.shape_cast %153 : vector<1x128x16xbf16> to vector<128x16xbf16>
    %cst_144 = arith.constant dense<0.000000e+00> : vector<8x16xf32>
    %155 = tpu.matmul %152, %154, %cst_144 {dimension_numbers = #tpu.dot_dimension_numbers<[1], [0], [0], [1], [0, 0, 1, 1], [], []>} : vector<8x128xbf16>, vector<128x16xbf16>, vector<8x16xf32> -> vector<8x16xf32>
    %c13 = arith.constant 13 : index
    %c0_145 = arith.constant 0 : index
    %c0_146 = arith.constant 0 : index
    %156 = vector.load %arg1[%c13, %c0_145, %c0_146] : memref<35x8x128xbf16, #tpu.memory_space<vmem>>, vector<1x8x128xbf16>
    %157 = vector.shape_cast %156 : vector<1x8x128xbf16> to vector<8x128xbf16>
    %c1_147 = arith.constant 1 : index
    %c0_148 = arith.constant 0 : index
    %c0_149 = arith.constant 0 : index
    %158 = vector.load %arg2[%c1_147, %c0_148, %c0_149] : memref<3x128x16xbf16, #tpu.memory_space<vmem>>, vector<1x128x16xbf16>
    %159 = vector.shape_cast %158 : vector<1x128x16xbf16> to vector<128x16xbf16>
    %cst_150 = arith.constant dense<0.000000e+00> : vector<8x16xf32>
    %160 = tpu.matmul %157, %159, %cst_150 {dimension_numbers = #tpu.dot_dimension_numbers<[1], [0], [0], [1], [0, 0, 1, 1], [], []>} : vector<8x128xbf16>, vector<128x16xbf16>, vector<8x16xf32> -> vector<8x16xf32>
    %161 = arith.addf %155, %160 : vector<8x16xf32>
    %c14 = arith.constant 14 : index
    %c0_151 = arith.constant 0 : index
    %c0_152 = arith.constant 0 : index
    %162 = vector.load %arg1[%c14, %c0_151, %c0_152] : memref<35x8x128xbf16, #tpu.memory_space<vmem>>, vector<1x8x128xbf16>
    %163 = vector.shape_cast %162 : vector<1x8x128xbf16> to vector<8x128xbf16>
    %c2_153 = arith.constant 2 : index
    %c0_154 = arith.constant 0 : index
    %c0_155 = arith.constant 0 : index
    %164 = vector.load %arg2[%c2_153, %c0_154, %c0_155] : memref<3x128x16xbf16, #tpu.memory_space<vmem>>, vector<1x128x16xbf16>
    %165 = vector.shape_cast %164 : vector<1x128x16xbf16> to vector<128x16xbf16>
    %cst_156 = arith.constant dense<0.000000e+00> : vector<8x16xf32>
    %166 = tpu.matmul %163, %165, %cst_156 {dimension_numbers = #tpu.dot_dimension_numbers<[1], [0], [0], [1], [0, 0, 1, 1], [], []>} : vector<8x128xbf16>, vector<128x16xbf16>, vector<8x16xf32> -> vector<8x16xf32>
    %167 = arith.addf %161, %166 : vector<8x16xf32>
    %168 = vector.broadcast %0 : vector<1x16xf32> to vector<8x16xf32>
    %169 = arith.addf %167, %168 : vector<8x16xf32>
    %cst_157 = arith.constant 0.000000e+00 : f32
    %170 = vector.broadcast %cst_157 : f32 to vector<8x16xf32>
    %171 = arith.maximumf %169, %170 : vector<8x16xf32>
    %172 = arith.truncf %171 : vector<8x16xf32> to vector<8x16xbf16>
    %c6_158 = arith.constant 6 : index
    %c0_159 = arith.constant 0 : index
    %c0_160 = arith.constant 0 : index
    %173 = vector.load %arg9[%c6_158, %c0_159, %c0_160] : memref<17x8x16xbf16, #tpu.memory_space<vmem>>, vector<1x8x16xbf16>
    %174 = vector.shape_cast %173 : vector<1x8x16xbf16> to vector<8x16xbf16>
    %175 = vector.shape_cast %172 : vector<8x16xbf16> to vector<1x8x16xbf16>
    tpu.vector_store %arg9[%c6_158, %c0_159, %c0_160], %175 {strides = array<i32>} : memref<17x8x16xbf16, #tpu.memory_space<vmem>>, vector<1x8x16xbf16>,
    %c14_161 = arith.constant 14 : index
    %c0_162 = arith.constant 0 : index
    %c0_163 = arith.constant 0 : index
    %176 = vector.load %arg1[%c14_161, %c0_162, %c0_163] : memref<35x8x128xbf16, #tpu.memory_space<vmem>>, vector<1x8x128xbf16>
    %177 = vector.shape_cast %176 : vector<1x8x128xbf16> to vector<8x128xbf16>
    %c0_164 = arith.constant 0 : index
    %c0_165 = arith.constant 0 : index
    %c0_166 = arith.constant 0 : index
    %178 = vector.load %arg2[%c0_164, %c0_165, %c0_166] : memref<3x128x16xbf16, #tpu.memory_space<vmem>>, vector<1x128x16xbf16>
    %179 = vector.shape_cast %178 : vector<1x128x16xbf16> to vector<128x16xbf16>
    %cst_167 = arith.constant dense<0.000000e+00> : vector<8x16xf32>
    %180 = tpu.matmul %177, %179, %cst_167 {dimension_numbers = #tpu.dot_dimension_numbers<[1], [0], [0], [1], [0, 0, 1, 1], [], []>} : vector<8x128xbf16>, vector<128x16xbf16>, vector<8x16xf32> -> vector<8x16xf32>
    %c15 = arith.constant 15 : index
    %c0_168 = arith.constant 0 : index
    %c0_169 = arith.constant 0 : index
    %181 = vector.load %arg1[%c15, %c0_168, %c0_169] : memref<35x8x128xbf16, #tpu.memory_space<vmem>>, vector<1x8x128xbf16>
    %182 = vector.shape_cast %181 : vector<1x8x128xbf16> to vector<8x128xbf16>
    %c1_170 = arith.constant 1 : index
    %c0_171 = arith.constant 0 : index
    %c0_172 = arith.constant 0 : index
    %183 = vector.load %arg2[%c1_170, %c0_171, %c0_172] : memref<3x128x16xbf16, #tpu.memory_space<vmem>>, vector<1x128x16xbf16>
    %184 = vector.shape_cast %183 : vector<1x128x16xbf16> to vector<128x16xbf16>
    %cst_173 = arith.constant dense<0.000000e+00> : vector<8x16xf32>
    %185 = tpu.matmul %182, %184, %cst_173 {dimension_numbers = #tpu.dot_dimension_numbers<[1], [0], [0], [1], [0, 0, 1, 1], [], []>} : vector<8x128xbf16>, vector<128x16xbf16>, vector<8x16xf32> -> vector<8x16xf32>
    %186 = arith.addf %180, %185 : vector<8x16xf32>
    %c16 = arith.constant 16 : index
    %c0_174 = arith.constant 0 : index
    %c0_175 = arith.constant 0 : index
    %187 = vector.load %arg1[%c16, %c0_174, %c0_175] : memref<35x8x128xbf16, #tpu.memory_space<vmem>>, vector<1x8x128xbf16>
    %188 = vector.shape_cast %187 : vector<1x8x128xbf16> to vector<8x128xbf16>
    %c2_176 = arith.constant 2 : index
    %c0_177 = arith.constant 0 : index
    %c0_178 = arith.constant 0 : index
    %189 = vector.load %arg2[%c2_176, %c0_177, %c0_178] : memref<3x128x16xbf16, #tpu.memory_space<vmem>>, vector<1x128x16xbf16>
    %190 = vector.shape_cast %189 : vector<1x128x16xbf16> to vector<128x16xbf16>
    %cst_179 = arith.constant dense<0.000000e+00> : vector<8x16xf32>
    %191 = tpu.matmul %188, %190, %cst_179 {dimension_numbers = #tpu.dot_dimension_numbers<[1], [0], [0], [1], [0, 0, 1, 1], [], []>} : vector<8x128xbf16>, vector<128x16xbf16>, vector<8x16xf32> -> vector<8x16xf32>
    %192 = arith.addf %186, %191 : vector<8x16xf32>
    %193 = vector.broadcast %0 : vector<1x16xf32> to vector<8x16xf32>
    %194 = arith.addf %192, %193 : vector<8x16xf32>
    %cst_180 = arith.constant 0.000000e+00 : f32
    %195 = vector.broadcast %cst_180 : f32 to vector<8x16xf32>
    %196 = arith.maximumf %194, %195 : vector<8x16xf32>
    %197 = arith.truncf %196 : vector<8x16xf32> to vector<8x16xbf16>
    %c7_181 = arith.constant 7 : index
    %c0_182 = arith.constant 0 : index
    %c0_183 = arith.constant 0 : index
    %198 = vector.load %arg9[%c7_181, %c0_182, %c0_183] : memref<17x8x16xbf16, #tpu.memory_space<vmem>>, vector<1x8x16xbf16>
    %199 = vector.shape_cast %198 : vector<1x8x16xbf16> to vector<8x16xbf16>
    %200 = vector.shape_cast %197 : vector<8x16xbf16> to vector<1x8x16xbf16>
    tpu.vector_store %arg9[%c7_181, %c0_182, %c0_183], %200 {strides = array<i32>} : memref<17x8x16xbf16, #tpu.memory_space<vmem>>, vector<1x8x16xbf16>,
    %c16_184 = arith.constant 16 : index
    %c0_185 = arith.constant 0 : index
    %c0_186 = arith.constant 0 : index
    %201 = vector.load %arg1[%c16_184, %c0_185, %c0_186] : memref<35x8x128xbf16, #tpu.memory_space<vmem>>, vector<1x8x128xbf16>
    %202 = vector.shape_cast %201 : vector<1x8x128xbf16> to vector<8x128xbf16>
    %c0_187 = arith.constant 0 : index
    %c0_188 = arith.constant 0 : index
    %c0_189 = arith.constant 0 : index
    %203 = vector.load %arg2[%c0_187, %c0_188, %c0_189] : memref<3x128x16xbf16, #tpu.memory_space<vmem>>, vector<1x128x16xbf16>
    %204 = vector.shape_cast %203 : vector<1x128x16xbf16> to vector<128x16xbf16>
    %cst_190 = arith.constant dense<0.000000e+00> : vector<8x16xf32>
    %205 = tpu.matmul %202, %204, %cst_190 {dimension_numbers = #tpu.dot_dimension_numbers<[1], [0], [0], [1], [0, 0, 1, 1], [], []>} : vector<8x128xbf16>, vector<128x16xbf16>, vector<8x16xf32> -> vector<8x16xf32>
    %c17 = arith.constant 17 : index
    %c0_191 = arith.constant 0 : index
    %c0_192 = arith.constant 0 : index
    %206 = vector.load %arg1[%c17, %c0_191, %c0_192] : memref<35x8x128xbf16, #tpu.memory_space<vmem>>, vector<1x8x128xbf16>
    %207 = vector.shape_cast %206 : vector<1x8x128xbf16> to vector<8x128xbf16>
    %c1_193 = arith.constant 1 : index
    %c0_194 = arith.constant 0 : index
    %c0_195 = arith.constant 0 : index
    %208 = vector.load %arg2[%c1_193, %c0_194, %c0_195] : memref<3x128x16xbf16, #tpu.memory_space<vmem>>, vector<1x128x16xbf16>
    %209 = vector.shape_cast %208 : vector<1x128x16xbf16> to vector<128x16xbf16>
    %cst_196 = arith.constant dense<0.000000e+00> : vector<8x16xf32>
    %210 = tpu.matmul %207, %209, %cst_196 {dimension_numbers = #tpu.dot_dimension_numbers<[1], [0], [0], [1], [0, 0, 1, 1], [], []>} : vector<8x128xbf16>, vector<128x16xbf16>, vector<8x16xf32> -> vector<8x16xf32>
    %211 = arith.addf %205, %210 : vector<8x16xf32>
    %c18 = arith.constant 18 : index
    %c0_197 = arith.constant 0 : index
    %c0_198 = arith.constant 0 : index
    %212 = vector.load %arg1[%c18, %c0_197, %c0_198] : memref<35x8x128xbf16, #tpu.memory_space<vmem>>, vector<1x8x128xbf16>
    %213 = vector.shape_cast %212 : vector<1x8x128xbf16> to vector<8x128xbf16>
    %c2_199 = arith.constant 2 : index
    %c0_200 = arith.constant 0 : index
    %c0_201 = arith.constant 0 : index
    %214 = vector.load %arg2[%c2_199, %c0_200, %c0_201] : memref<3x128x16xbf16, #tpu.memory_space<vmem>>, vector<1x128x16xbf16>
    %215 = vector.shape_cast %214 : vector<1x128x16xbf16> to vector<128x16xbf16>
    %cst_202 = arith.constant dense<0.000000e+00> : vector<8x16xf32>
    %216 = tpu.matmul %213, %215, %cst_202 {dimension_numbers = #tpu.dot_dimension_numbers<[1], [0], [0], [1], [0, 0, 1, 1], [], []>} : vector<8x128xbf16>, vector<128x16xbf16>, vector<8x16xf32> -> vector<8x16xf32>
    %217 = arith.addf %211, %216 : vector<8x16xf32>
    %218 = vector.broadcast %0 : vector<1x16xf32> to vector<8x16xf32>
    %219 = arith.addf %217, %218 : vector<8x16xf32>
    %cst_203 = arith.constant 0.000000e+00 : f32
    %220 = vector.broadcast %cst_203 : f32 to vector<8x16xf32>
    %221 = arith.maximumf %219, %220 : vector<8x16xf32>
    %222 = arith.truncf %221 : vector<8x16xf32> to vector<8x16xbf16>
    %c8_204 = arith.constant 8 : index
    %c0_205 = arith.constant 0 : index
    %c0_206 = arith.constant 0 : index
    %223 = vector.load %arg9[%c8_204, %c0_205, %c0_206] : memref<17x8x16xbf16, #tpu.memory_space<vmem>>, vector<1x8x16xbf16>
    %224 = vector.shape_cast %223 : vector<1x8x16xbf16> to vector<8x16xbf16>
    %225 = vector.shape_cast %222 : vector<8x16xbf16> to vector<1x8x16xbf16>
    tpu.vector_store %arg9[%c8_204, %c0_205, %c0_206], %225 {strides = array<i32>} : memref<17x8x16xbf16, #tpu.memory_space<vmem>>, vector<1x8x16xbf16>,
    %c18_207 = arith.constant 18 : index
    %c0_208 = arith.constant 0 : index
    %c0_209 = arith.constant 0 : index
    %226 = vector.load %arg1[%c18_207, %c0_208, %c0_209] : memref<35x8x128xbf16, #tpu.memory_space<vmem>>, vector<1x8x128xbf16>
    %227 = vector.shape_cast %226 : vector<1x8x128xbf16> to vector<8x128xbf16>
    %c0_210 = arith.constant 0 : index
    %c0_211 = arith.constant 0 : index
    %c0_212 = arith.constant 0 : index
    %228 = vector.load %arg2[%c0_210, %c0_211, %c0_212] : memref<3x128x16xbf16, #tpu.memory_space<vmem>>, vector<1x128x16xbf16>
    %229 = vector.shape_cast %228 : vector<1x128x16xbf16> to vector<128x16xbf16>
    %cst_213 = arith.constant dense<0.000000e+00> : vector<8x16xf32>
    %230 = tpu.matmul %227, %229, %cst_213 {dimension_numbers = #tpu.dot_dimension_numbers<[1], [0], [0], [1], [0, 0, 1, 1], [], []>} : vector<8x128xbf16>, vector<128x16xbf16>, vector<8x16xf32> -> vector<8x16xf32>
    %c19 = arith.constant 19 : index
    %c0_214 = arith.constant 0 : index
    %c0_215 = arith.constant 0 : index
    %231 = vector.load %arg1[%c19, %c0_214, %c0_215] : memref<35x8x128xbf16, #tpu.memory_space<vmem>>, vector<1x8x128xbf16>
    %232 = vector.shape_cast %231 : vector<1x8x128xbf16> to vector<8x128xbf16>
    %c1_216 = arith.constant 1 : index
    %c0_217 = arith.constant 0 : index
    %c0_218 = arith.constant 0 : index
    %233 = vector.load %arg2[%c1_216, %c0_217, %c0_218] : memref<3x128x16xbf16, #tpu.memory_space<vmem>>, vector<1x128x16xbf16>
    %234 = vector.shape_cast %233 : vector<1x128x16xbf16> to vector<128x16xbf16>
    %cst_219 = arith.constant dense<0.000000e+00> : vector<8x16xf32>
    %235 = tpu.matmul %232, %234, %cst_219 {dimension_numbers = #tpu.dot_dimension_numbers<[1], [0], [0], [1], [0, 0, 1, 1], [], []>} : vector<8x128xbf16>, vector<128x16xbf16>, vector<8x16xf32> -> vector<8x16xf32>
    %236 = arith.addf %230, %235 : vector<8x16xf32>
    %c20 = arith.constant 20 : index
    %c0_220 = arith.constant 0 : index
    %c0_221 = arith.constant 0 : index
    %237 = vector.load %arg1[%c20, %c0_220, %c0_221] : memref<35x8x128xbf16, #tpu.memory_space<vmem>>, vector<1x8x128xbf16>
    %238 = vector.shape_cast %237 : vector<1x8x128xbf16> to vector<8x128xbf16>
    %c2_222 = arith.constant 2 : index
    %c0_223 = arith.constant 0 : index
    %c0_224 = arith.constant 0 : index
    %239 = vector.load %arg2[%c2_222, %c0_223, %c0_224] : memref<3x128x16xbf16, #tpu.memory_space<vmem>>, vector<1x128x16xbf16>
    %240 = vector.shape_cast %239 : vector<1x128x16xbf16> to vector<128x16xbf16>
    %cst_225 = arith.constant dense<0.000000e+00> : vector<8x16xf32>
    %241 = tpu.matmul %238, %240, %cst_225 {dimension_numbers = #tpu.dot_dimension_numbers<[1], [0], [0], [1], [0, 0, 1, 1], [], []>} : vector<8x128xbf16>, vector<128x16xbf16>, vector<8x16xf32> -> vector<8x16xf32>
    %242 = arith.addf %236, %241 : vector<8x16xf32>
    %243 = vector.broadcast %0 : vector<1x16xf32> to vector<8x16xf32>
    %244 = arith.addf %242, %243 : vector<8x16xf32>
    %cst_226 = arith.constant 0.000000e+00 : f32
    %245 = vector.broadcast %cst_226 : f32 to vector<8x16xf32>
    %246 = arith.maximumf %244, %245 : vector<8x16xf32>
    %247 = arith.truncf %246 : vector<8x16xf32> to vector<8x16xbf16>
    %c9_227 = arith.constant 9 : index
    %c0_228 = arith.constant 0 : index
    %c0_229 = arith.constant 0 : index
    %248 = vector.load %arg9[%c9_227, %c0_228, %c0_229] : memref<17x8x16xbf16, #tpu.memory_space<vmem>>, vector<1x8x16xbf16>
    %249 = vector.shape_cast %248 : vector<1x8x16xbf16> to vector<8x16xbf16>
    %250 = vector.shape_cast %247 : vector<8x16xbf16> to vector<1x8x16xbf16>
    tpu.vector_store %arg9[%c9_227, %c0_228, %c0_229], %250 {strides = array<i32>} : memref<17x8x16xbf16, #tpu.memory_space<vmem>>, vector<1x8x16xbf16>,
    %c20_230 = arith.constant 20 : index
    %c0_231 = arith.constant 0 : index
    %c0_232 = arith.constant 0 : index
    %251 = vector.load %arg1[%c20_230, %c0_231, %c0_232] : memref<35x8x128xbf16, #tpu.memory_space<vmem>>, vector<1x8x128xbf16>
    %252 = vector.shape_cast %251 : vector<1x8x128xbf16> to vector<8x128xbf16>
    %c0_233 = arith.constant 0 : index
    %c0_234 = arith.constant 0 : index
    %c0_235 = arith.constant 0 : index
    %253 = vector.load %arg2[%c0_233, %c0_234, %c0_235] : memref<3x128x16xbf16, #tpu.memory_space<vmem>>, vector<1x128x16xbf16>
    %254 = vector.shape_cast %253 : vector<1x128x16xbf16> to vector<128x16xbf16>
    %cst_236 = arith.constant dense<0.000000e+00> : vector<8x16xf32>
    %255 = tpu.matmul %252, %254, %cst_236 {dimension_numbers = #tpu.dot_dimension_numbers<[1], [0], [0], [1], [0, 0, 1, 1], [], []>} : vector<8x128xbf16>, vector<128x16xbf16>, vector<8x16xf32> -> vector<8x16xf32>
    %c21 = arith.constant 21 : index
    %c0_237 = arith.constant 0 : index
    %c0_238 = arith.constant 0 : index
    %256 = vector.load %arg1[%c21, %c0_237, %c0_238] : memref<35x8x128xbf16, #tpu.memory_space<vmem>>, vector<1x8x128xbf16>
    %257 = vector.shape_cast %256 : vector<1x8x128xbf16> to vector<8x128xbf16>
    %c1_239 = arith.constant 1 : index
    %c0_240 = arith.constant 0 : index
    %c0_241 = arith.constant 0 : index
    %258 = vector.load %arg2[%c1_239, %c0_240, %c0_241] : memref<3x128x16xbf16, #tpu.memory_space<vmem>>, vector<1x128x16xbf16>
    %259 = vector.shape_cast %258 : vector<1x128x16xbf16> to vector<128x16xbf16>
    %cst_242 = arith.constant dense<0.000000e+00> : vector<8x16xf32>
    %260 = tpu.matmul %257, %259, %cst_242 {dimension_numbers = #tpu.dot_dimension_numbers<[1], [0], [0], [1], [0, 0, 1, 1], [], []>} : vector<8x128xbf16>, vector<128x16xbf16>, vector<8x16xf32> -> vector<8x16xf32>
    %261 = arith.addf %255, %260 : vector<8x16xf32>
    %c22 = arith.constant 22 : index
    %c0_243 = arith.constant 0 : index
    %c0_244 = arith.constant 0 : index
    %262 = vector.load %arg1[%c22, %c0_243, %c0_244] : memref<35x8x128xbf16, #tpu.memory_space<vmem>>, vector<1x8x128xbf16>
    %263 = vector.shape_cast %262 : vector<1x8x128xbf16> to vector<8x128xbf16>
    %c2_245 = arith.constant 2 : index
    %c0_246 = arith.constant 0 : index
    %c0_247 = arith.constant 0 : index
    %264 = vector.load %arg2[%c2_245, %c0_246, %c0_247] : memref<3x128x16xbf16, #tpu.memory_space<vmem>>, vector<1x128x16xbf16>
    %265 = vector.shape_cast %264 : vector<1x128x16xbf16> to vector<128x16xbf16>
    %cst_248 = arith.constant dense<0.000000e+00> : vector<8x16xf32>
    %266 = tpu.matmul %263, %265, %cst_248 {dimension_numbers = #tpu.dot_dimension_numbers<[1], [0], [0], [1], [0, 0, 1, 1], [], []>} : vector<8x128xbf16>, vector<128x16xbf16>, vector<8x16xf32> -> vector<8x16xf32>
    %267 = arith.addf %261, %266 : vector<8x16xf32>
    %268 = vector.broadcast %0 : vector<1x16xf32> to vector<8x16xf32>
    %269 = arith.addf %267, %268 : vector<8x16xf32>
    %cst_249 = arith.constant 0.000000e+00 : f32
    %270 = vector.broadcast %cst_249 : f32 to vector<8x16xf32>
    %271 = arith.maximumf %269, %270 : vector<8x16xf32>
    %272 = arith.truncf %271 : vector<8x16xf32> to vector<8x16xbf16>
    %c10_250 = arith.constant 10 : index
    %c0_251 = arith.constant 0 : index
    %c0_252 = arith.constant 0 : index
    %273 = vector.load %arg9[%c10_250, %c0_251, %c0_252] : memref<17x8x16xbf16, #tpu.memory_space<vmem>>, vector<1x8x16xbf16>
    %274 = vector.shape_cast %273 : vector<1x8x16xbf16> to vector<8x16xbf16>
    %275 = vector.shape_cast %272 : vector<8x16xbf16> to vector<1x8x16xbf16>
    tpu.vector_store %arg9[%c10_250, %c0_251, %c0_252], %275 {strides = array<i32>} : memref<17x8x16xbf16, #tpu.memory_space<vmem>>, vector<1x8x16xbf16>,
    %c22_253 = arith.constant 22 : index
    %c0_254 = arith.constant 0 : index
    %c0_255 = arith.constant 0 : index
    %276 = vector.load %arg1[%c22_253, %c0_254, %c0_255] : memref<35x8x128xbf16, #tpu.memory_space<vmem>>, vector<1x8x128xbf16>
    %277 = vector.shape_cast %276 : vector<1x8x128xbf16> to vector<8x128xbf16>
    %c0_256 = arith.constant 0 : index
    %c0_257 = arith.constant 0 : index
    %c0_258 = arith.constant 0 : index
    %278 = vector.load %arg2[%c0_256, %c0_257, %c0_258] : memref<3x128x16xbf16, #tpu.memory_space<vmem>>, vector<1x128x16xbf16>
    %279 = vector.shape_cast %278 : vector<1x128x16xbf16> to vector<128x16xbf16>
    %cst_259 = arith.constant dense<0.000000e+00> : vector<8x16xf32>
    %280 = tpu.matmul %277, %279, %cst_259 {dimension_numbers = #tpu.dot_dimension_numbers<[1], [0], [0], [1], [0, 0, 1, 1], [], []>} : vector<8x128xbf16>, vector<128x16xbf16>, vector<8x16xf32> -> vector<8x16xf32>
    %c23 = arith.constant 23 : index
    %c0_260 = arith.constant 0 : index
    %c0_261 = arith.constant 0 : index
    %281 = vector.load %arg1[%c23, %c0_260, %c0_261] : memref<35x8x128xbf16, #tpu.memory_space<vmem>>, vector<1x8x128xbf16>
    %282 = vector.shape_cast %281 : vector<1x8x128xbf16> to vector<8x128xbf16>
    %c1_262 = arith.constant 1 : index
    %c0_263 = arith.constant 0 : index
    %c0_264 = arith.constant 0 : index
    %283 = vector.load %arg2[%c1_262, %c0_263, %c0_264] : memref<3x128x16xbf16, #tpu.memory_space<vmem>>, vector<1x128x16xbf16>
    %284 = vector.shape_cast %283 : vector<1x128x16xbf16> to vector<128x16xbf16>
    %cst_265 = arith.constant dense<0.000000e+00> : vector<8x16xf32>
    %285 = tpu.matmul %282, %284, %cst_265 {dimension_numbers = #tpu.dot_dimension_numbers<[1], [0], [0], [1], [0, 0, 1, 1], [], []>} : vector<8x128xbf16>, vector<128x16xbf16>, vector<8x16xf32> -> vector<8x16xf32>
    %286 = arith.addf %280, %285 : vector<8x16xf32>
    %c24 = arith.constant 24 : index
    %c0_266 = arith.constant 0 : index
    %c0_267 = arith.constant 0 : index
    %287 = vector.load %arg1[%c24, %c0_266, %c0_267] : memref<35x8x128xbf16, #tpu.memory_space<vmem>>, vector<1x8x128xbf16>
    %288 = vector.shape_cast %287 : vector<1x8x128xbf16> to vector<8x128xbf16>
    %c2_268 = arith.constant 2 : index
    %c0_269 = arith.constant 0 : index
    %c0_270 = arith.constant 0 : index
    %289 = vector.load %arg2[%c2_268, %c0_269, %c0_270] : memref<3x128x16xbf16, #tpu.memory_space<vmem>>, vector<1x128x16xbf16>
    %290 = vector.shape_cast %289 : vector<1x128x16xbf16> to vector<128x16xbf16>
    %cst_271 = arith.constant dense<0.000000e+00> : vector<8x16xf32>
    %291 = tpu.matmul %288, %290, %cst_271 {dimension_numbers = #tpu.dot_dimension_numbers<[1], [0], [0], [1], [0, 0, 1, 1], [], []>} : vector<8x128xbf16>, vector<128x16xbf16>, vector<8x16xf32> -> vector<8x16xf32>
    %292 = arith.addf %286, %291 : vector<8x16xf32>
    %293 = vector.broadcast %0 : vector<1x16xf32> to vector<8x16xf32>
    %294 = arith.addf %292, %293 : vector<8x16xf32>
    %cst_272 = arith.constant 0.000000e+00 : f32
    %295 = vector.broadcast %cst_272 : f32 to vector<8x16xf32>
    %296 = arith.maximumf %294, %295 : vector<8x16xf32>
    %297 = arith.truncf %296 : vector<8x16xf32> to vector<8x16xbf16>
    %c11_273 = arith.constant 11 : index
    %c0_274 = arith.constant 0 : index
    %c0_275 = arith.constant 0 : index
    %298 = vector.load %arg9[%c11_273, %c0_274, %c0_275] : memref<17x8x16xbf16, #tpu.memory_space<vmem>>, vector<1x8x16xbf16>
    %299 = vector.shape_cast %298 : vector<1x8x16xbf16> to vector<8x16xbf16>
    %300 = vector.shape_cast %297 : vector<8x16xbf16> to vector<1x8x16xbf16>
    tpu.vector_store %arg9[%c11_273, %c0_274, %c0_275], %300 {strides = array<i32>} : memref<17x8x16xbf16, #tpu.memory_space<vmem>>, vector<1x8x16xbf16>,
    %c24_276 = arith.constant 24 : index
    %c0_277 = arith.constant 0 : index
    %c0_278 = arith.constant 0 : index
    %301 = vector.load %arg1[%c24_276, %c0_277, %c0_278] : memref<35x8x128xbf16, #tpu.memory_space<vmem>>, vector<1x8x128xbf16>
    %302 = vector.shape_cast %301 : vector<1x8x128xbf16> to vector<8x128xbf16>
    %c0_279 = arith.constant 0 : index
    %c0_280 = arith.constant 0 : index
    %c0_281 = arith.constant 0 : index
    %303 = vector.load %arg2[%c0_279, %c0_280, %c0_281] : memref<3x128x16xbf16, #tpu.memory_space<vmem>>, vector<1x128x16xbf16>
    %304 = vector.shape_cast %303 : vector<1x128x16xbf16> to vector<128x16xbf16>
    %cst_282 = arith.constant dense<0.000000e+00> : vector<8x16xf32>
    %305 = tpu.matmul %302, %304, %cst_282 {dimension_numbers = #tpu.dot_dimension_numbers<[1], [0], [0], [1], [0, 0, 1, 1], [], []>} : vector<8x128xbf16>, vector<128x16xbf16>, vector<8x16xf32> -> vector<8x16xf32>
    %c25 = arith.constant 25 : index
    %c0_283 = arith.constant 0 : index
    %c0_284 = arith.constant 0 : index
    %306 = vector.load %arg1[%c25, %c0_283, %c0_284] : memref<35x8x128xbf16, #tpu.memory_space<vmem>>, vector<1x8x128xbf16>
    %307 = vector.shape_cast %306 : vector<1x8x128xbf16> to vector<8x128xbf16>
    %c1_285 = arith.constant 1 : index
    %c0_286 = arith.constant 0 : index
    %c0_287 = arith.constant 0 : index
    %308 = vector.load %arg2[%c1_285, %c0_286, %c0_287] : memref<3x128x16xbf16, #tpu.memory_space<vmem>>, vector<1x128x16xbf16>
    %309 = vector.shape_cast %308 : vector<1x128x16xbf16> to vector<128x16xbf16>
    %cst_288 = arith.constant dense<0.000000e+00> : vector<8x16xf32>
    %310 = tpu.matmul %307, %309, %cst_288 {dimension_numbers = #tpu.dot_dimension_numbers<[1], [0], [0], [1], [0, 0, 1, 1], [], []>} : vector<8x128xbf16>, vector<128x16xbf16>, vector<8x16xf32> -> vector<8x16xf32>
    %311 = arith.addf %305, %310 : vector<8x16xf32>
    %c26 = arith.constant 26 : index
    %c0_289 = arith.constant 0 : index
    %c0_290 = arith.constant 0 : index
    %312 = vector.load %arg1[%c26, %c0_289, %c0_290] : memref<35x8x128xbf16, #tpu.memory_space<vmem>>, vector<1x8x128xbf16>
    %313 = vector.shape_cast %312 : vector<1x8x128xbf16> to vector<8x128xbf16>
    %c2_291 = arith.constant 2 : index
    %c0_292 = arith.constant 0 : index
    %c0_293 = arith.constant 0 : index
    %314 = vector.load %arg2[%c2_291, %c0_292, %c0_293] : memref<3x128x16xbf16, #tpu.memory_space<vmem>>, vector<1x128x16xbf16>
    %315 = vector.shape_cast %314 : vector<1x128x16xbf16> to vector<128x16xbf16>
    %cst_294 = arith.constant dense<0.000000e+00> : vector<8x16xf32>
    %316 = tpu.matmul %313, %315, %cst_294 {dimension_numbers = #tpu.dot_dimension_numbers<[1], [0], [0], [1], [0, 0, 1, 1], [], []>} : vector<8x128xbf16>, vector<128x16xbf16>, vector<8x16xf32> -> vector<8x16xf32>
    %317 = arith.addf %311, %316 : vector<8x16xf32>
    %318 = vector.broadcast %0 : vector<1x16xf32> to vector<8x16xf32>
    %319 = arith.addf %317, %318 : vector<8x16xf32>
    %cst_295 = arith.constant 0.000000e+00 : f32
    %320 = vector.broadcast %cst_295 : f32 to vector<8x16xf32>
    %321 = arith.maximumf %319, %320 : vector<8x16xf32>
    %322 = arith.truncf %321 : vector<8x16xf32> to vector<8x16xbf16>
    %c12_296 = arith.constant 12 : index
    %c0_297 = arith.constant 0 : index
    %c0_298 = arith.constant 0 : index
    %323 = vector.load %arg9[%c12_296, %c0_297, %c0_298] : memref<17x8x16xbf16, #tpu.memory_space<vmem>>, vector<1x8x16xbf16>
    %324 = vector.shape_cast %323 : vector<1x8x16xbf16> to vector<8x16xbf16>
    %325 = vector.shape_cast %322 : vector<8x16xbf16> to vector<1x8x16xbf16>
    tpu.vector_store %arg9[%c12_296, %c0_297, %c0_298], %325 {strides = array<i32>} : memref<17x8x16xbf16, #tpu.memory_space<vmem>>, vector<1x8x16xbf16>,
    %c26_299 = arith.constant 26 : index
    %c0_300 = arith.constant 0 : index
    %c0_301 = arith.constant 0 : index
    %326 = vector.load %arg1[%c26_299, %c0_300, %c0_301] : memref<35x8x128xbf16, #tpu.memory_space<vmem>>, vector<1x8x128xbf16>
    %327 = vector.shape_cast %326 : vector<1x8x128xbf16> to vector<8x128xbf16>
    %c0_302 = arith.constant 0 : index
    %c0_303 = arith.constant 0 : index
    %c0_304 = arith.constant 0 : index
    %328 = vector.load %arg2[%c0_302, %c0_303, %c0_304] : memref<3x128x16xbf16, #tpu.memory_space<vmem>>, vector<1x128x16xbf16>
    %329 = vector.shape_cast %328 : vector<1x128x16xbf16> to vector<128x16xbf16>
    %cst_305 = arith.constant dense<0.000000e+00> : vector<8x16xf32>
    %330 = tpu.matmul %327, %329, %cst_305 {dimension_numbers = #tpu.dot_dimension_numbers<[1], [0], [0], [1], [0, 0, 1, 1], [], []>} : vector<8x128xbf16>, vector<128x16xbf16>, vector<8x16xf32> -> vector<8x16xf32>
    %c27 = arith.constant 27 : index
    %c0_306 = arith.constant 0 : index
    %c0_307 = arith.constant 0 : index
    %331 = vector.load %arg1[%c27, %c0_306, %c0_307] : memref<35x8x128xbf16, #tpu.memory_space<vmem>>, vector<1x8x128xbf16>
    %332 = vector.shape_cast %331 : vector<1x8x128xbf16> to vector<8x128xbf16>
    %c1_308 = arith.constant 1 : index
    %c0_309 = arith.constant 0 : index
    %c0_310 = arith.constant 0 : index
    %333 = vector.load %arg2[%c1_308, %c0_309, %c0_310] : memref<3x128x16xbf16, #tpu.memory_space<vmem>>, vector<1x128x16xbf16>
    %334 = vector.shape_cast %333 : vector<1x128x16xbf16> to vector<128x16xbf16>
    %cst_311 = arith.constant dense<0.000000e+00> : vector<8x16xf32>
    %335 = tpu.matmul %332, %334, %cst_311 {dimension_numbers = #tpu.dot_dimension_numbers<[1], [0], [0], [1], [0, 0, 1, 1], [], []>} : vector<8x128xbf16>, vector<128x16xbf16>, vector<8x16xf32> -> vector<8x16xf32>
    %336 = arith.addf %330, %335 : vector<8x16xf32>
    %c28 = arith.constant 28 : index
    %c0_312 = arith.constant 0 : index
    %c0_313 = arith.constant 0 : index
    %337 = vector.load %arg1[%c28, %c0_312, %c0_313] : memref<35x8x128xbf16, #tpu.memory_space<vmem>>, vector<1x8x128xbf16>
    %338 = vector.shape_cast %337 : vector<1x8x128xbf16> to vector<8x128xbf16>
    %c2_314 = arith.constant 2 : index
    %c0_315 = arith.constant 0 : index
    %c0_316 = arith.constant 0 : index
    %339 = vector.load %arg2[%c2_314, %c0_315, %c0_316] : memref<3x128x16xbf16, #tpu.memory_space<vmem>>, vector<1x128x16xbf16>
    %340 = vector.shape_cast %339 : vector<1x128x16xbf16> to vector<128x16xbf16>
    %cst_317 = arith.constant dense<0.000000e+00> : vector<8x16xf32>
    %341 = tpu.matmul %338, %340, %cst_317 {dimension_numbers = #tpu.dot_dimension_numbers<[1], [0], [0], [1], [0, 0, 1, 1], [], []>} : vector<8x128xbf16>, vector<128x16xbf16>, vector<8x16xf32> -> vector<8x16xf32>
    %342 = arith.addf %336, %341 : vector<8x16xf32>
    %343 = vector.broadcast %0 : vector<1x16xf32> to vector<8x16xf32>
    %344 = arith.addf %342, %343 : vector<8x16xf32>
    %cst_318 = arith.constant 0.000000e+00 : f32
    %345 = vector.broadcast %cst_318 : f32 to vector<8x16xf32>
    %346 = arith.maximumf %344, %345 : vector<8x16xf32>
    %347 = arith.truncf %346 : vector<8x16xf32> to vector<8x16xbf16>
    %c13_319 = arith.constant 13 : index
    %c0_320 = arith.constant 0 : index
    %c0_321 = arith.constant 0 : index
    %348 = vector.load %arg9[%c13_319, %c0_320, %c0_321] : memref<17x8x16xbf16, #tpu.memory_space<vmem>>, vector<1x8x16xbf16>
    %349 = vector.shape_cast %348 : vector<1x8x16xbf16> to vector<8x16xbf16>
    %350 = vector.shape_cast %347 : vector<8x16xbf16> to vector<1x8x16xbf16>
    tpu.vector_store %arg9[%c13_319, %c0_320, %c0_321], %350 {strides = array<i32>} : memref<17x8x16xbf16, #tpu.memory_space<vmem>>, vector<1x8x16xbf16>,
    %c28_322 = arith.constant 28 : index
    %c0_323 = arith.constant 0 : index
    %c0_324 = arith.constant 0 : index
    %351 = vector.load %arg1[%c28_322, %c0_323, %c0_324] : memref<35x8x128xbf16, #tpu.memory_space<vmem>>, vector<1x8x128xbf16>
    %352 = vector.shape_cast %351 : vector<1x8x128xbf16> to vector<8x128xbf16>
    %c0_325 = arith.constant 0 : index
    %c0_326 = arith.constant 0 : index
    %c0_327 = arith.constant 0 : index
    %353 = vector.load %arg2[%c0_325, %c0_326, %c0_327] : memref<3x128x16xbf16, #tpu.memory_space<vmem>>, vector<1x128x16xbf16>
    %354 = vector.shape_cast %353 : vector<1x128x16xbf16> to vector<128x16xbf16>
    %cst_328 = arith.constant dense<0.000000e+00> : vector<8x16xf32>
    %355 = tpu.matmul %352, %354, %cst_328 {dimension_numbers = #tpu.dot_dimension_numbers<[1], [0], [0], [1], [0, 0, 1, 1], [], []>} : vector<8x128xbf16>, vector<128x16xbf16>, vector<8x16xf32> -> vector<8x16xf32>
    %c29 = arith.constant 29 : index
    %c0_329 = arith.constant 0 : index
    %c0_330 = arith.constant 0 : index
    %356 = vector.load %arg1[%c29, %c0_329, %c0_330] : memref<35x8x128xbf16, #tpu.memory_space<vmem>>, vector<1x8x128xbf16>
    %357 = vector.shape_cast %356 : vector<1x8x128xbf16> to vector<8x128xbf16>
    %c1_331 = arith.constant 1 : index
    %c0_332 = arith.constant 0 : index
    %c0_333 = arith.constant 0 : index
    %358 = vector.load %arg2[%c1_331, %c0_332, %c0_333] : memref<3x128x16xbf16, #tpu.memory_space<vmem>>, vector<1x128x16xbf16>
    %359 = vector.shape_cast %358 : vector<1x128x16xbf16> to vector<128x16xbf16>
    %cst_334 = arith.constant dense<0.000000e+00> : vector<8x16xf32>
    %360 = tpu.matmul %357, %359, %cst_334 {dimension_numbers = #tpu.dot_dimension_numbers<[1], [0], [0], [1], [0, 0, 1, 1], [], []>} : vector<8x128xbf16>, vector<128x16xbf16>, vector<8x16xf32> -> vector<8x16xf32>
    %361 = arith.addf %355, %360 : vector<8x16xf32>
    %c30 = arith.constant 30 : index
    %c0_335 = arith.constant 0 : index
    %c0_336 = arith.constant 0 : index
    %362 = vector.load %arg1[%c30, %c0_335, %c0_336] : memref<35x8x128xbf16, #tpu.memory_space<vmem>>, vector<1x8x128xbf16>
    %363 = vector.shape_cast %362 : vector<1x8x128xbf16> to vector<8x128xbf16>
    %c2_337 = arith.constant 2 : index
    %c0_338 = arith.constant 0 : index
    %c0_339 = arith.constant 0 : index
    %364 = vector.load %arg2[%c2_337, %c0_338, %c0_339] : memref<3x128x16xbf16, #tpu.memory_space<vmem>>, vector<1x128x16xbf16>
    %365 = vector.shape_cast %364 : vector<1x128x16xbf16> to vector<128x16xbf16>
    %cst_340 = arith.constant dense<0.000000e+00> : vector<8x16xf32>
    %366 = tpu.matmul %363, %365, %cst_340 {dimension_numbers = #tpu.dot_dimension_numbers<[1], [0], [0], [1], [0, 0, 1, 1], [], []>} : vector<8x128xbf16>, vector<128x16xbf16>, vector<8x16xf32> -> vector<8x16xf32>
    %367 = arith.addf %361, %366 : vector<8x16xf32>
    %368 = vector.broadcast %0 : vector<1x16xf32> to vector<8x16xf32>
    %369 = arith.addf %367, %368 : vector<8x16xf32>
    %cst_341 = arith.constant 0.000000e+00 : f32
    %370 = vector.broadcast %cst_341 : f32 to vector<8x16xf32>
    %371 = arith.maximumf %369, %370 : vector<8x16xf32>
    %372 = arith.truncf %371 : vector<8x16xf32> to vector<8x16xbf16>
    %c14_342 = arith.constant 14 : index
    %c0_343 = arith.constant 0 : index
    %c0_344 = arith.constant 0 : index
    %373 = vector.load %arg9[%c14_342, %c0_343, %c0_344] : memref<17x8x16xbf16, #tpu.memory_space<vmem>>, vector<1x8x16xbf16>
    %374 = vector.shape_cast %373 : vector<1x8x16xbf16> to vector<8x16xbf16>
    %375 = vector.shape_cast %372 : vector<8x16xbf16> to vector<1x8x16xbf16>
    tpu.vector_store %arg9[%c14_342, %c0_343, %c0_344], %375 {strides = array<i32>} : memref<17x8x16xbf16, #tpu.memory_space<vmem>>, vector<1x8x16xbf16>,
    %c30_345 = arith.constant 30 : index
    %c0_346 = arith.constant 0 : index
    %c0_347 = arith.constant 0 : index
    %376 = vector.load %arg1[%c30_345, %c0_346, %c0_347] : memref<35x8x128xbf16, #tpu.memory_space<vmem>>, vector<1x8x128xbf16>
    %377 = vector.shape_cast %376 : vector<1x8x128xbf16> to vector<8x128xbf16>
    %c0_348 = arith.constant 0 : index
    %c0_349 = arith.constant 0 : index
    %c0_350 = arith.constant 0 : index
    %378 = vector.load %arg2[%c0_348, %c0_349, %c0_350] : memref<3x128x16xbf16, #tpu.memory_space<vmem>>, vector<1x128x16xbf16>
    %379 = vector.shape_cast %378 : vector<1x128x16xbf16> to vector<128x16xbf16>
    %cst_351 = arith.constant dense<0.000000e+00> : vector<8x16xf32>
    %380 = tpu.matmul %377, %379, %cst_351 {dimension_numbers = #tpu.dot_dimension_numbers<[1], [0], [0], [1], [0, 0, 1, 1], [], []>} : vector<8x128xbf16>, vector<128x16xbf16>, vector<8x16xf32> -> vector<8x16xf32>
    %c31 = arith.constant 31 : index
    %c0_352 = arith.constant 0 : index
    %c0_353 = arith.constant 0 : index
    %381 = vector.load %arg1[%c31, %c0_352, %c0_353] : memref<35x8x128xbf16, #tpu.memory_space<vmem>>, vector<1x8x128xbf16>
    %382 = vector.shape_cast %381 : vector<1x8x128xbf16> to vector<8x128xbf16>
    %c1_354 = arith.constant 1 : index
    %c0_355 = arith.constant 0 : index
    %c0_356 = arith.constant 0 : index
    %383 = vector.load %arg2[%c1_354, %c0_355, %c0_356] : memref<3x128x16xbf16, #tpu.memory_space<vmem>>, vector<1x128x16xbf16>
    %384 = vector.shape_cast %383 : vector<1x128x16xbf16> to vector<128x16xbf16>
    %cst_357 = arith.constant dense<0.000000e+00> : vector<8x16xf32>
    %385 = tpu.matmul %382, %384, %cst_357 {dimension_numbers = #tpu.dot_dimension_numbers<[1], [0], [0], [1], [0, 0, 1, 1], [], []>} : vector<8x128xbf16>, vector<128x16xbf16>, vector<8x16xf32> -> vector<8x16xf32>
    %386 = arith.addf %380, %385 : vector<8x16xf32>
    %c32 = arith.constant 32 : index
    %c0_358 = arith.constant 0 : index
    %c0_359 = arith.constant 0 : index
    %387 = vector.load %arg1[%c32, %c0_358, %c0_359] : memref<35x8x128xbf16, #tpu.memory_space<vmem>>, vector<1x8x128xbf16>
    %388 = vector.shape_cast %387 : vector<1x8x128xbf16> to vector<8x128xbf16>
    %c2_360 = arith.constant 2 : index
    %c0_361 = arith.constant 0 : index
    %c0_362 = arith.constant 0 : index
    %389 = vector.load %arg2[%c2_360, %c0_361, %c0_362] : memref<3x128x16xbf16, #tpu.memory_space<vmem>>, vector<1x128x16xbf16>
    %390 = vector.shape_cast %389 : vector<1x128x16xbf16> to vector<128x16xbf16>
    %cst_363 = arith.constant dense<0.000000e+00> : vector<8x16xf32>
    %391 = tpu.matmul %388, %390, %cst_363 {dimension_numbers = #tpu.dot_dimension_numbers<[1], [0], [0], [1], [0, 0, 1, 1], [], []>} : vector<8x128xbf16>, vector<128x16xbf16>, vector<8x16xf32> -> vector<8x16xf32>
    %392 = arith.addf %386, %391 : vector<8x16xf32>
    %393 = vector.broadcast %0 : vector<1x16xf32> to vector<8x16xf32>
    %394 = arith.addf %392, %393 : vector<8x16xf32>
    %cst_364 = arith.constant 0.000000e+00 : f32
    %395 = vector.broadcast %cst_364 : f32 to vector<8x16xf32>
    %396 = arith.maximumf %394, %395 : vector<8x16xf32>
    %397 = arith.truncf %396 : vector<8x16xf32> to vector<8x16xbf16>
    %c15_365 = arith.constant 15 : index
    %c0_366 = arith.constant 0 : index
    %c0_367 = arith.constant 0 : index
    %398 = vector.load %arg9[%c15_365, %c0_366, %c0_367] : memref<17x8x16xbf16, #tpu.memory_space<vmem>>, vector<1x8x16xbf16>
    %399 = vector.shape_cast %398 : vector<1x8x16xbf16> to vector<8x16xbf16>
    %400 = vector.shape_cast %397 : vector<8x16xbf16> to vector<1x8x16xbf16>
    tpu.vector_store %arg9[%c15_365, %c0_366, %c0_367], %400 {strides = array<i32>} : memref<17x8x16xbf16, #tpu.memory_space<vmem>>, vector<1x8x16xbf16>,
    %c32_368 = arith.constant 32 : index
    %c0_369 = arith.constant 0 : index
    %c0_370 = arith.constant 0 : index
    %401 = vector.load %arg1[%c32_368, %c0_369, %c0_370] : memref<35x8x128xbf16, #tpu.memory_space<vmem>>, vector<1x8x128xbf16>
    %402 = vector.shape_cast %401 : vector<1x8x128xbf16> to vector<8x128xbf16>
    %c0_371 = arith.constant 0 : index
    %c0_372 = arith.constant 0 : index
    %c0_373 = arith.constant 0 : index
    %403 = vector.load %arg2[%c0_371, %c0_372, %c0_373] : memref<3x128x16xbf16, #tpu.memory_space<vmem>>, vector<1x128x16xbf16>
    %404 = vector.shape_cast %403 : vector<1x128x16xbf16> to vector<128x16xbf16>
    %cst_374 = arith.constant dense<0.000000e+00> : vector<8x16xf32>
    %405 = tpu.matmul %402, %404, %cst_374 {dimension_numbers = #tpu.dot_dimension_numbers<[1], [0], [0], [1], [0, 0, 1, 1], [], []>} : vector<8x128xbf16>, vector<128x16xbf16>, vector<8x16xf32> -> vector<8x16xf32>
    %c33 = arith.constant 33 : index
    %c0_375 = arith.constant 0 : index
    %c0_376 = arith.constant 0 : index
    %406 = vector.load %arg1[%c33, %c0_375, %c0_376] : memref<35x8x128xbf16, #tpu.memory_space<vmem>>, vector<1x8x128xbf16>
    %407 = vector.shape_cast %406 : vector<1x8x128xbf16> to vector<8x128xbf16>
    %c1_377 = arith.constant 1 : index
    %c0_378 = arith.constant 0 : index
    %c0_379 = arith.constant 0 : index
    %408 = vector.load %arg2[%c1_377, %c0_378, %c0_379] : memref<3x128x16xbf16, #tpu.memory_space<vmem>>, vector<1x128x16xbf16>
    %409 = vector.shape_cast %408 : vector<1x128x16xbf16> to vector<128x16xbf16>
    %cst_380 = arith.constant dense<0.000000e+00> : vector<8x16xf32>
    %410 = tpu.matmul %407, %409, %cst_380 {dimension_numbers = #tpu.dot_dimension_numbers<[1], [0], [0], [1], [0, 0, 1, 1], [], []>} : vector<8x128xbf16>, vector<128x16xbf16>, vector<8x16xf32> -> vector<8x16xf32>
    %411 = arith.addf %405, %410 : vector<8x16xf32>
    %c34 = arith.constant 34 : index
    %c0_381 = arith.constant 0 : index
    %c0_382 = arith.constant 0 : index
    %412 = vector.load %arg1[%c34, %c0_381, %c0_382] : memref<35x8x128xbf16, #tpu.memory_space<vmem>>, vector<1x8x128xbf16>
    %413 = vector.shape_cast %412 : vector<1x8x128xbf16> to vector<8x128xbf16>
    %c2_383 = arith.constant 2 : index
    %c0_384 = arith.constant 0 : index
    %c0_385 = arith.constant 0 : index
    %414 = vector.load %arg2[%c2_383, %c0_384, %c0_385] : memref<3x128x16xbf16, #tpu.memory_space<vmem>>, vector<1x128x16xbf16>
    %415 = vector.shape_cast %414 : vector<1x128x16xbf16> to vector<128x16xbf16>
    %cst_386 = arith.constant dense<0.000000e+00> : vector<8x16xf32>
    %416 = tpu.matmul %413, %415, %cst_386 {dimension_numbers = #tpu.dot_dimension_numbers<[1], [0], [0], [1], [0, 0, 1, 1], [], []>} : vector<8x128xbf16>, vector<128x16xbf16>, vector<8x16xf32> -> vector<8x16xf32>
    %417 = arith.addf %411, %416 : vector<8x16xf32>
    %418 = vector.broadcast %0 : vector<1x16xf32> to vector<8x16xf32>
    %419 = arith.addf %417, %418 : vector<8x16xf32>
    %cst_387 = arith.constant 0.000000e+00 : f32
    %420 = vector.broadcast %cst_387 : f32 to vector<8x16xf32>
    %421 = arith.maximumf %419, %420 : vector<8x16xf32>
    %422 = arith.truncf %421 : vector<8x16xf32> to vector<8x16xbf16>
    %c16_388 = arith.constant 16 : index
    %c0_389 = arith.constant 0 : index
    %c0_390 = arith.constant 0 : index
    %423 = vector.load %arg9[%c16_388, %c0_389, %c0_390] : memref<17x8x16xbf16, #tpu.memory_space<vmem>>, vector<1x8x16xbf16>
    %424 = vector.shape_cast %423 : vector<1x8x16xbf16> to vector<8x16xbf16>
    %425 = vector.shape_cast %422 : vector<8x16xbf16> to vector<1x8x16xbf16>
    tpu.vector_store %arg9[%c16_388, %c0_389, %c0_390], %425 {strides = array<i32>} : memref<17x8x16xbf16, #tpu.memory_space<vmem>>, vector<1x8x16xbf16>,
    %c0_391 = arith.constant 0 : index
    %c0_392 = arith.constant 0 : index
    %426 = vector.load %arg6[%c0_391, %c0_392] : memref<1x32xf32, #tpu.memory_space<vmem>>, vector<1x32xf32>
    %c0_393 = arith.constant 0 : index
    %c0_394 = arith.constant 0 : index
    %c0_395 = arith.constant 0 : index
    %427 = vector.load %arg9[%c0_393, %c0_394, %c0_395] : memref<17x8x16xbf16, #tpu.memory_space<vmem>>, vector<1x8x16xbf16>
    %428 = vector.shape_cast %427 : vector<1x8x16xbf16> to vector<8x16xbf16>
    %c0_396 = arith.constant 0 : index
    %c0_397 = arith.constant 0 : index
    %c0_398 = arith.constant 0 : index
    %429 = vector.load %arg3[%c0_396, %c0_397, %c0_398] : memref<4x16x32xbf16, #tpu.memory_space<vmem>>, vector<1x16x32xbf16>
    %430 = vector.shape_cast %429 : vector<1x16x32xbf16> to vector<16x32xbf16>
    %cst_399 = arith.constant dense<0.000000e+00> : vector<8x32xf32>
    %431 = tpu.matmul %428, %430, %cst_399 {dimension_numbers = #tpu.dot_dimension_numbers<[1], [0], [0], [1], [0, 0, 1, 1], [], []>} : vector<8x16xbf16>, vector<16x32xbf16>, vector<8x32xf32> -> vector<8x32xf32>
    %c1_400 = arith.constant 1 : index
    %c0_401 = arith.constant 0 : index
    %c0_402 = arith.constant 0 : index
    %432 = vector.load %arg9[%c1_400, %c0_401, %c0_402] : memref<17x8x16xbf16, #tpu.memory_space<vmem>>, vector<1x8x16xbf16>
    %433 = vector.shape_cast %432 : vector<1x8x16xbf16> to vector<8x16xbf16>
    %c1_403 = arith.constant 1 : index
    %c0_404 = arith.constant 0 : index
    %c0_405 = arith.constant 0 : index
    %434 = vector.load %arg3[%c1_403, %c0_404, %c0_405] : memref<4x16x32xbf16, #tpu.memory_space<vmem>>, vector<1x16x32xbf16>
    %435 = vector.shape_cast %434 : vector<1x16x32xbf16> to vector<16x32xbf16>
    %cst_406 = arith.constant dense<0.000000e+00> : vector<8x32xf32>
    %436 = tpu.matmul %433, %435, %cst_406 {dimension_numbers = #tpu.dot_dimension_numbers<[1], [0], [0], [1], [0, 0, 1, 1], [], []>} : vector<8x16xbf16>, vector<16x32xbf16>, vector<8x32xf32> -> vector<8x32xf32>
    %437 = arith.addf %431, %436 : vector<8x32xf32>
    %c2_407 = arith.constant 2 : index
    %c0_408 = arith.constant 0 : index
    %c0_409 = arith.constant 0 : index
    %438 = vector.load %arg9[%c2_407, %c0_408, %c0_409] : memref<17x8x16xbf16, #tpu.memory_space<vmem>>, vector<1x8x16xbf16>
    %439 = vector.shape_cast %438 : vector<1x8x16xbf16> to vector<8x16xbf16>
    %c2_410 = arith.constant 2 : index
    %c0_411 = arith.constant 0 : index
    %c0_412 = arith.constant 0 : index
    %440 = vector.load %arg3[%c2_410, %c0_411, %c0_412] : memref<4x16x32xbf16, #tpu.memory_space<vmem>>, vector<1x16x32xbf16>
    %441 = vector.shape_cast %440 : vector<1x16x32xbf16> to vector<16x32xbf16>
    %cst_413 = arith.constant dense<0.000000e+00> : vector<8x32xf32>
    %442 = tpu.matmul %439, %441, %cst_413 {dimension_numbers = #tpu.dot_dimension_numbers<[1], [0], [0], [1], [0, 0, 1, 1], [], []>} : vector<8x16xbf16>, vector<16x32xbf16>, vector<8x32xf32> -> vector<8x32xf32>
    %443 = arith.addf %437, %442 : vector<8x32xf32>
    %c3_414 = arith.constant 3 : index
    %c0_415 = arith.constant 0 : index
    %c0_416 = arith.constant 0 : index
    %444 = vector.load %arg9[%c3_414, %c0_415, %c0_416] : memref<17x8x16xbf16, #tpu.memory_space<vmem>>, vector<1x8x16xbf16>
    %445 = vector.shape_cast %444 : vector<1x8x16xbf16> to vector<8x16xbf16>
    %c3_417 = arith.constant 3 : index
    %c0_418 = arith.constant 0 : index
    %c0_419 = arith.constant 0 : index
    %446 = vector.load %arg3[%c3_417, %c0_418, %c0_419] : memref<4x16x32xbf16, #tpu.memory_space<vmem>>, vector<1x16x32xbf16>
    %447 = vector.shape_cast %446 : vector<1x16x32xbf16> to vector<16x32xbf16>
    %cst_420 = arith.constant dense<0.000000e+00> : vector<8x32xf32>
    %448 = tpu.matmul %445, %447, %cst_420 {dimension_numbers = #tpu.dot_dimension_numbers<[1], [0], [0], [1], [0, 0, 1, 1], [], []>} : vector<8x16xbf16>, vector<16x32xbf16>, vector<8x32xf32> -> vector<8x32xf32>
    %449 = arith.addf %443, %448 : vector<8x32xf32>
    %450 = vector.broadcast %426 : vector<1x32xf32> to vector<8x32xf32>
    %451 = arith.addf %449, %450 : vector<8x32xf32>
    %cst_421 = arith.constant 0.000000e+00 : f32
    %452 = vector.broadcast %cst_421 : f32 to vector<8x32xf32>
    %453 = arith.maximumf %451, %452 : vector<8x32xf32>
    %454 = arith.truncf %453 : vector<8x32xf32> to vector<8x32xbf16>
    %c0_422 = arith.constant 0 : index
    %c0_423 = arith.constant 0 : index
    %c0_424 = arith.constant 0 : index
    %455 = vector.load %arg10[%c0_422, %c0_423, %c0_424] : memref<7x8x32xbf16, #tpu.memory_space<vmem>>, vector<1x8x32xbf16>
    %456 = vector.shape_cast %455 : vector<1x8x32xbf16> to vector<8x32xbf16>
    %457 = vector.shape_cast %454 : vector<8x32xbf16> to vector<1x8x32xbf16>
    tpu.vector_store %arg10[%c0_422, %c0_423, %c0_424], %457 {strides = array<i32>} : memref<7x8x32xbf16, #tpu.memory_space<vmem>>, vector<1x8x32xbf16>,
    %c2_425 = arith.constant 2 : index
    %c0_426 = arith.constant 0 : index
    %c0_427 = arith.constant 0 : index
    %458 = vector.load %arg9[%c2_425, %c0_426, %c0_427] : memref<17x8x16xbf16, #tpu.memory_space<vmem>>, vector<1x8x16xbf16>
    %459 = vector.shape_cast %458 : vector<1x8x16xbf16> to vector<8x16xbf16>
    %c0_428 = arith.constant 0 : index
    %c0_429 = arith.constant 0 : index
    %c0_430 = arith.constant 0 : index
    %460 = vector.load %arg3[%c0_428, %c0_429, %c0_430] : memref<4x16x32xbf16, #tpu.memory_space<vmem>>, vector<1x16x32xbf16>
    %461 = vector.shape_cast %460 : vector<1x16x32xbf16> to vector<16x32xbf16>
    %cst_431 = arith.constant dense<0.000000e+00> : vector<8x32xf32>
    %462 = tpu.matmul %459, %461, %cst_431 {dimension_numbers = #tpu.dot_dimension_numbers<[1], [0], [0], [1], [0, 0, 1, 1], [], []>} : vector<8x16xbf16>, vector<16x32xbf16>, vector<8x32xf32> -> vector<8x32xf32>
    %c3_432 = arith.constant 3 : index
    %c0_433 = arith.constant 0 : index
    %c0_434 = arith.constant 0 : index
    %463 = vector.load %arg9[%c3_432, %c0_433, %c0_434] : memref<17x8x16xbf16, #tpu.memory_space<vmem>>, vector<1x8x16xbf16>
    %464 = vector.shape_cast %463 : vector<1x8x16xbf16> to vector<8x16xbf16>
    %c1_435 = arith.constant 1 : index
    %c0_436 = arith.constant 0 : index
    %c0_437 = arith.constant 0 : index
    %465 = vector.load %arg3[%c1_435, %c0_436, %c0_437] : memref<4x16x32xbf16, #tpu.memory_space<vmem>>, vector<1x16x32xbf16>
    %466 = vector.shape_cast %465 : vector<1x16x32xbf16> to vector<16x32xbf16>
    %cst_438 = arith.constant dense<0.000000e+00> : vector<8x32xf32>
    %467 = tpu.matmul %464, %466, %cst_438 {dimension_numbers = #tpu.dot_dimension_numbers<[1], [0], [0], [1], [0, 0, 1, 1], [], []>} : vector<8x16xbf16>, vector<16x32xbf16>, vector<8x32xf32> -> vector<8x32xf32>
    %468 = arith.addf %462, %467 : vector<8x32xf32>
    %c4_439 = arith.constant 4 : index
    %c0_440 = arith.constant 0 : index
    %c0_441 = arith.constant 0 : index
    %469 = vector.load %arg9[%c4_439, %c0_440, %c0_441] : memref<17x8x16xbf16, #tpu.memory_space<vmem>>, vector<1x8x16xbf16>
    %470 = vector.shape_cast %469 : vector<1x8x16xbf16> to vector<8x16xbf16>
    %c2_442 = arith.constant 2 : index
    %c0_443 = arith.constant 0 : index
    %c0_444 = arith.constant 0 : index
    %471 = vector.load %arg3[%c2_442, %c0_443, %c0_444] : memref<4x16x32xbf16, #tpu.memory_space<vmem>>, vector<1x16x32xbf16>
    %472 = vector.shape_cast %471 : vector<1x16x32xbf16> to vector<16x32xbf16>
    %cst_445 = arith.constant dense<0.000000e+00> : vector<8x32xf32>
    %473 = tpu.matmul %470, %472, %cst_445 {dimension_numbers = #tpu.dot_dimension_numbers<[1], [0], [0], [1], [0, 0, 1, 1], [], []>} : vector<8x16xbf16>, vector<16x32xbf16>, vector<8x32xf32> -> vector<8x32xf32>
    %474 = arith.addf %468, %473 : vector<8x32xf32>
    %c5_446 = arith.constant 5 : index
    %c0_447 = arith.constant 0 : index
    %c0_448 = arith.constant 0 : index
    %475 = vector.load %arg9[%c5_446, %c0_447, %c0_448] : memref<17x8x16xbf16, #tpu.memory_space<vmem>>, vector<1x8x16xbf16>
    %476 = vector.shape_cast %475 : vector<1x8x16xbf16> to vector<8x16xbf16>
    %c3_449 = arith.constant 3 : index
    %c0_450 = arith.constant 0 : index
    %c0_451 = arith.constant 0 : index
    %477 = vector.load %arg3[%c3_449, %c0_450, %c0_451] : memref<4x16x32xbf16, #tpu.memory_space<vmem>>, vector<1x16x32xbf16>
    %478 = vector.shape_cast %477 : vector<1x16x32xbf16> to vector<16x32xbf16>
    %cst_452 = arith.constant dense<0.000000e+00> : vector<8x32xf32>
    %479 = tpu.matmul %476, %478, %cst_452 {dimension_numbers = #tpu.dot_dimension_numbers<[1], [0], [0], [1], [0, 0, 1, 1], [], []>} : vector<8x16xbf16>, vector<16x32xbf16>, vector<8x32xf32> -> vector<8x32xf32>
    %480 = arith.addf %474, %479 : vector<8x32xf32>
    %481 = vector.broadcast %426 : vector<1x32xf32> to vector<8x32xf32>
    %482 = arith.addf %480, %481 : vector<8x32xf32>
    %cst_453 = arith.constant 0.000000e+00 : f32
    %483 = vector.broadcast %cst_453 : f32 to vector<8x32xf32>
    %484 = arith.maximumf %482, %483 : vector<8x32xf32>
    %485 = arith.truncf %484 : vector<8x32xf32> to vector<8x32xbf16>
    %c1_454 = arith.constant 1 : index
    %c0_455 = arith.constant 0 : index
    %c0_456 = arith.constant 0 : index
    %486 = vector.load %arg10[%c1_454, %c0_455, %c0_456] : memref<7x8x32xbf16, #tpu.memory_space<vmem>>, vector<1x8x32xbf16>
    %487 = vector.shape_cast %486 : vector<1x8x32xbf16> to vector<8x32xbf16>
    %488 = vector.shape_cast %485 : vector<8x32xbf16> to vector<1x8x32xbf16>
    tpu.vector_store %arg10[%c1_454, %c0_455, %c0_456], %488 {strides = array<i32>} : memref<7x8x32xbf16, #tpu.memory_space<vmem>>, vector<1x8x32xbf16>,
    %c4_457 = arith.constant 4 : index
    %c0_458 = arith.constant 0 : index
    %c0_459 = arith.constant 0 : index
    %489 = vector.load %arg9[%c4_457, %c0_458, %c0_459] : memref<17x8x16xbf16, #tpu.memory_space<vmem>>, vector<1x8x16xbf16>
    %490 = vector.shape_cast %489 : vector<1x8x16xbf16> to vector<8x16xbf16>
    %c0_460 = arith.constant 0 : index
    %c0_461 = arith.constant 0 : index
    %c0_462 = arith.constant 0 : index
    %491 = vector.load %arg3[%c0_460, %c0_461, %c0_462] : memref<4x16x32xbf16, #tpu.memory_space<vmem>>, vector<1x16x32xbf16>
    %492 = vector.shape_cast %491 : vector<1x16x32xbf16> to vector<16x32xbf16>
    %cst_463 = arith.constant dense<0.000000e+00> : vector<8x32xf32>
    %493 = tpu.matmul %490, %492, %cst_463 {dimension_numbers = #tpu.dot_dimension_numbers<[1], [0], [0], [1], [0, 0, 1, 1], [], []>} : vector<8x16xbf16>, vector<16x32xbf16>, vector<8x32xf32> -> vector<8x32xf32>
    %c5_464 = arith.constant 5 : index
    %c0_465 = arith.constant 0 : index
    %c0_466 = arith.constant 0 : index
    %494 = vector.load %arg9[%c5_464, %c0_465, %c0_466] : memref<17x8x16xbf16, #tpu.memory_space<vmem>>, vector<1x8x16xbf16>
    %495 = vector.shape_cast %494 : vector<1x8x16xbf16> to vector<8x16xbf16>
    %c1_467 = arith.constant 1 : index
    %c0_468 = arith.constant 0 : index
    %c0_469 = arith.constant 0 : index
    %496 = vector.load %arg3[%c1_467, %c0_468, %c0_469] : memref<4x16x32xbf16, #tpu.memory_space<vmem>>, vector<1x16x32xbf16>
    %497 = vector.shape_cast %496 : vector<1x16x32xbf16> to vector<16x32xbf16>
    %cst_470 = arith.constant dense<0.000000e+00> : vector<8x32xf32>
    %498 = tpu.matmul %495, %497, %cst_470 {dimension_numbers = #tpu.dot_dimension_numbers<[1], [0], [0], [1], [0, 0, 1, 1], [], []>} : vector<8x16xbf16>, vector<16x32xbf16>, vector<8x32xf32> -> vector<8x32xf32>
    %499 = arith.addf %493, %498 : vector<8x32xf32>
    %c6_471 = arith.constant 6 : index
    %c0_472 = arith.constant 0 : index
    %c0_473 = arith.constant 0 : index
    %500 = vector.load %arg9[%c6_471, %c0_472, %c0_473] : memref<17x8x16xbf16, #tpu.memory_space<vmem>>, vector<1x8x16xbf16>
    %501 = vector.shape_cast %500 : vector<1x8x16xbf16> to vector<8x16xbf16>
    %c2_474 = arith.constant 2 : index
    %c0_475 = arith.constant 0 : index
    %c0_476 = arith.constant 0 : index
    %502 = vector.load %arg3[%c2_474, %c0_475, %c0_476] : memref<4x16x32xbf16, #tpu.memory_space<vmem>>, vector<1x16x32xbf16>
    %503 = vector.shape_cast %502 : vector<1x16x32xbf16> to vector<16x32xbf16>
    %cst_477 = arith.constant dense<0.000000e+00> : vector<8x32xf32>
    %504 = tpu.matmul %501, %503, %cst_477 {dimension_numbers = #tpu.dot_dimension_numbers<[1], [0], [0], [1], [0, 0, 1, 1], [], []>} : vector<8x16xbf16>, vector<16x32xbf16>, vector<8x32xf32> -> vector<8x32xf32>
    %505 = arith.addf %499, %504 : vector<8x32xf32>
    %c7_478 = arith.constant 7 : index
    %c0_479 = arith.constant 0 : index
    %c0_480 = arith.constant 0 : index
    %506 = vector.load %arg9[%c7_478, %c0_479, %c0_480] : memref<17x8x16xbf16, #tpu.memory_space<vmem>>, vector<1x8x16xbf16>
    %507 = vector.shape_cast %506 : vector<1x8x16xbf16> to vector<8x16xbf16>
    %c3_481 = arith.constant 3 : index
    %c0_482 = arith.constant 0 : index
    %c0_483 = arith.constant 0 : index
    %508 = vector.load %arg3[%c3_481, %c0_482, %c0_483] : memref<4x16x32xbf16, #tpu.memory_space<vmem>>, vector<1x16x32xbf16>
    %509 = vector.shape_cast %508 : vector<1x16x32xbf16> to vector<16x32xbf16>
    %cst_484 = arith.constant dense<0.000000e+00> : vector<8x32xf32>
    %510 = tpu.matmul %507, %509, %cst_484 {dimension_numbers = #tpu.dot_dimension_numbers<[1], [0], [0], [1], [0, 0, 1, 1], [], []>} : vector<8x16xbf16>, vector<16x32xbf16>, vector<8x32xf32> -> vector<8x32xf32>
    %511 = arith.addf %505, %510 : vector<8x32xf32>
    %512 = vector.broadcast %426 : vector<1x32xf32> to vector<8x32xf32>
    %513 = arith.addf %511, %512 : vector<8x32xf32>
    %cst_485 = arith.constant 0.000000e+00 : f32
    %514 = vector.broadcast %cst_485 : f32 to vector<8x32xf32>
    %515 = arith.maximumf %513, %514 : vector<8x32xf32>
    %516 = arith.truncf %515 : vector<8x32xf32> to vector<8x32xbf16>
    %c2_486 = arith.constant 2 : index
    %c0_487 = arith.constant 0 : index
    %c0_488 = arith.constant 0 : index
    %517 = vector.load %arg10[%c2_486, %c0_487, %c0_488] : memref<7x8x32xbf16, #tpu.memory_space<vmem>>, vector<1x8x32xbf16>
    %518 = vector.shape_cast %517 : vector<1x8x32xbf16> to vector<8x32xbf16>
    %519 = vector.shape_cast %516 : vector<8x32xbf16> to vector<1x8x32xbf16>
    tpu.vector_store %arg10[%c2_486, %c0_487, %c0_488], %519 {strides = array<i32>} : memref<7x8x32xbf16, #tpu.memory_space<vmem>>, vector<1x8x32xbf16>,
    %c6_489 = arith.constant 6 : index
    %c0_490 = arith.constant 0 : index
    %c0_491 = arith.constant 0 : index
    %520 = vector.load %arg9[%c6_489, %c0_490, %c0_491] : memref<17x8x16xbf16, #tpu.memory_space<vmem>>, vector<1x8x16xbf16>
    %521 = vector.shape_cast %520 : vector<1x8x16xbf16> to vector<8x16xbf16>
    %c0_492 = arith.constant 0 : index
    %c0_493 = arith.constant 0 : index
    %c0_494 = arith.constant 0 : index
    %522 = vector.load %arg3[%c0_492, %c0_493, %c0_494] : memref<4x16x32xbf16, #tpu.memory_space<vmem>>, vector<1x16x32xbf16>
    %523 = vector.shape_cast %522 : vector<1x16x32xbf16> to vector<16x32xbf16>
    %cst_495 = arith.constant dense<0.000000e+00> : vector<8x32xf32>
    %524 = tpu.matmul %521, %523, %cst_495 {dimension_numbers = #tpu.dot_dimension_numbers<[1], [0], [0], [1], [0, 0, 1, 1], [], []>} : vector<8x16xbf16>, vector<16x32xbf16>, vector<8x32xf32> -> vector<8x32xf32>
    %c7_496 = arith.constant 7 : index
    %c0_497 = arith.constant 0 : index
    %c0_498 = arith.constant 0 : index
    %525 = vector.load %arg9[%c7_496, %c0_497, %c0_498] : memref<17x8x16xbf16, #tpu.memory_space<vmem>>, vector<1x8x16xbf16>
    %526 = vector.shape_cast %525 : vector<1x8x16xbf16> to vector<8x16xbf16>
    %c1_499 = arith.constant 1 : index
    %c0_500 = arith.constant 0 : index
    %c0_501 = arith.constant 0 : index
    %527 = vector.load %arg3[%c1_499, %c0_500, %c0_501] : memref<4x16x32xbf16, #tpu.memory_space<vmem>>, vector<1x16x32xbf16>
    %528 = vector.shape_cast %527 : vector<1x16x32xbf16> to vector<16x32xbf16>
    %cst_502 = arith.constant dense<0.000000e+00> : vector<8x32xf32>
    %529 = tpu.matmul %526, %528, %cst_502 {dimension_numbers = #tpu.dot_dimension_numbers<[1], [0], [0], [1], [0, 0, 1, 1], [], []>} : vector<8x16xbf16>, vector<16x32xbf16>, vector<8x32xf32> -> vector<8x32xf32>
    %530 = arith.addf %524, %529 : vector<8x32xf32>
    %c8_503 = arith.constant 8 : index
    %c0_504 = arith.constant 0 : index
    %c0_505 = arith.constant 0 : index
    %531 = vector.load %arg9[%c8_503, %c0_504, %c0_505] : memref<17x8x16xbf16, #tpu.memory_space<vmem>>, vector<1x8x16xbf16>
    %532 = vector.shape_cast %531 : vector<1x8x16xbf16> to vector<8x16xbf16>
    %c2_506 = arith.constant 2 : index
    %c0_507 = arith.constant 0 : index
    %c0_508 = arith.constant 0 : index
    %533 = vector.load %arg3[%c2_506, %c0_507, %c0_508] : memref<4x16x32xbf16, #tpu.memory_space<vmem>>, vector<1x16x32xbf16>
    %534 = vector.shape_cast %533 : vector<1x16x32xbf16> to vector<16x32xbf16>
    %cst_509 = arith.constant dense<0.000000e+00> : vector<8x32xf32>
    %535 = tpu.matmul %532, %534, %cst_509 {dimension_numbers = #tpu.dot_dimension_numbers<[1], [0], [0], [1], [0, 0, 1, 1], [], []>} : vector<8x16xbf16>, vector<16x32xbf16>, vector<8x32xf32> -> vector<8x32xf32>
    %536 = arith.addf %530, %535 : vector<8x32xf32>
    %c9_510 = arith.constant 9 : index
    %c0_511 = arith.constant 0 : index
    %c0_512 = arith.constant 0 : index
    %537 = vector.load %arg9[%c9_510, %c0_511, %c0_512] : memref<17x8x16xbf16, #tpu.memory_space<vmem>>, vector<1x8x16xbf16>
    %538 = vector.shape_cast %537 : vector<1x8x16xbf16> to vector<8x16xbf16>
    %c3_513 = arith.constant 3 : index
    %c0_514 = arith.constant 0 : index
    %c0_515 = arith.constant 0 : index
    %539 = vector.load %arg3[%c3_513, %c0_514, %c0_515] : memref<4x16x32xbf16, #tpu.memory_space<vmem>>, vector<1x16x32xbf16>
    %540 = vector.shape_cast %539 : vector<1x16x32xbf16> to vector<16x32xbf16>
    %cst_516 = arith.constant dense<0.000000e+00> : vector<8x32xf32>
    %541 = tpu.matmul %538, %540, %cst_516 {dimension_numbers = #tpu.dot_dimension_numbers<[1], [0], [0], [1], [0, 0, 1, 1], [], []>} : vector<8x16xbf16>, vector<16x32xbf16>, vector<8x32xf32> -> vector<8x32xf32>
    %542 = arith.addf %536, %541 : vector<8x32xf32>
    %543 = vector.broadcast %426 : vector<1x32xf32> to vector<8x32xf32>
    %544 = arith.addf %542, %543 : vector<8x32xf32>
    %cst_517 = arith.constant 0.000000e+00 : f32
    %545 = vector.broadcast %cst_517 : f32 to vector<8x32xf32>
    %546 = arith.maximumf %544, %545 : vector<8x32xf32>
    %547 = arith.truncf %546 : vector<8x32xf32> to vector<8x32xbf16>
    %c3_518 = arith.constant 3 : index
    %c0_519 = arith.constant 0 : index
    %c0_520 = arith.constant 0 : index
    %548 = vector.load %arg10[%c3_518, %c0_519, %c0_520] : memref<7x8x32xbf16, #tpu.memory_space<vmem>>, vector<1x8x32xbf16>
    %549 = vector.shape_cast %548 : vector<1x8x32xbf16> to vector<8x32xbf16>
    %550 = vector.shape_cast %547 : vector<8x32xbf16> to vector<1x8x32xbf16>
    tpu.vector_store %arg10[%c3_518, %c0_519, %c0_520], %550 {strides = array<i32>} : memref<7x8x32xbf16, #tpu.memory_space<vmem>>, vector<1x8x32xbf16>,
    %c8_521 = arith.constant 8 : index
    %c0_522 = arith.constant 0 : index
    %c0_523 = arith.constant 0 : index
    %551 = vector.load %arg9[%c8_521, %c0_522, %c0_523] : memref<17x8x16xbf16, #tpu.memory_space<vmem>>, vector<1x8x16xbf16>
    %552 = vector.shape_cast %551 : vector<1x8x16xbf16> to vector<8x16xbf16>
    %c0_524 = arith.constant 0 : index
    %c0_525 = arith.constant 0 : index
    %c0_526 = arith.constant 0 : index
    %553 = vector.load %arg3[%c0_524, %c0_525, %c0_526] : memref<4x16x32xbf16, #tpu.memory_space<vmem>>, vector<1x16x32xbf16>
    %554 = vector.shape_cast %553 : vector<1x16x32xbf16> to vector<16x32xbf16>
    %cst_527 = arith.constant dense<0.000000e+00> : vector<8x32xf32>
    %555 = tpu.matmul %552, %554, %cst_527 {dimension_numbers = #tpu.dot_dimension_numbers<[1], [0], [0], [1], [0, 0, 1, 1], [], []>} : vector<8x16xbf16>, vector<16x32xbf16>, vector<8x32xf32> -> vector<8x32xf32>
    %c9_528 = arith.constant 9 : index
    %c0_529 = arith.constant 0 : index
    %c0_530 = arith.constant 0 : index
    %556 = vector.load %arg9[%c9_528, %c0_529, %c0_530] : memref<17x8x16xbf16, #tpu.memory_space<vmem>>, vector<1x8x16xbf16>
    %557 = vector.shape_cast %556 : vector<1x8x16xbf16> to vector<8x16xbf16>
    %c1_531 = arith.constant 1 : index
    %c0_532 = arith.constant 0 : index
    %c0_533 = arith.constant 0 : index
    %558 = vector.load %arg3[%c1_531, %c0_532, %c0_533] : memref<4x16x32xbf16, #tpu.memory_space<vmem>>, vector<1x16x32xbf16>
    %559 = vector.shape_cast %558 : vector<1x16x32xbf16> to vector<16x32xbf16>
    %cst_534 = arith.constant dense<0.000000e+00> : vector<8x32xf32>
    %560 = tpu.matmul %557, %559, %cst_534 {dimension_numbers = #tpu.dot_dimension_numbers<[1], [0], [0], [1], [0, 0, 1, 1], [], []>} : vector<8x16xbf16>, vector<16x32xbf16>, vector<8x32xf32> -> vector<8x32xf32>
    %561 = arith.addf %555, %560 : vector<8x32xf32>
    %c10_535 = arith.constant 10 : index
    %c0_536 = arith.constant 0 : index
    %c0_537 = arith.constant 0 : index
    %562 = vector.load %arg9[%c10_535, %c0_536, %c0_537] : memref<17x8x16xbf16, #tpu.memory_space<vmem>>, vector<1x8x16xbf16>
    %563 = vector.shape_cast %562 : vector<1x8x16xbf16> to vector<8x16xbf16>
    %c2_538 = arith.constant 2 : index
    %c0_539 = arith.constant 0 : index
    %c0_540 = arith.constant 0 : index
    %564 = vector.load %arg3[%c2_538, %c0_539, %c0_540] : memref<4x16x32xbf16, #tpu.memory_space<vmem>>, vector<1x16x32xbf16>
    %565 = vector.shape_cast %564 : vector<1x16x32xbf16> to vector<16x32xbf16>
    %cst_541 = arith.constant dense<0.000000e+00> : vector<8x32xf32>
    %566 = tpu.matmul %563, %565, %cst_541 {dimension_numbers = #tpu.dot_dimension_numbers<[1], [0], [0], [1], [0, 0, 1, 1], [], []>} : vector<8x16xbf16>, vector<16x32xbf16>, vector<8x32xf32> -> vector<8x32xf32>
    %567 = arith.addf %561, %566 : vector<8x32xf32>
    %c11_542 = arith.constant 11 : index
    %c0_543 = arith.constant 0 : index
    %c0_544 = arith.constant 0 : index
    %568 = vector.load %arg9[%c11_542, %c0_543, %c0_544] : memref<17x8x16xbf16, #tpu.memory_space<vmem>>, vector<1x8x16xbf16>
    %569 = vector.shape_cast %568 : vector<1x8x16xbf16> to vector<8x16xbf16>
    %c3_545 = arith.constant 3 : index
    %c0_546 = arith.constant 0 : index
    %c0_547 = arith.constant 0 : index
    %570 = vector.load %arg3[%c3_545, %c0_546, %c0_547] : memref<4x16x32xbf16, #tpu.memory_space<vmem>>, vector<1x16x32xbf16>
    %571 = vector.shape_cast %570 : vector<1x16x32xbf16> to vector<16x32xbf16>
    %cst_548 = arith.constant dense<0.000000e+00> : vector<8x32xf32>
    %572 = tpu.matmul %569, %571, %cst_548 {dimension_numbers = #tpu.dot_dimension_numbers<[1], [0], [0], [1], [0, 0, 1, 1], [], []>} : vector<8x16xbf16>, vector<16x32xbf16>, vector<8x32xf32> -> vector<8x32xf32>
    %573 = arith.addf %567, %572 : vector<8x32xf32>
    %574 = vector.broadcast %426 : vector<1x32xf32> to vector<8x32xf32>
    %575 = arith.addf %573, %574 : vector<8x32xf32>
    %cst_549 = arith.constant 0.000000e+00 : f32
    %576 = vector.broadcast %cst_549 : f32 to vector<8x32xf32>
    %577 = arith.maximumf %575, %576 : vector<8x32xf32>
    %578 = arith.truncf %577 : vector<8x32xf32> to vector<8x32xbf16>
    %c4_550 = arith.constant 4 : index
    %c0_551 = arith.constant 0 : index
    %c0_552 = arith.constant 0 : index
    %579 = vector.load %arg10[%c4_550, %c0_551, %c0_552] : memref<7x8x32xbf16, #tpu.memory_space<vmem>>, vector<1x8x32xbf16>
    %580 = vector.shape_cast %579 : vector<1x8x32xbf16> to vector<8x32xbf16>
    %581 = vector.shape_cast %578 : vector<8x32xbf16> to vector<1x8x32xbf16>
    tpu.vector_store %arg10[%c4_550, %c0_551, %c0_552], %581 {strides = array<i32>} : memref<7x8x32xbf16, #tpu.memory_space<vmem>>, vector<1x8x32xbf16>,
    %c10_553 = arith.constant 10 : index
    %c0_554 = arith.constant 0 : index
    %c0_555 = arith.constant 0 : index
    %582 = vector.load %arg9[%c10_553, %c0_554, %c0_555] : memref<17x8x16xbf16, #tpu.memory_space<vmem>>, vector<1x8x16xbf16>
    %583 = vector.shape_cast %582 : vector<1x8x16xbf16> to vector<8x16xbf16>
    %c0_556 = arith.constant 0 : index
    %c0_557 = arith.constant 0 : index
    %c0_558 = arith.constant 0 : index
    %584 = vector.load %arg3[%c0_556, %c0_557, %c0_558] : memref<4x16x32xbf16, #tpu.memory_space<vmem>>, vector<1x16x32xbf16>
    %585 = vector.shape_cast %584 : vector<1x16x32xbf16> to vector<16x32xbf16>
    %cst_559 = arith.constant dense<0.000000e+00> : vector<8x32xf32>
    %586 = tpu.matmul %583, %585, %cst_559 {dimension_numbers = #tpu.dot_dimension_numbers<[1], [0], [0], [1], [0, 0, 1, 1], [], []>} : vector<8x16xbf16>, vector<16x32xbf16>, vector<8x32xf32> -> vector<8x32xf32>
    %c11_560 = arith.constant 11 : index
    %c0_561 = arith.constant 0 : index
    %c0_562 = arith.constant 0 : index
    %587 = vector.load %arg9[%c11_560, %c0_561, %c0_562] : memref<17x8x16xbf16, #tpu.memory_space<vmem>>, vector<1x8x16xbf16>
    %588 = vector.shape_cast %587 : vector<1x8x16xbf16> to vector<8x16xbf16>
    %c1_563 = arith.constant 1 : index
    %c0_564 = arith.constant 0 : index
    %c0_565 = arith.constant 0 : index
    %589 = vector.load %arg3[%c1_563, %c0_564, %c0_565] : memref<4x16x32xbf16, #tpu.memory_space<vmem>>, vector<1x16x32xbf16>
    %590 = vector.shape_cast %589 : vector<1x16x32xbf16> to vector<16x32xbf16>
    %cst_566 = arith.constant dense<0.000000e+00> : vector<8x32xf32>
    %591 = tpu.matmul %588, %590, %cst_566 {dimension_numbers = #tpu.dot_dimension_numbers<[1], [0], [0], [1], [0, 0, 1, 1], [], []>} : vector<8x16xbf16>, vector<16x32xbf16>, vector<8x32xf32> -> vector<8x32xf32>
    %592 = arith.addf %586, %591 : vector<8x32xf32>
    %c12_567 = arith.constant 12 : index
    %c0_568 = arith.constant 0 : index
    %c0_569 = arith.constant 0 : index
    %593 = vector.load %arg9[%c12_567, %c0_568, %c0_569] : memref<17x8x16xbf16, #tpu.memory_space<vmem>>, vector<1x8x16xbf16>
    %594 = vector.shape_cast %593 : vector<1x8x16xbf16> to vector<8x16xbf16>
    %c2_570 = arith.constant 2 : index
    %c0_571 = arith.constant 0 : index
    %c0_572 = arith.constant 0 : index
    %595 = vector.load %arg3[%c2_570, %c0_571, %c0_572] : memref<4x16x32xbf16, #tpu.memory_space<vmem>>, vector<1x16x32xbf16>
    %596 = vector.shape_cast %595 : vector<1x16x32xbf16> to vector<16x32xbf16>
    %cst_573 = arith.constant dense<0.000000e+00> : vector<8x32xf32>
    %597 = tpu.matmul %594, %596, %cst_573 {dimension_numbers = #tpu.dot_dimension_numbers<[1], [0], [0], [1], [0, 0, 1, 1], [], []>} : vector<8x16xbf16>, vector<16x32xbf16>, vector<8x32xf32> -> vector<8x32xf32>
    %598 = arith.addf %592, %597 : vector<8x32xf32>
    %c13_574 = arith.constant 13 : index
    %c0_575 = arith.constant 0 : index
    %c0_576 = arith.constant 0 : index
    %599 = vector.load %arg9[%c13_574, %c0_575, %c0_576] : memref<17x8x16xbf16, #tpu.memory_space<vmem>>, vector<1x8x16xbf16>
    %600 = vector.shape_cast %599 : vector<1x8x16xbf16> to vector<8x16xbf16>
    %c3_577 = arith.constant 3 : index
    %c0_578 = arith.constant 0 : index
    %c0_579 = arith.constant 0 : index
    %601 = vector.load %arg3[%c3_577, %c0_578, %c0_579] : memref<4x16x32xbf16, #tpu.memory_space<vmem>>, vector<1x16x32xbf16>
    %602 = vector.shape_cast %601 : vector<1x16x32xbf16> to vector<16x32xbf16>
    %cst_580 = arith.constant dense<0.000000e+00> : vector<8x32xf32>
    %603 = tpu.matmul %600, %602, %cst_580 {dimension_numbers = #tpu.dot_dimension_numbers<[1], [0], [0], [1], [0, 0, 1, 1], [], []>} : vector<8x16xbf16>, vector<16x32xbf16>, vector<8x32xf32> -> vector<8x32xf32>
    %604 = arith.addf %598, %603 : vector<8x32xf32>
    %605 = vector.broadcast %426 : vector<1x32xf32> to vector<8x32xf32>
    %606 = arith.addf %604, %605 : vector<8x32xf32>
    %cst_581 = arith.constant 0.000000e+00 : f32
    %607 = vector.broadcast %cst_581 : f32 to vector<8x32xf32>
    %608 = arith.maximumf %606, %607 : vector<8x32xf32>
    %609 = arith.truncf %608 : vector<8x32xf32> to vector<8x32xbf16>
    %c5_582 = arith.constant 5 : index
    %c0_583 = arith.constant 0 : index
    %c0_584 = arith.constant 0 : index
    %610 = vector.load %arg10[%c5_582, %c0_583, %c0_584] : memref<7x8x32xbf16, #tpu.memory_space<vmem>>, vector<1x8x32xbf16>
    %611 = vector.shape_cast %610 : vector<1x8x32xbf16> to vector<8x32xbf16>
    %612 = vector.shape_cast %609 : vector<8x32xbf16> to vector<1x8x32xbf16>
    tpu.vector_store %arg10[%c5_582, %c0_583, %c0_584], %612 {strides = array<i32>} : memref<7x8x32xbf16, #tpu.memory_space<vmem>>, vector<1x8x32xbf16>,
    %c12_585 = arith.constant 12 : index
    %c0_586 = arith.constant 0 : index
    %c0_587 = arith.constant 0 : index
    %613 = vector.load %arg9[%c12_585, %c0_586, %c0_587] : memref<17x8x16xbf16, #tpu.memory_space<vmem>>, vector<1x8x16xbf16>
    %614 = vector.shape_cast %613 : vector<1x8x16xbf16> to vector<8x16xbf16>
    %c0_588 = arith.constant 0 : index
    %c0_589 = arith.constant 0 : index
    %c0_590 = arith.constant 0 : index
    %615 = vector.load %arg3[%c0_588, %c0_589, %c0_590] : memref<4x16x32xbf16, #tpu.memory_space<vmem>>, vector<1x16x32xbf16>
    %616 = vector.shape_cast %615 : vector<1x16x32xbf16> to vector<16x32xbf16>
    %cst_591 = arith.constant dense<0.000000e+00> : vector<8x32xf32>
    %617 = tpu.matmul %614, %616, %cst_591 {dimension_numbers = #tpu.dot_dimension_numbers<[1], [0], [0], [1], [0, 0, 1, 1], [], []>} : vector<8x16xbf16>, vector<16x32xbf16>, vector<8x32xf32> -> vector<8x32xf32>
    %c13_592 = arith.constant 13 : index
    %c0_593 = arith.constant 0 : index
    %c0_594 = arith.constant 0 : index
    %618 = vector.load %arg9[%c13_592, %c0_593, %c0_594] : memref<17x8x16xbf16, #tpu.memory_space<vmem>>, vector<1x8x16xbf16>
    %619 = vector.shape_cast %618 : vector<1x8x16xbf16> to vector<8x16xbf16>
    %c1_595 = arith.constant 1 : index
    %c0_596 = arith.constant 0 : index
    %c0_597 = arith.constant 0 : index
    %620 = vector.load %arg3[%c1_595, %c0_596, %c0_597] : memref<4x16x32xbf16, #tpu.memory_space<vmem>>, vector<1x16x32xbf16>
    %621 = vector.shape_cast %620 : vector<1x16x32xbf16> to vector<16x32xbf16>
    %cst_598 = arith.constant dense<0.000000e+00> : vector<8x32xf32>
    %622 = tpu.matmul %619, %621, %cst_598 {dimension_numbers = #tpu.dot_dimension_numbers<[1], [0], [0], [1], [0, 0, 1, 1], [], []>} : vector<8x16xbf16>, vector<16x32xbf16>, vector<8x32xf32> -> vector<8x32xf32>
    %623 = arith.addf %617, %622 : vector<8x32xf32>
    %c14_599 = arith.constant 14 : index
    %c0_600 = arith.constant 0 : index
    %c0_601 = arith.constant 0 : index
    %624 = vector.load %arg9[%c14_599, %c0_600, %c0_601] : memref<17x8x16xbf16, #tpu.memory_space<vmem>>, vector<1x8x16xbf16>
    %625 = vector.shape_cast %624 : vector<1x8x16xbf16> to vector<8x16xbf16>
    %c2_602 = arith.constant 2 : index
    %c0_603 = arith.constant 0 : index
    %c0_604 = arith.constant 0 : index
    %626 = vector.load %arg3[%c2_602, %c0_603, %c0_604] : memref<4x16x32xbf16, #tpu.memory_space<vmem>>, vector<1x16x32xbf16>
    %627 = vector.shape_cast %626 : vector<1x16x32xbf16> to vector<16x32xbf16>
    %cst_605 = arith.constant dense<0.000000e+00> : vector<8x32xf32>
    %628 = tpu.matmul %625, %627, %cst_605 {dimension_numbers = #tpu.dot_dimension_numbers<[1], [0], [0], [1], [0, 0, 1, 1], [], []>} : vector<8x16xbf16>, vector<16x32xbf16>, vector<8x32xf32> -> vector<8x32xf32>
    %629 = arith.addf %623, %628 : vector<8x32xf32>
    %c15_606 = arith.constant 15 : index
    %c0_607 = arith.constant 0 : index
    %c0_608 = arith.constant 0 : index
    %630 = vector.load %arg9[%c15_606, %c0_607, %c0_608] : memref<17x8x16xbf16, #tpu.memory_space<vmem>>, vector<1x8x16xbf16>
    %631 = vector.shape_cast %630 : vector<1x8x16xbf16> to vector<8x16xbf16>
    %c3_609 = arith.constant 3 : index
    %c0_610 = arith.constant 0 : index
    %c0_611 = arith.constant 0 : index
    %632 = vector.load %arg3[%c3_609, %c0_610, %c0_611] : memref<4x16x32xbf16, #tpu.memory_space<vmem>>, vector<1x16x32xbf16>
    %633 = vector.shape_cast %632 : vector<1x16x32xbf16> to vector<16x32xbf16>
    %cst_612 = arith.constant dense<0.000000e+00> : vector<8x32xf32>
    %634 = tpu.matmul %631, %633, %cst_612 {dimension_numbers = #tpu.dot_dimension_numbers<[1], [0], [0], [1], [0, 0, 1, 1], [], []>} : vector<8x16xbf16>, vector<16x32xbf16>, vector<8x32xf32> -> vector<8x32xf32>
    %635 = arith.addf %629, %634 : vector<8x32xf32>
    %636 = vector.broadcast %426 : vector<1x32xf32> to vector<8x32xf32>
    %637 = arith.addf %635, %636 : vector<8x32xf32>
    %cst_613 = arith.constant 0.000000e+00 : f32
    %638 = vector.broadcast %cst_613 : f32 to vector<8x32xf32>
    %639 = arith.maximumf %637, %638 : vector<8x32xf32>
    %640 = arith.truncf %639 : vector<8x32xf32> to vector<8x32xbf16>
    %c6_614 = arith.constant 6 : index
    %c0_615 = arith.constant 0 : index
    %c0_616 = arith.constant 0 : index
    %641 = vector.load %arg10[%c6_614, %c0_615, %c0_616] : memref<7x8x32xbf16, #tpu.memory_space<vmem>>, vector<1x8x32xbf16>
    %642 = vector.shape_cast %641 : vector<1x8x32xbf16> to vector<8x32xbf16>
    %643 = vector.shape_cast %640 : vector<8x32xbf16> to vector<1x8x32xbf16>
    tpu.vector_store %arg10[%c6_614, %c0_615, %c0_616], %643 {strides = array<i32>} : memref<7x8x32xbf16, #tpu.memory_space<vmem>>, vector<1x8x32xbf16>,
    %c0_617 = arith.constant 0 : index
    %c0_618 = arith.constant 0 : index
    %644 = vector.load %arg7[%c0_617, %c0_618] : memref<1x64xf32, #tpu.memory_space<vmem>>, vector<1x64xf32>
    %c0_619 = arith.constant 0 : index
    %c0_620 = arith.constant 0 : index
    %c0_621 = arith.constant 0 : index
    %645 = vector.load %arg10[%c0_619, %c0_620, %c0_621] : memref<7x8x32xbf16, #tpu.memory_space<vmem>>, vector<1x8x32xbf16>
    %646 = vector.shape_cast %645 : vector<1x8x32xbf16> to vector<8x32xbf16>
    %c0_622 = arith.constant 0 : index
    %c0_623 = arith.constant 0 : index
    %c0_624 = arith.constant 0 : index
    %647 = vector.load %arg4[%c0_622, %c0_623, %c0_624] : memref<4x32x64xbf16, #tpu.memory_space<vmem>>, vector<1x32x64xbf16>
    %648 = vector.shape_cast %647 : vector<1x32x64xbf16> to vector<32x64xbf16>
    %cst_625 = arith.constant dense<0.000000e+00> : vector<8x64xf32>
    %649 = tpu.matmul %646, %648, %cst_625 {dimension_numbers = #tpu.dot_dimension_numbers<[1], [0], [0], [1], [0, 0, 1, 1], [], []>} : vector<8x32xbf16>, vector<32x64xbf16>, vector<8x64xf32> -> vector<8x64xf32>
    %c1_626 = arith.constant 1 : index
    %c0_627 = arith.constant 0 : index
    %c0_628 = arith.constant 0 : index
    %650 = vector.load %arg10[%c1_626, %c0_627, %c0_628] : memref<7x8x32xbf16, #tpu.memory_space<vmem>>, vector<1x8x32xbf16>
    %651 = vector.shape_cast %650 : vector<1x8x32xbf16> to vector<8x32xbf16>
    %c1_629 = arith.constant 1 : index
    %c0_630 = arith.constant 0 : index
    %c0_631 = arith.constant 0 : index
    %652 = vector.load %arg4[%c1_629, %c0_630, %c0_631] : memref<4x32x64xbf16, #tpu.memory_space<vmem>>, vector<1x32x64xbf16>
    %653 = vector.shape_cast %652 : vector<1x32x64xbf16> to vector<32x64xbf16>
    %cst_632 = arith.constant dense<0.000000e+00> : vector<8x64xf32>
    %654 = tpu.matmul %651, %653, %cst_632 {dimension_numbers = #tpu.dot_dimension_numbers<[1], [0], [0], [1], [0, 0, 1, 1], [], []>} : vector<8x32xbf16>, vector<32x64xbf16>, vector<8x64xf32> -> vector<8x64xf32>
    %655 = arith.addf %649, %654 : vector<8x64xf32>
    %c2_633 = arith.constant 2 : index
    %c0_634 = arith.constant 0 : index
    %c0_635 = arith.constant 0 : index
    %656 = vector.load %arg10[%c2_633, %c0_634, %c0_635] : memref<7x8x32xbf16, #tpu.memory_space<vmem>>, vector<1x8x32xbf16>
    %657 = vector.shape_cast %656 : vector<1x8x32xbf16> to vector<8x32xbf16>
    %c2_636 = arith.constant 2 : index
    %c0_637 = arith.constant 0 : index
    %c0_638 = arith.constant 0 : index
    %658 = vector.load %arg4[%c2_636, %c0_637, %c0_638] : memref<4x32x64xbf16, #tpu.memory_space<vmem>>, vector<1x32x64xbf16>
    %659 = vector.shape_cast %658 : vector<1x32x64xbf16> to vector<32x64xbf16>
    %cst_639 = arith.constant dense<0.000000e+00> : vector<8x64xf32>
    %660 = tpu.matmul %657, %659, %cst_639 {dimension_numbers = #tpu.dot_dimension_numbers<[1], [0], [0], [1], [0, 0, 1, 1], [], []>} : vector<8x32xbf16>, vector<32x64xbf16>, vector<8x64xf32> -> vector<8x64xf32>
    %661 = arith.addf %655, %660 : vector<8x64xf32>
    %c3_640 = arith.constant 3 : index
    %c0_641 = arith.constant 0 : index
    %c0_642 = arith.constant 0 : index
    %662 = vector.load %arg10[%c3_640, %c0_641, %c0_642] : memref<7x8x32xbf16, #tpu.memory_space<vmem>>, vector<1x8x32xbf16>
    %663 = vector.shape_cast %662 : vector<1x8x32xbf16> to vector<8x32xbf16>
    %c3_643 = arith.constant 3 : index
    %c0_644 = arith.constant 0 : index
    %c0_645 = arith.constant 0 : index
    %664 = vector.load %arg4[%c3_643, %c0_644, %c0_645] : memref<4x32x64xbf16, #tpu.memory_space<vmem>>, vector<1x32x64xbf16>
    %665 = vector.shape_cast %664 : vector<1x32x64xbf16> to vector<32x64xbf16>
    %cst_646 = arith.constant dense<0.000000e+00> : vector<8x64xf32>
    %666 = tpu.matmul %663, %665, %cst_646 {dimension_numbers = #tpu.dot_dimension_numbers<[1], [0], [0], [1], [0, 0, 1, 1], [], []>} : vector<8x32xbf16>, vector<32x64xbf16>, vector<8x64xf32> -> vector<8x64xf32>
    %667 = arith.addf %661, %666 : vector<8x64xf32>
    %668 = vector.broadcast %644 : vector<1x64xf32> to vector<8x64xf32>
    %669 = arith.addf %667, %668 : vector<8x64xf32>
    %cst_647 = arith.constant 0.000000e+00 : f32
    %670 = vector.broadcast %cst_647 : f32 to vector<8x64xf32>
    %671 = arith.maximumf %669, %670 : vector<8x64xf32>
    %c2_648 = arith.constant 2 : index
    %c0_649 = arith.constant 0 : index
    %c0_650 = arith.constant 0 : index
    %672 = vector.load %arg10[%c2_648, %c0_649, %c0_650] : memref<7x8x32xbf16, #tpu.memory_space<vmem>>, vector<1x8x32xbf16>
    %673 = vector.shape_cast %672 : vector<1x8x32xbf16> to vector<8x32xbf16>
    %c0_651 = arith.constant 0 : index
    %c0_652 = arith.constant 0 : index
    %c0_653 = arith.constant 0 : index
    %674 = vector.load %arg4[%c0_651, %c0_652, %c0_653] : memref<4x32x64xbf16, #tpu.memory_space<vmem>>, vector<1x32x64xbf16>
    %675 = vector.shape_cast %674 : vector<1x32x64xbf16> to vector<32x64xbf16>
    %cst_654 = arith.constant dense<0.000000e+00> : vector<8x64xf32>
    %676 = tpu.matmul %673, %675, %cst_654 {dimension_numbers = #tpu.dot_dimension_numbers<[1], [0], [0], [1], [0, 0, 1, 1], [], []>} : vector<8x32xbf16>, vector<32x64xbf16>, vector<8x64xf32> -> vector<8x64xf32>
    %c3_655 = arith.constant 3 : index
    %c0_656 = arith.constant 0 : index
    %c0_657 = arith.constant 0 : index
    %677 = vector.load %arg10[%c3_655, %c0_656, %c0_657] : memref<7x8x32xbf16, #tpu.memory_space<vmem>>, vector<1x8x32xbf16>
    %678 = vector.shape_cast %677 : vector<1x8x32xbf16> to vector<8x32xbf16>
    %c1_658 = arith.constant 1 : index
    %c0_659 = arith.constant 0 : index
    %c0_660 = arith.constant 0 : index
    %679 = vector.load %arg4[%c1_658, %c0_659, %c0_660] : memref<4x32x64xbf16, #tpu.memory_space<vmem>>, vector<1x32x64xbf16>
    %680 = vector.shape_cast %679 : vector<1x32x64xbf16> to vector<32x64xbf16>
    %cst_661 = arith.constant dense<0.000000e+00> : vector<8x64xf32>
    %681 = tpu.matmul %678, %680, %cst_661 {dimension_numbers = #tpu.dot_dimension_numbers<[1], [0], [0], [1], [0, 0, 1, 1], [], []>} : vector<8x32xbf16>, vector<32x64xbf16>, vector<8x64xf32> -> vector<8x64xf32>
    %682 = arith.addf %676, %681 : vector<8x64xf32>
    %c4_662 = arith.constant 4 : index
    %c0_663 = arith.constant 0 : index
    %c0_664 = arith.constant 0 : index
    %683 = vector.load %arg10[%c4_662, %c0_663, %c0_664] : memref<7x8x32xbf16, #tpu.memory_space<vmem>>, vector<1x8x32xbf16>
    %684 = vector.shape_cast %683 : vector<1x8x32xbf16> to vector<8x32xbf16>
    %c2_665 = arith.constant 2 : index
    %c0_666 = arith.constant 0 : index
    %c0_667 = arith.constant 0 : index
    %685 = vector.load %arg4[%c2_665, %c0_666, %c0_667] : memref<4x32x64xbf16, #tpu.memory_space<vmem>>, vector<1x32x64xbf16>
    %686 = vector.shape_cast %685 : vector<1x32x64xbf16> to vector<32x64xbf16>
    %cst_668 = arith.constant dense<0.000000e+00> : vector<8x64xf32>
    %687 = tpu.matmul %684, %686, %cst_668 {dimension_numbers = #tpu.dot_dimension_numbers<[1], [0], [0], [1], [0, 0, 1, 1], [], []>} : vector<8x32xbf16>, vector<32x64xbf16>, vector<8x64xf32> -> vector<8x64xf32>
    %688 = arith.addf %682, %687 : vector<8x64xf32>
    %c5_669 = arith.constant 5 : index
    %c0_670 = arith.constant 0 : index
    %c0_671 = arith.constant 0 : index
    %689 = vector.load %arg10[%c5_669, %c0_670, %c0_671] : memref<7x8x32xbf16, #tpu.memory_space<vmem>>, vector<1x8x32xbf16>
    %690 = vector.shape_cast %689 : vector<1x8x32xbf16> to vector<8x32xbf16>
    %c3_672 = arith.constant 3 : index
    %c0_673 = arith.constant 0 : index
    %c0_674 = arith.constant 0 : index
    %691 = vector.load %arg4[%c3_672, %c0_673, %c0_674] : memref<4x32x64xbf16, #tpu.memory_space<vmem>>, vector<1x32x64xbf16>
    %692 = vector.shape_cast %691 : vector<1x32x64xbf16> to vector<32x64xbf16>
    %cst_675 = arith.constant dense<0.000000e+00> : vector<8x64xf32>
    %693 = tpu.matmul %690, %692, %cst_675 {dimension_numbers = #tpu.dot_dimension_numbers<[1], [0], [0], [1], [0, 0, 1, 1], [], []>} : vector<8x32xbf16>, vector<32x64xbf16>, vector<8x64xf32> -> vector<8x64xf32>
    %694 = arith.addf %688, %693 : vector<8x64xf32>
    %695 = vector.broadcast %644 : vector<1x64xf32> to vector<8x64xf32>
    %696 = arith.addf %694, %695 : vector<8x64xf32>
    %cst_676 = arith.constant 0.000000e+00 : f32
    %697 = vector.broadcast %cst_676 : f32 to vector<8x64xf32>
    %698 = arith.maximumf %696, %697 : vector<8x64xf32>
    %699 = arith.maximumf %671, %698 : vector<8x64xf32>
    %c0_677 = arith.constant 0 : index
    %c0_678 = arith.constant 0 : index
    %700 = vector.load %arg8[%c0_677, %c0_678] : memref<8x64xf32, #tpu.memory_space<vmem>>, vector<8x64xf32>
    tpu.vector_store %arg8[%c0_677, %c0_678], %699 {strides = array<i32>} : memref<8x64xf32, #tpu.memory_space<vmem>>, vector<8x64xf32>,
    return
  }
  func.func @transform_0(%arg0: i32) -> (i32, i32, i32) {
    %c0_i32 = arith.constant 0 : i32
    %c0_i32_0 = arith.constant 0 : i32
    %c0_i32_1 = arith.constant 0 : i32
    return %c0_i32, %arg0, %c0_i32_0 : i32, i32, i32
  }
  func.func @transform_1(%arg0: i32) -> (i32, i32, i32) {
    %c0_i32 = arith.constant 0 : i32
    %c0_i32_0 = arith.constant 0 : i32
    %c0_i32_1 = arith.constant 0 : i32
    %c0_i32_2 = arith.constant 0 : i32
    return %c0_i32, %c0_i32_0, %c0_i32_1 : i32, i32, i32
  }
  func.func @transform_2(%arg0: i32) -> (i32, i32, i32) {
    %c0_i32 = arith.constant 0 : i32
    %c0_i32_0 = arith.constant 0 : i32
    %c0_i32_1 = arith.constant 0 : i32
    %c0_i32_2 = arith.constant 0 : i32
    return %c0_i32, %c0_i32_0, %c0_i32_1 : i32, i32, i32
  }
  func.func @transform_3(%arg0: i32) -> (i32, i32, i32) {
    %c0_i32 = arith.constant 0 : i32
    %c0_i32_0 = arith.constant 0 : i32
    %c0_i32_1 = arith.constant 0 : i32
    %c0_i32_2 = arith.constant 0 : i32
    return %c0_i32, %c0_i32_0, %c0_i32_1 : i32, i32, i32
  }
  func.func @transform_4(%arg0: i32) -> (i32, i32) {
    %c0_i32 = arith.constant 0 : i32
    %c0_i32_0 = arith.constant 0 : i32
    %c0_i32_1 = arith.constant 0 : i32
    return %c0_i32, %c0_i32_0 : i32, i32
  }
  func.func @transform_5(%arg0: i32) -> (i32, i32) {
    %c0_i32 = arith.constant 0 : i32
    %c0_i32_0 = arith.constant 0 : i32
    %c0_i32_1 = arith.constant 0 : i32
    return %c0_i32, %c0_i32_0 : i32, i32
  }
  func.func @transform_6(%arg0: i32) -> (i32, i32) {
    %c0_i32 = arith.constant 0 : i32
    %c0_i32_0 = arith.constant 0 : i32
    %c0_i32_1 = arith.constant 0 : i32
    return %c0_i32, %c0_i32_0 : i32, i32
  }
  func.func @transform_7(%arg0: i32) -> (i32, i32) {
    %c0_i32 = arith.constant 0 : i32
    %c0_i32_0 = arith.constant 0 : i32
    return %arg0, %c0_i32 : i32, i32
  }
}

module attributes {stable_mosaic.version = 11 : i64} {
  func.func @tail_kernel(%arg0: i32, %arg1: memref<2xi32, #tpu.memory_space<smem>>, %arg2: memref<16x64xf32, #tpu.memory_space<vmem>>, %arg3: memref<16x64xf32, #tpu.memory_space<vmem>>, %arg4: memref<64x64xbf16, #tpu.memory_space<vmem>>, %arg5: memref<1x64xf32, #tpu.memory_space<vmem>>, %arg6: memref<64x64xbf16, #tpu.memory_space<vmem>>, %arg7: memref<1x64xf32, #tpu.memory_space<vmem>>, %arg8: memref<1x64xf32, #tpu.memory_space<vmem>>, %arg9: memref<1x1xf32, #tpu.memory_space<vmem>>, %arg10: memref<64x128xbf16, #tpu.memory_space<vmem>>, %arg11: memref<1x128xf32, #tpu.memory_space<vmem>>, %arg12: memref<128x2xbf16, #tpu.memory_space<vmem>>, %arg13: memref<1x2xf32, #tpu.memory_space<vmem>>, %arg14: memref<2x2xf32, #tpu.memory_space<vmem>>, %arg15: memref<16x1xf32, #tpu.memory_space<vmem>>, %arg16: memref<2x64xf32, #tpu.memory_space<vmem>>) attributes {dimension_semantics = [#tpu.dimension_semantics<arbitrary>], iteration_bounds = array<i64: 1>, scalar_prefetch = 1 : i64, scratch_operands = 1 : i64, tpu.core_type = #tpu.core_type<tc>, window_params = [{pipeline_mode = #tpu.pipeline_mode<synchronous>, transform_indices = @transform_0, window_bounds = array<i64: 16, 64>}, {pipeline_mode = #tpu.pipeline_mode<synchronous>, transform_indices = @transform_1, window_bounds = array<i64: 16, 64>}, {pipeline_mode = #tpu.pipeline_mode<synchronous>, transform_indices = @transform_2, window_bounds = array<i64: 64, 64>}, {pipeline_mode = #tpu.pipeline_mode<synchronous>, transform_indices = @transform_3, window_bounds = array<i64: 1, 64>}, {pipeline_mode = #tpu.pipeline_mode<synchronous>, transform_indices = @transform_4, window_bounds = array<i64: 64, 64>}, {pipeline_mode = #tpu.pipeline_mode<synchronous>, transform_indices = @transform_5, window_bounds = array<i64: 1, 64>}, {pipeline_mode = #tpu.pipeline_mode<synchronous>, transform_indices = @transform_6, window_bounds = array<i64: 1, 64>}, {pipeline_mode = #tpu.pipeline_mode<synchronous>, transform_indices = @transform_7, window_bounds = array<i64: 1, 1>}, {pipeline_mode = #tpu.pipeline_mode<synchronous>, transform_indices = @transform_8, window_bounds = array<i64: 64, 128>}, {pipeline_mode = #tpu.pipeline_mode<synchronous>, transform_indices = @transform_9, window_bounds = array<i64: 1, 128>}, {pipeline_mode = #tpu.pipeline_mode<synchronous>, transform_indices = @transform_10, window_bounds = array<i64: 128, 2>}, {pipeline_mode = #tpu.pipeline_mode<synchronous>, transform_indices = @transform_11, window_bounds = array<i64: 1, 2>}, {pipeline_mode = #tpu.pipeline_mode<synchronous>, transform_indices = @transform_12, window_bounds = array<i64: 2, 2>}, {pipeline_mode = #tpu.pipeline_mode<synchronous>, transform_indices = @transform_13, window_bounds = array<i64: 16, 1>}]} {
    %c0 = arith.constant 0 : index
    %c0_0 = arith.constant 0 : index
    %0 = vector.load %arg2[%c0, %c0_0] : memref<16x64xf32, #tpu.memory_space<vmem>>, vector<16x64xf32>
    %c0_1 = arith.constant 0 : index
    %c0_2 = arith.constant 0 : index
    %1 = vector.load %arg3[%c0_1, %c0_2] : memref<16x64xf32, #tpu.memory_space<vmem>>, vector<16x64xf32>
    %2 = arith.addf %0, %1 : vector<16x64xf32>
    %3 = arith.truncf %2 : vector<16x64xf32> to vector<16x64xbf16>
    %c0_3 = arith.constant 0 : index
    %c0_4 = arith.constant 0 : index
    %4 = vector.load %arg4[%c0_3, %c0_4] : memref<64x64xbf16, #tpu.memory_space<vmem>>, vector<64x64xbf16>
    %cst = arith.constant dense<0.000000e+00> : vector<16x64xf32>
    %5 = tpu.matmul %3, %4, %cst {dimension_numbers = #tpu.dot_dimension_numbers<[1], [0], [0], [1], [0, 0, 1, 1], [], []>} : vector<16x64xbf16>, vector<64x64xbf16>, vector<16x64xf32> -> vector<16x64xf32>
    %c0_5 = arith.constant 0 : index
    %c0_6 = arith.constant 0 : index
    %6 = vector.load %arg5[%c0_5, %c0_6] : memref<1x64xf32, #tpu.memory_space<vmem>>, vector<1x64xf32>
    %7 = vector.broadcast %6 : vector<1x64xf32> to vector<16x64xf32>
    %8 = arith.addf %5, %7 : vector<16x64xf32>
    %cst_7 = arith.constant 0.000000e+00 : f32
    %9 = vector.broadcast %cst_7 : f32 to vector<16x64xf32>
    %10 = arith.maximumf %8, %9 : vector<16x64xf32>
    %11 = arith.truncf %10 : vector<16x64xf32> to vector<16x64xbf16>
    %c0_8 = arith.constant 0 : index
    %c0_9 = arith.constant 0 : index
    %12 = vector.load %arg6[%c0_8, %c0_9] : memref<64x64xbf16, #tpu.memory_space<vmem>>, vector<64x64xbf16>
    %cst_10 = arith.constant dense<0.000000e+00> : vector<16x64xf32>
    %13 = tpu.matmul %11, %12, %cst_10 {dimension_numbers = #tpu.dot_dimension_numbers<[1], [0], [0], [1], [0, 0, 1, 1], [], []>} : vector<16x64xbf16>, vector<64x64xbf16>, vector<16x64xf32> -> vector<16x64xf32>
    %c0_11 = arith.constant 0 : index
    %c0_12 = arith.constant 0 : index
    %14 = vector.load %arg7[%c0_11, %c0_12] : memref<1x64xf32, #tpu.memory_space<vmem>>, vector<1x64xf32>
    %15 = vector.broadcast %14 : vector<1x64xf32> to vector<16x64xf32>
    %16 = arith.addf %13, %15 : vector<16x64xf32>
    %17 = math.tanh %16 : vector<16x64xf32>
    %c0_13 = arith.constant 0 : index
    %c0_14 = arith.constant 0 : index
    %18 = vector.load %arg8[%c0_13, %c0_14] : memref<1x64xf32, #tpu.memory_space<vmem>>, vector<1x64xf32>
    %19 = vector.broadcast %18 : vector<1x64xf32> to vector<16x64xf32>
    %20 = arith.mulf %17, %19 : vector<16x64xf32>
    %cst_15 = arith.constant dense<0.000000e+00> : vector<16xf32>
    %21 = vector.multi_reduction <add>, %20, %cst_15 [1] : vector<16x64xf32> to vector<16xf32>
    %22 = vector.shape_cast %21 : vector<16xf32> to vector<16x1xf32>
    %c0_16 = arith.constant 0 : index
    %c0_17 = arith.constant 0 : index
    %23 = vector.load %arg9[%c0_16, %c0_17] : memref<1x1xf32, #tpu.memory_space<vmem>>, vector<1x1xf32>
    %24 = vector.broadcast %23 : vector<1x1xf32> to vector<16x1xf32>
    %25 = arith.addf %22, %24 : vector<16x1xf32>
    %26 = vector.extract_strided_slice %25 {offsets = [0, 0], sizes = [8, 1], strides = [1, 1]} : vector<16x1xf32> to vector<8x1xf32>
    %27 = tpu.iota {dimensions = array<i32: 0>} : vector<8x1xi32>
    %c0_18 = arith.constant 0 : index
    %28 = memref.load %arg1[%c0_18] : memref<2xi32, #tpu.memory_space<smem>>
    %29 = vector.broadcast %28 : i32 to vector<8x1xi32>
    %30 = arith.cmpi sge, %27, %29 : vector<8x1xi32>
    %cst_19 = arith.constant 0xFF800000 : f32
    %31 = vector.broadcast %cst_19 : f32 to vector<8x1xf32>
    %32 = arith.select %30, %31, %26 : vector<8x1xi1>, vector<8x1xf32>
    %cst_20 = arith.constant dense<0xFF800000> : vector<1xf32>
    %33 = vector.multi_reduction <maximumf>, %32, %cst_20 [0] : vector<8x1xf32> to vector<1xf32>
    %34 = vector.shape_cast %33 : vector<1xf32> to vector<1x1xf32>
    %35 = vector.broadcast %34 : vector<1x1xf32> to vector<8x1xf32>
    %36 = arith.subf %32, %35 : vector<8x1xf32>
    %37 = math.exp %36 : vector<8x1xf32>
    %cst_21 = arith.constant dense<0.000000e+00> : vector<1xf32>
    %38 = vector.multi_reduction <add>, %37, %cst_21 [0] : vector<8x1xf32> to vector<1xf32>
    %39 = vector.shape_cast %38 : vector<1xf32> to vector<1x1xf32>
    %40 = tpu.reciprocal %39 {approx = true} : vector<1x1xf32> -> vector<1x1xf32>
    %41 = vector.broadcast %40 : vector<1x1xf32> to vector<8x1xf32>
    %42 = arith.mulf %37, %41 : vector<8x1xf32>
    %c0_22 = arith.constant 0 : index
    %c0_23 = arith.constant 0 : index
    %43 = vector.load %arg15[%c0_22, %c0_23] : memref<16x1xf32, #tpu.memory_space<vmem>>, vector<8x1xf32>
    tpu.vector_store %arg15[%c0_22, %c0_23], %42 {strides = array<i32>} : memref<16x1xf32, #tpu.memory_space<vmem>>, vector<8x1xf32>,
    %44 = vector.extract_strided_slice %0 {offsets = [0, 0], sizes = [8, 64], strides = [1, 1]} : vector<16x64xf32> to vector<8x64xf32>
    %45 = vector.broadcast %42 : vector<8x1xf32> to vector<8x64xf32>
    %46 = arith.mulf %45, %44 : vector<8x64xf32>
    %cst_24 = arith.constant dense<0.000000e+00> : vector<64xf32>
    %47 = vector.multi_reduction <add>, %46, %cst_24 [0] : vector<8x64xf32> to vector<64xf32>
    %48 = vector.shape_cast %47 : vector<64xf32> to vector<1x64xf32>
    %c0_25 = arith.constant 0 : index
    %c0_26 = arith.constant 0 : index
    %49 = vector.load %arg16[%c0_25, %c0_26] : memref<2x64xf32, #tpu.memory_space<vmem>>, vector<1x64xf32>
    tpu.vector_store %arg16[%c0_25, %c0_26], %48 {strides = array<i32>} : memref<2x64xf32, #tpu.memory_space<vmem>>, vector<1x64xf32>,
    %50 = vector.extract_strided_slice %25 {offsets = [8, 0], sizes = [8, 1], strides = [1, 1]} : vector<16x1xf32> to vector<8x1xf32>
    %51 = tpu.iota {dimensions = array<i32: 0>} : vector<8x1xi32>
    %c1 = arith.constant 1 : index
    %52 = memref.load %arg1[%c1] : memref<2xi32, #tpu.memory_space<smem>>
    %53 = vector.broadcast %52 : i32 to vector<8x1xi32>
    %54 = arith.cmpi sge, %51, %53 : vector<8x1xi32>
    %cst_27 = arith.constant 0xFF800000 : f32
    %55 = vector.broadcast %cst_27 : f32 to vector<8x1xf32>
    %56 = arith.select %54, %55, %50 : vector<8x1xi1>, vector<8x1xf32>
    %cst_28 = arith.constant dense<0xFF800000> : vector<1xf32>
    %57 = vector.multi_reduction <maximumf>, %56, %cst_28 [0] : vector<8x1xf32> to vector<1xf32>
    %58 = vector.shape_cast %57 : vector<1xf32> to vector<1x1xf32>
    %59 = vector.broadcast %58 : vector<1x1xf32> to vector<8x1xf32>
    %60 = arith.subf %56, %59 : vector<8x1xf32>
    %61 = math.exp %60 : vector<8x1xf32>
    %cst_29 = arith.constant dense<0.000000e+00> : vector<1xf32>
    %62 = vector.multi_reduction <add>, %61, %cst_29 [0] : vector<8x1xf32> to vector<1xf32>
    %63 = vector.shape_cast %62 : vector<1xf32> to vector<1x1xf32>
    %64 = tpu.reciprocal %63 {approx = true} : vector<1x1xf32> -> vector<1x1xf32>
    %65 = vector.broadcast %64 : vector<1x1xf32> to vector<8x1xf32>
    %66 = arith.mulf %61, %65 : vector<8x1xf32>
    %c8 = arith.constant 8 : index
    %c0_30 = arith.constant 0 : index
    %67 = vector.load %arg15[%c8, %c0_30] : memref<16x1xf32, #tpu.memory_space<vmem>>, vector<8x1xf32>
    tpu.vector_store %arg15[%c8, %c0_30], %66 {strides = array<i32>} : memref<16x1xf32, #tpu.memory_space<vmem>>, vector<8x1xf32>,
    %68 = vector.extract_strided_slice %0 {offsets = [8, 0], sizes = [8, 64], strides = [1, 1]} : vector<16x64xf32> to vector<8x64xf32>
    %69 = vector.broadcast %66 : vector<8x1xf32> to vector<8x64xf32>
    %70 = arith.mulf %69, %68 : vector<8x64xf32>
    %cst_31 = arith.constant dense<0.000000e+00> : vector<64xf32>
    %71 = vector.multi_reduction <add>, %70, %cst_31 [0] : vector<8x64xf32> to vector<64xf32>
    %72 = vector.shape_cast %71 : vector<64xf32> to vector<1x64xf32>
    %c1_32 = arith.constant 1 : index
    %c0_33 = arith.constant 0 : index
    %73 = vector.load %arg16[%c1_32, %c0_33] : memref<2x64xf32, #tpu.memory_space<vmem>>, vector<1x64xf32>
    tpu.vector_store %arg16[%c1_32, %c0_33], %72 {strides = array<i32>} : memref<2x64xf32, #tpu.memory_space<vmem>>, vector<1x64xf32>,
    %c0_34 = arith.constant 0 : index
    %c0_35 = arith.constant 0 : index
    %74 = vector.load %arg16[%c0_34, %c0_35] : memref<2x64xf32, #tpu.memory_space<vmem>>, vector<2x64xf32>
    %75 = arith.truncf %74 : vector<2x64xf32> to vector<2x64xbf16>
    %c0_36 = arith.constant 0 : index
    %c0_37 = arith.constant 0 : index
    %76 = vector.load %arg10[%c0_36, %c0_37] : memref<64x128xbf16, #tpu.memory_space<vmem>>, vector<64x128xbf16>
    %cst_38 = arith.constant dense<0.000000e+00> : vector<2x128xf32>
    %77 = tpu.matmul %75, %76, %cst_38 {dimension_numbers = #tpu.dot_dimension_numbers<[1], [0], [0], [1], [0, 0, 1, 1], [], []>} : vector<2x64xbf16>, vector<64x128xbf16>, vector<2x128xf32> -> vector<2x128xf32>
    %c0_39 = arith.constant 0 : index
    %c0_40 = arith.constant 0 : index
    %78 = vector.load %arg11[%c0_39, %c0_40] : memref<1x128xf32, #tpu.memory_space<vmem>>, vector<1x128xf32>
    %79 = vector.broadcast %78 : vector<1x128xf32> to vector<2x128xf32>
    %80 = arith.addf %77, %79 : vector<2x128xf32>
    %cst_41 = arith.constant 0.000000e+00 : f32
    %81 = vector.broadcast %cst_41 : f32 to vector<2x128xf32>
    %82 = arith.maximumf %80, %81 : vector<2x128xf32>
    %83 = arith.truncf %82 : vector<2x128xf32> to vector<2x128xbf16>
    %c0_42 = arith.constant 0 : index
    %c0_43 = arith.constant 0 : index
    %84 = vector.load %arg12[%c0_42, %c0_43] : memref<128x2xbf16, #tpu.memory_space<vmem>>, vector<128x2xbf16>
    %cst_44 = arith.constant dense<0.000000e+00> : vector<2x2xf32>
    %85 = tpu.matmul %83, %84, %cst_44 {dimension_numbers = #tpu.dot_dimension_numbers<[1], [0], [0], [1], [0, 0, 1, 1], [], []>} : vector<2x128xbf16>, vector<128x2xbf16>, vector<2x2xf32> -> vector<2x2xf32>
    %c0_45 = arith.constant 0 : index
    %c0_46 = arith.constant 0 : index
    %86 = vector.load %arg13[%c0_45, %c0_46] : memref<1x2xf32, #tpu.memory_space<vmem>>, vector<1x2xf32>
    %87 = vector.broadcast %86 : vector<1x2xf32> to vector<2x2xf32>
    %88 = arith.addf %85, %87 : vector<2x2xf32>
    %89 = arith.negf %88 : vector<2x2xf32>
    %90 = math.exp %89 : vector<2x2xf32>
    %cst_47 = arith.constant 1.000000e+00 : f32
    %91 = vector.broadcast %cst_47 : f32 to vector<2x2xf32>
    %92 = arith.addf %91, %90 : vector<2x2xf32>
    %93 = arith.divf %91, %92 : vector<2x2xf32>
    %c0_48 = arith.constant 0 : index
    %c0_49 = arith.constant 0 : index
    %94 = vector.load %arg14[%c0_48, %c0_49] : memref<2x2xf32, #tpu.memory_space<vmem>>, vector<2x2xf32>
    tpu.vector_store %arg14[%c0_48, %c0_49], %93 {strides = array<i32>} : memref<2x2xf32, #tpu.memory_space<vmem>>, vector<2x2xf32>,
    return
  }
  func.func @transform_0(%arg0: i32, %arg1: memref<2xi32, #tpu.memory_space<smem>>) -> (i32, i32) {
    %c0_i32 = arith.constant 0 : i32
    %c0_i32_0 = arith.constant 0 : i32
    %c0_i32_1 = arith.constant 0 : i32
    return %c0_i32, %c0_i32_0 : i32, i32
  }
  func.func @transform_1(%arg0: i32, %arg1: memref<2xi32, #tpu.memory_space<smem>>) -> (i32, i32) {
    %c0_i32 = arith.constant 0 : i32
    %c0_i32_0 = arith.constant 0 : i32
    %c0_i32_1 = arith.constant 0 : i32
    return %c0_i32, %c0_i32_0 : i32, i32
  }
  func.func @transform_2(%arg0: i32, %arg1: memref<2xi32, #tpu.memory_space<smem>>) -> (i32, i32) {
    %c0_i32 = arith.constant 0 : i32
    %c0_i32_0 = arith.constant 0 : i32
    %c0_i32_1 = arith.constant 0 : i32
    return %c0_i32, %c0_i32_0 : i32, i32
  }
  func.func @transform_3(%arg0: i32, %arg1: memref<2xi32, #tpu.memory_space<smem>>) -> (i32, i32) {
    %c0_i32 = arith.constant 0 : i32
    %c0_i32_0 = arith.constant 0 : i32
    %c0_i32_1 = arith.constant 0 : i32
    return %c0_i32, %c0_i32_0 : i32, i32
  }
  func.func @transform_4(%arg0: i32, %arg1: memref<2xi32, #tpu.memory_space<smem>>) -> (i32, i32) {
    %c0_i32 = arith.constant 0 : i32
    %c0_i32_0 = arith.constant 0 : i32
    %c0_i32_1 = arith.constant 0 : i32
    return %c0_i32, %c0_i32_0 : i32, i32
  }
  func.func @transform_5(%arg0: i32, %arg1: memref<2xi32, #tpu.memory_space<smem>>) -> (i32, i32) {
    %c0_i32 = arith.constant 0 : i32
    %c0_i32_0 = arith.constant 0 : i32
    %c0_i32_1 = arith.constant 0 : i32
    return %c0_i32, %c0_i32_0 : i32, i32
  }
  func.func @transform_6(%arg0: i32, %arg1: memref<2xi32, #tpu.memory_space<smem>>) -> (i32, i32) {
    %c0_i32 = arith.constant 0 : i32
    %c0_i32_0 = arith.constant 0 : i32
    %c0_i32_1 = arith.constant 0 : i32
    return %c0_i32, %c0_i32_0 : i32, i32
  }
  func.func @transform_7(%arg0: i32, %arg1: memref<2xi32, #tpu.memory_space<smem>>) -> (i32, i32) {
    %c0_i32 = arith.constant 0 : i32
    %c0_i32_0 = arith.constant 0 : i32
    %c0_i32_1 = arith.constant 0 : i32
    return %c0_i32, %c0_i32_0 : i32, i32
  }
  func.func @transform_8(%arg0: i32, %arg1: memref<2xi32, #tpu.memory_space<smem>>) -> (i32, i32) {
    %c0_i32 = arith.constant 0 : i32
    %c0_i32_0 = arith.constant 0 : i32
    %c0_i32_1 = arith.constant 0 : i32
    return %c0_i32, %c0_i32_0 : i32, i32
  }
  func.func @transform_9(%arg0: i32, %arg1: memref<2xi32, #tpu.memory_space<smem>>) -> (i32, i32) {
    %c0_i32 = arith.constant 0 : i32
    %c0_i32_0 = arith.constant 0 : i32
    %c0_i32_1 = arith.constant 0 : i32
    return %c0_i32, %c0_i32_0 : i32, i32
  }
  func.func @transform_10(%arg0: i32, %arg1: memref<2xi32, #tpu.memory_space<smem>>) -> (i32, i32) {
    %c0_i32 = arith.constant 0 : i32
    %c0_i32_0 = arith.constant 0 : i32
    %c0_i32_1 = arith.constant 0 : i32
    return %c0_i32, %c0_i32_0 : i32, i32
  }
  func.func @transform_11(%arg0: i32, %arg1: memref<2xi32, #tpu.memory_space<smem>>) -> (i32, i32) {
    %c0_i32 = arith.constant 0 : i32
    %c0_i32_0 = arith.constant 0 : i32
    %c0_i32_1 = arith.constant 0 : i32
    return %c0_i32, %c0_i32_0 : i32, i32
  }
  func.func @transform_12(%arg0: i32, %arg1: memref<2xi32, #tpu.memory_space<smem>>) -> (i32, i32) {
    %c0_i32 = arith.constant 0 : i32
    %c0_i32_0 = arith.constant 0 : i32
    %c0_i32_1 = arith.constant 0 : i32
    return %c0_i32, %c0_i32_0 : i32, i32
  }
  func.func @transform_13(%arg0: i32, %arg1: memref<2xi32, #tpu.memory_space<smem>>) -> (i32, i32) {
    %c0_i32 = arith.constant 0 : i32
    %c0_i32_0 = arith.constant 0 : i32
    %c0_i32_1 = arith.constant 0 : i32
    return %c0_i32, %c0_i32_0 : i32, i32
  }
}

</mosaic_0001>

<bundles_post_ra>
// kernel: music_highlighter_forward.3
= control target key start
LH: loop header
LB: loop body
LE: loop exit
PB: predicated region body
PF: predicated region fallthrough
CT: control target
= control target key end

     0   :  { %s623_s18 = smov [#allocation4]   ;;  %s824_s0 = inlined_call_operand.vmem [shape: s32[2], index: 0, kind: input, shape index: {}]   ;;  %s825_s1 = inlined_call_operand.vmem [shape: f32[16,64], index: 1, kind: input, shape index: {}]   ;;  %s826_s2 = inlined_call_operand.vmem [shape: f32[16,64], index: 2, kind: input, shape index: {}]   ;;  %s827_s3 = inlined_call_operand.vmem [shape: bf16[64,64], index: 3, kind: input, shape index: {}]   ;;  %s828_s4 = inlined_call_operand.vmem [shape: f32[1,64], index: 4, kind: input, shape index: {}]   ;;  %s829_s5 = inlined_call_operand.vmem [shape: bf16[64,64], index: 5, kind: input, shape index: {}]   ;;  %s830_s6 = inlined_call_operand.vmem [shape: f32[1,64], index: 6, kind: input, shape index: {}]   ;;  %s831_s7 = inlined_call_operand.vmem [shape: f32[1,64], index: 7, kind: input, shape index: {}]   ;;  %s832_s9 = inlined_call_operand.vmem [shape: bf16[64,128], index: 9, kind: input, shape index: {}]   ;;  %s833_s10 = inlined_call_operand.vmem [shape: f32[1,128], index: 10, kind: input, shape index: {}]   ;;  %s834_s11 = inlined_call_operand.vmem [shape: bf16[128,2], index: 11, kind: input, shape index: {}]   ;;  %s835_s12 = inlined_call_operand.vmem [shape: f32[1,2], index: 12, kind: input, shape index: {}]   ;;  %s836_s13 = inlined_call_operand.hbm [shape: f32[2,2], index: 13, kind: output, shape index: {0}]   ;;  %s837_s14 = inlined_call_operand.vmem [shape: f32[16,1], index: 14, kind: output, shape index: {1}]   ;;  %s838_s8 = inlined_call_operand.<no memory space> [shape: f32[1,1], index: 8, kind: input, shape index: {}]  }
   0x1   :  { %s21_s15 = sshll.u32 %s824_s0, 4  ;;  %v25_v0 = vstv %s838_s8  ;;  %s22_s15 = int_to_ptr.vmem [resolvable:$true] %s21_s15 }
   0x2   :  { %26 = vst [vmem:[#allocation5] sm:$0x1] %v25_v0  ;;  %24 = dma.vmem_to_smem %s22_s15, 16, %s623_s18, [#allocation3] }
   0x3   :  { %619 = dma.done.wait [#allocation3], 16 }
   0x4   :  { %620 = vsyncadd [#allocation3], 4294967280 }
   0x5   :  { %29 = sfence }
   0x6   :  { %v539_v1 = vld [vmem:[%s827_s3 + $0x18] sm:$0xff]  ;;  %v538_v2 = vld [vmem:[%s827_s3 + $0x10] sm:$0xff]  ;;  %v537_v3 = vld [vmem:[%s827_s3 + $0x8] sm:$0xff] }
   0x7   :  { %107 = vmatpush.bf16.msra.mxu0 %v539_v1  ;;  %v719_v4 = vld [vmem:[%s825_s1] sm:$0xff] }
   0x8   :  { %30 = vsyncpa [#allocation7], 0  ;;  %v724_v5 = vld [vmem:[%s825_s1 + $0x8] sm:$0xff]  ;;  %v58_v6 = vld [vmem:[%s826_s2] sm:$0xff]  ;;  %vm99_vm0 = vcmask 523264   ;;  %v193_v36 = vlaneseq  ;;  %vm199_vm2 = vcmask 7168  }
   0x9   :  { %v59_v7 = vld [vmem:[%s826_s2 + $0x8] sm:$0xff]  ;;  %v60_v8 = vadd.f32 %v58_v6, %v719_v4  ;;  %v536_v10 = vld [vmem:[%s827_s3] sm:$0xff]  ;;  %v543_v12 = vld [vmem:[%s829_s5 + $0x18] sm:$0xff]  ;;  %v624_v50 = vmov 0   ;;  %vm233_vm4 = vcmask 516096   ;;  %vm429_vm8 = vcmask 9216  }
   0xa   :  { %v61_v9 = vadd.f32 %v59_v7, %v724_v5  ;;  %163 = vmatpush.bf16.msra.mxu1 %v543_v12  ;;  %v542_v13 = vld [vmem:[%s829_s5 + $0x10] sm:$0xff]  ;;  %v541_v14 = vld [vmem:[%s829_s5 + $0x8] sm:$0xff]  ;;  %v540_v15 = vld [vmem:[%s829_s5] sm:$0xff]  ;;  %v194_v37 = vshrl.u32 %v193_v36, 7  ;;  %559 = vset.pattern.permute.xlu1 %v624_v50 }
   0xb   :  { %108 = vmatpush.bf16.msra.mxu0 %v538_v2  ;;  %v561_v17 = vld [vmem:[%s828_s4] ss:$0 sm:$0xff]  ;;  %s195_s4 = sld [smem:[#allocation4]]  ;;  %v564_v38 = vld [vmem:[#allocation5] ss:$0 sm:$0xff]  ;;  %560 = vset.pattern.permute.xlu0 %v624_v50 }
   0xc   :  { %v62_v11 = vpack.c.bf16 %v61_v9, %v60_v8  ;;  %v562_v24 = vld [vmem:[%s830_s6] ss:$0 sm:$0xff]  ;;  %s485_s6 = sld [smem:[#allocation4 + $0x1]] }
   0xd   :  { %v563_v27 = vld [vmem:[%s831_s7] ss:$0 sm:$0xff] }
   0xe   :  { %164 = vmatpush.bf16.msra.mxu1 %v542_v13 }
   0xf   :  { %109 = vmatpush.bf16.msra.mxu0 %v537_v3 }
  0x11   :  { %v196_v39 = vstv %s195_s4 }
  0x12   :  { %165 = vmatpush.bf16.msra.mxu1 %v541_v14  ;;  %vm197_vm1 = vcmp.ge.s32.totalorder %v194_v37, %v196_v39  ;;  %v236_v45 = vstv %s485_s6 }
  0x13   :  { %110 = vmatpush.bf16.msra.mxu0 %v536_v10  ;;  %vm237_vm3 = vcmp.ge.s32.totalorder %v194_v37, %v236_v45 }
  0x16   :  { %467 = vmatmul.msk.bf16.vlgmr.msra.gmra.mxu0 %vm99_vm0, %v62_v11  ;;  %166 = vmatpush.bf16.msra.mxu1 %v540_v15 }
  0x93   :  { %v112_v16 = vpop.f32.mrf.mxu0 }
  0x94   :  { %v113_v18 = vadd.f32 %v561_v17, %v112_v16 }
  0x96   :  { %v117_v21 = vmax.f32 %v113_v18, 0.0 }
  0x9b   :  { %v114_v19 = vpop.f32.mrf.mxu0 }
  0x9c   :  { %v115_v20 = vadd.f32 %v561_v17, %v114_v19 }
  0x9e   :  { %v118_v22 = vmax.f32 %v115_v20, 0.0 }
  0xa0   :  { %v119_v23 = vpack.c.bf16 %v118_v22, %v117_v21 }
  0xa2   :  { %484 = vmatmul.msk.bf16.vlgmr.msra.gmra.mxu1 %vm99_vm0, %v119_v23 }
 0x11f   :  { %v168_v25 = vpop.f32.mrf.mxu1 }
 0x120   :  { %v169_v26 = vadd.f32 %v562_v24, %v168_v25  ;;  %v546_v25 = vld [vmem:[%s832_s9 + $0x10] sm:$0xff] }
 0x122   :  { %567 = vtanh.f32 %v169_v26  ;;  %v545_v26 = vld [vmem:[%s832_s9 + $0x8] sm:$0xff] }
 0x127   :  { %v170_v28 = vpop.f32.mrf.mxu1 }
 0x128   :  { %v568_v29 = vpop.eup %567  ;;  %v171_v30 = vadd.f32 %v562_v24, %v170_v28  ;;  %v547_v24 = vld [vmem:[%s832_s9 + $0x18] sm:$0xff] }
 0x129   :  { %v179_v31 = vmul.f32 %v568_v29, %v563_v27  ;;  %318 = vmatpush.bf16.msra.mxu2 %v547_v24 }
 0x12a   :  { %569 = vtanh.f32 %v171_v30  ;;  %v555_v30 = vld [vmem:[%s834_s11 + $0x38] sm:$0xff] }
 0x12b   :  { %v181_v32 = vsel %vm99_vm0, %v179_v31, 0.0  ;;  %397 = vmatpush.bf16.msra.mxu3 %v555_v30 }
 0x12c   :  { %182 = vadd.xlane.f32.xlu0 %v181_v32 }
 0x12d   :  { %319 = vmatpush.bf16.msra.mxu2 %v546_v25 }
 0x130   :  { %v570_v33 = vpop.eup %569 }
 0x131   :  { %v180_v34 = vmul.f32 %v570_v33, %v563_v27  ;;  %320 = vmatpush.bf16.msra.mxu2 %v545_v26  ;;  %v544_v27 = vld [vmem:[%s832_s9] sm:$0xff]  ;;  %v554_v33 = vld [vmem:[%s834_s11 + $0x30] sm:$0xff] }
 0x132   :  { %398 = vmatpush.bf16.msra.mxu3 %v554_v33 }
 0x133   :  { %v184_v35 = vsel %vm99_vm0, %v180_v34, 0.0 }
 0x134   :  { %185 = vadd.xlane.f32.xlu0 %v184_v35 }
 0x135   :  { %321 = vmatpush.bf16.msra.mxu2 %v544_v27 }
 0x19f   :  { %v183_v40 = vpop.xlane.xlu0 %182 }
 0x1a0   :  { %v191_v41 = vadd.f32 %v564_v38, %v183_v40 }
 0x1a2   :  { %v198_v42 = vsel %vm197_vm1, -inf, %v191_v41 }
 0x1a3   :  { %v200_v43 = vsel %vm199_vm2, %v198_v42, -inf }
 0x1a4   :  { %v201_v44 = vrot.slane %v200_v43, 4 }
 0x1a6   :  { %v202_v46 = vmax.f32 %v200_v43, %v201_v44 }
 0x1a7   :  { %v186_v47 = vpop.xlane.xlu0 %185 }
 0x1a8   :  { %v203_v48 = vrot.slane %v202_v46, 2  ;;  %v192_v49 = vadd.f32 %v564_v38, %v186_v47 }
 0x1aa   :  { %v204_v51 = vmax.f32 %v202_v46, %v203_v48  ;;  %v238_v52 = vsel %vm237_vm3, -inf, %v192_v49  ;;  %v550_v48 = vld [vmem:[%s834_s11 + $0x10] sm:$0xff] }
 0x1ab   :  { %v239_v53 = vsel %vm199_vm2, %v238_v52, -inf }
 0x1ac   :  { %v205_v54 = vrot.slane %v204_v51, 1  ;;  %v240_v55 = vrot.slane %v239_v53, 4 }
 0x1ae   :  { %v206_v56 = vmax.f32 %v204_v51, %v205_v54  ;;  %v241_v57 = vmax.f32 %v239_v53, %v240_v55  ;;  %v548_v53 = vld [vmem:[%s834_s11] sm:$0xff] }
 0x1af   :  { %v565_v54 = vld [vmem:[%s833_s10] ss:$0 sm:$0xff]  ;;  %s625_s10 = smov [#allocation6]  }
 0x1b0   :  { %v207_v58 = vsub.f32 %v198_v42, %v206_v56  ;;  %v242_v59 = vrot.slane %v241_v57, 2  ;;  %v552_v42 = vld [vmem:[%s834_s11 + $0x20] sm:$0xff] }
 0x1b2   :  { %v208_v60 = vmul.f32 1.442695, %v207_v58  ;;  %v243_v61 = vmax.f32 %v241_v57, %v242_v59 }
 0x1b4   :  { %571 = vpow2.f32 %v208_v60  ;;  %v244_v62 = vrot.slane %v243_v61, 1  ;;  %v566_v60 = vld [vmem:[%s835_s12] ss:$0 sm:$0xff]  ;;  %s438_s12 = sshll.u32 %s836_s13, 4  ;;  %s439_s12 = int_to_ptr.hbm [resolvable:$true] %s438_s12 }
 0x1b6   :  { %v245_v63 = vmax.f32 %v243_v61, %v244_v62 }
 0x1b8   :  { %v246_v0 = vsub.f32 %v238_v52, %v245_v63  ;;  %v549_v52 = vld [vmem:[%s834_s11 + $0x8] sm:$0xff] }
 0x1ba   :  { %v572_v1 = vpop.eup %571  ;;  %v247_v2 = vmul.f32 1.442695, %v246_v0 }
 0x1bb   :  { %v210_v3 = vsel %vm199_vm2, %v572_v1, 0.0 }
 0x1bc   :  { %v211_v6 = vrot.slane %v210_v3, 4  ;;  %573 = vpow2.f32 %v247_v2 }
 0x1be   :  { %v212_v7 = vadd.f32 %v211_v6, %v210_v3 }
 0x1c0   :  { %v213_v8 = vrot.slane %v212_v7, 2 }
 0x1c2   :  { %v574_v9 = vpop.eup %573  ;;  %v214_v10 = vadd.f32 %v213_v8, %v212_v7 }
 0x1c3   :  { %v249_v11 = vsel %vm199_vm2, %v574_v9, 0.0 }
 0x1c4   :  { %v250_v12 = vrot.slane %v249_v11, 4  ;;  %v215_v13 = vrot.slane %v214_v10, 1 }
 0x1c6   :  { %v251_v14 = vadd.f32 %v250_v12, %v249_v11  ;;  %v216_v15 = vadd.f32 %v215_v13, %v214_v10 }
 0x1c8   :  { %v252_v16 = vrot.slane %v251_v14, 2  ;;  %575 = vrcp.f32 %v216_v15 }
 0x1ca   :  { %v253_v17 = vadd.f32 %v252_v16, %v251_v14 }
 0x1cc   :  { %v254_v18 = vrot.slane %v253_v17, 1 }
 0x1ce   :  { %v576_v19 = vpop.eup %575  ;;  %v255_v20 = vadd.f32 %v254_v18, %v253_v17 }
 0x1cf   :  { %v218_v21 = vmul.f32 %v576_v19, %v572_v1 }
 0x1d0   :  { %577 = vrcp.f32 %v255_v20 }
 0x1d1   :  { %222 = vperm.xlu1 %559, %v218_v21   ;;  %219 = vst.msk [vmem:[%s837_s14] sm:$0xff] %vm199_vm2, %v218_v21 }
 0x1d6   :  { %v578_v22 = vpop.eup %577 }
 0x1d7   :  { %v257_v23 = vmul.f32 %v578_v22, %v574_v9 }
 0x1d9   :  { %261 = vperm.xlu1 %559, %v257_v23   ;;  %258 = vst.msk [vmem:[%s837_s14 + $0x8] sm:$0xff] %vm199_vm2, %v257_v23 }
 0x243   :  { %v223_v28 = vpop.permute.xlu1 %222 }
 0x244   :  { %v225_v29 = vmul.f32 %v223_v28, %v719_v4  ;;  %v553_v4 = vld [vmem:[%s834_s11 + $0x28] sm:$0xff] }
 0x245   :  { %399 = vmatpush.bf16.msra.mxu3 %v553_v4 }
 0x246   :  { %v226_v31 = vsel %vm99_vm0, %v225_v29, 0.0 }
 0x247   :  { %v227_v32 = vrot.slane %v226_v31, 4 }
 0x249   :  { %v228_v34 = vadd.f32 %v227_v32, %v226_v31  ;;  %400 = vmatpush.bf16.msra.mxu3 %v552_v42 }
 0x24b   :  { %v229_v35 = vrot.slane %v228_v34, 2  ;;  %v262_v36 = vpop.permute.xlu1 %261 }
 0x24c   :  { %v264_v37 = vmul.f32 %v262_v36, %v724_v5  ;;  %v551_v5 = vld [vmem:[%s834_s11 + $0x18] sm:$0xff]  ;;  %s436_s11 = sshll.u32 %s625_s10, 4  ;;  %s437_s11 = int_to_ptr.vmem [resolvable:$true] %s436_s11 }
 0x24d   :  { %v230_v38 = vadd.f32 %v229_v35, %v228_v34  ;;  %401 = vmatpush.bf16.msra.mxu3 %v551_v5 }
 0x24e   :  { %v265_v39 = vsel %vm99_vm0, %v264_v37, 0.0 }
 0x24f   :  { %v231_v40 = vrot.slane %v230_v38, 1  ;;  %v266_v41 = vrot.slane %v265_v39, 4 }
 0x251   :  { %v232_v43 = vadd.f32 %v231_v40, %v230_v38  ;;  %v267_v44 = vadd.f32 %v266_v41, %v265_v39  ;;  %402 = vmatpush.bf16.msra.mxu3 %v550_v48 }
 0x253   :  { %234 = vst.msk [vmem:[#allocation2] sm:$0x1] %vm233_vm4, %v232_v43  ;;  %v268_v45 = vrot.slane %v267_v44, 2 }
 0x255   :  { %v269_v46 = vadd.f32 %v268_v45, %v267_v44  ;;  %403 = vmatpush.bf16.msra.mxu3 %v549_v52 }
 0x257   :  { %v270_v47 = vrot.slane %v269_v46, 1 }
 0x259   :  { %v271_v49 = vadd.f32 %v270_v47, %v269_v46  ;;  %404 = vmatpush.bf16.msra.mxu3 %v548_v53 }
 0x25b   :  { %272 = vst.msk [vmem:[#allocation2 + $0x1] sm:$0x1] %vm233_vm4, %v271_v49 }
 0x262   :  { %v273_v50 = vld [vmem:[#allocation2] sm:$0x3] }
 0x263   :  { %v274_v51 = vpack.c.bf16 %v273_v50, %v273_v50 }
 0x265   :  { %502 = vmatmul.msk.bf16.vlgmr.msra.gmra.mxu2 %vm99_vm0, %v274_v51 }
 0x2e8   :  { %v323_v55 = vpop.f32.mrf.mxu2 }
 0x2e9   :  { %v324_v56 = vadd.f32 %v565_v54, %v323_v55 }
 0x2eb   :  { %v327_v57 = vmax.f32 %v324_v56, 0.0 }
 0x2ed   :  { %v328_v58 = vpack.c.bf16 %v327_v57, %v327_v57 }
 0x2ef   :  { %405 = vmatmul.bf16.vlgmr.msra.gmra.mxu3 %v328_v58 }
 0x2f0   :  { %v325_v59 = vpop.f32.mrf.mxu2 }
 0x372   :  { %v406_v61 = vpop.f32.mrf.mxu3 }
 0x373   :  { %v407_v62 = vadd.f32 %v566_v60, %v406_v61 }
 0x375   :  { %v535_v63 = vmul.f32 -1.442695, %v407_v62 }
 0x377   :  { %579 = vpow2.f32 %v535_v63 }
 0x37a   :  { %v408_v0 = vpop.f32.mrf.mxu3 }
 0x37d   :  { %v580_v1 = vpop.eup %579 }
 0x37e   :  { %v413_v2 = vadd.f32 1.0, %v580_v1 }
 0x380   :  { %581 = vrcp.f32 %v413_v2  ;;  %v425_v8 = vand.u32 2147483648, %v413_v2  ;;  %v423_v10 = vand.u32 2147483647, %v413_v2  ;;  %vm419_vm6 = vweird.f32 %v413_v2 }
 0x382   :  { %v426_v12 = vor.u32 1.1754944e-38, %v425_v8  ;;  %vm424_vm9 = vcmp.eq.f32.partialorder %v423_v10, 8.507059e+37 }
 0x386   :  { %v582_v3 = vpop.eup %581 }
 0x387   :  { %v415_v6 = vmul.f32 %v582_v3, %v413_v2  ;;  %vm420_vm5 = vweird.f32 %v582_v3 }
 0x388   :  { %vm421_vm7 = vmor %vm419_vm6, %vm420_vm5 }
 0x389   :  { %v416_v7 = vsub.f32 1.0, %v415_v6 }
 0x38b   :  { %v417_v9 = vmul.f32 %v582_v3, %v416_v7 }
 0x38d   :  { %v418_v11 = vadd.f32 %v582_v3, %v417_v9 }
 0x38f   :  { %v422_v13 = vsel %vm421_vm7, %v582_v3, %v418_v11 }
 0x390   :  { %v427_v14 = vsel %vm424_vm9, %v426_v12, %v422_v13 }
 0x391   :  { %430 = vst.msk [vmem:[#allocation6] sm:$0x3] %vm429_vm8, %v427_v14 }
 0x392   :  { %441 = dma.vmem_to_hbm [thread:$0]  %s437_s11, 32, %s439_s12, [#allocation7]  }
 0x393   :  { %621 = dma.done.wait [#allocation7], 32  }
 0x394   :  { %622 = vsyncadd [#allocation7], 4294967264 }
 0x395   :  { %450 = vsyncpa [#allocation7], 1 }

// kernel: music_highlighter_forward.2
= control target key start
LH: loop header
LB: loop body
LE: loop exit
PB: predicated region body
PF: predicated region fallthrough
CT: control target
= control target key end

     0   :  { %s8611_s24 = smov 0   ;;  %s8613_s25 = smov 0   ;;  %s10231_s0 = inlined_call_operand.vmem [shape: bf16[35,16,128], index: 0, kind: input, shape index: {}]   ;;  %s10232_s1 = inlined_call_operand.vmem [shape: bf16[3,128,16], index: 1, kind: input, shape index: {}]   ;;  %s10233_s2 = inlined_call_operand.vmem [shape: bf16[4,16,32], index: 2, kind: input, shape index: {}]   ;;  %s10234_s3 = inlined_call_operand.vmem [shape: bf16[4,32,64], index: 3, kind: input, shape index: {}]   ;;  %s10235_s4 = inlined_call_operand.vmem [shape: f32[1,16], index: 4, kind: input, shape index: {}]   ;;  %s10236_s5 = inlined_call_operand.vmem [shape: f32[1,32], index: 5, kind: input, shape index: {}]   ;;  %s10237_s6 = inlined_call_operand.vmem [shape: f32[1,64], index: 6, kind: input, shape index: {}]   ;;  %s10238_s7 = inlined_call_operand.vmem [shape: f32[16,64], index: 7, kind: output, shape index: {}]  }
   0x1   :  { %s8615_s26 = smov 0  }
   0x2 LB: > { %s5604_s27 = sadd.s32 4294967295, %s8569_s26   ;;  %s8628_s28 = sadd.s32 1, %s8569_s26   ;;  %s8569_s26 = sphi %s8615_s26, %s10241_s26   ;;  %s8565_s25 = sphi %s8613_s25, %s10240_s25   ;;  %s8561_s24 = sphi %s8611_s24, %s10239_s24  }
   0x3   : > { %s21_s29 = ssub.s32 %s8569_s26, %s8628_s28  ;;  %s24_s30 = sadd.s32 1, %s8565_s25 }
   0x4   : > { %p22_p0 = scmp.eq.s32.totalorder %s21_s29, 0  ;;  %p31_p1 = scmp.ne.s32.totalorder %s8565_s25, %s8561_s24 }
   0x5   : > { %p32_p2 = scmp.eq.s32.totalorder %s8569_s26, 0  ;;  %p5607_p4 = scmp.ge.s32.totalorder %s8569_s26, 2 }
   0x6   : > { %s8637_s8 = scalar_select %p22_p0, %s8565_s25, %s24_s30  }
   0x7   : > { %p33_p3 = por %p32_p2, %p31_p1  ;;  %227 = sbr.rel (%p5607_p4) target bundleno = 52 (0x34), region = 40 }
   0xc   : > { %230 = sbr.rel (!%p33_p3) target bundleno = 52 (0x34), region = 44  ;;  %s232_s9 = sand.u32 (%p33_p3), 1, %s8565_s25  }
   0xd   : > { %s5608_s10 = sshll.u32 (%p33_p3), %s8569_s26, 2  ;;  %s8517_s11 = smul.u32 (%p33_p3), 140, %s232_s9 }
   0xe   : > { %s8645_s14 = scalar_lea.vmem (%p33_p3), %s10231_s0, %s5608_s10 }
   0xf   : > { %v253_v0 = vld [vmem:[%s8645_s14] sm:$0xf] (%p33_p3)  ;;  %v255_v1 = vld [vmem:[%s8645_s14 + $0x8] sm:$0xf] (%p33_p3)  ;;  %v257_v2 = vld [vmem:[%s8645_s14 + $0x10] sm:$0xf] (%p33_p3) }
  0x10   : > { %s8650_s15 = scalar_lea.vmem (%p33_p3), [#allocation4], %s8517_s11  ;;  %v259_v3 = vld [vmem:[%s8645_s14 + $0x18] sm:$0xf] (%p33_p3)  ;;  %v261_v4 = vld [vmem:[%s8645_s14 + $0x20] sm:$0xf] (%p33_p3) }
  0x11   : > { %254 = vst [vmem:[%s8650_s15] sm:$0xf] %v253_v0  ;;  %v263_v5 = vld [vmem:[%s8645_s14 + $0x28] sm:$0xf]  ;;  %v265_v6 = vld [vmem:[%s8645_s14 + $0x30] sm:$0xf] }
  0x12   : > { %256 = vst [vmem:[%s8650_s15 + $0x4] sm:$0xf] %v255_v1  ;;  %v267_v7 = vld [vmem:[%s8645_s14 + $0x38] sm:$0xf]  ;;  %v269_v8 = vld [vmem:[%s8645_s14 + $0x40] sm:$0xf] }
  0x13   : > { %258 = vst [vmem:[%s8650_s15 + $0x8] sm:$0xf] %v257_v2  ;;  %v271_v9 = vld [vmem:[%s8645_s14 + $0x48] sm:$0xf]  ;;  %v273_v10 = vld [vmem:[%s8645_s14 + $0x50] sm:$0xf] }
  0x14   : > { %260 = vst [vmem:[%s8650_s15 + $0xc] sm:$0xf] %v259_v3  ;;  %v275_v11 = vld [vmem:[%s8645_s14 + $0x58] sm:$0xf]  ;;  %v277_v12 = vld [vmem:[%s8645_s14 + $0x60] sm:$0xf] }
  0x15   : > { %262 = vst [vmem:[%s8650_s15 + $0x10] sm:$0xf] %v261_v4  ;;  %v279_v13 = vld [vmem:[%s8645_s14 + $0x68] sm:$0xf]  ;;  %v281_v14 = vld [vmem:[%s8645_s14 + $0x70] sm:$0xf] }
  0x16   : > { %264 = vst [vmem:[%s8650_s15 + $0x14] sm:$0xf] %v263_v5  ;;  %v283_v15 = vld [vmem:[%s8645_s14 + $0x78] sm:$0xf]  ;;  %v285_v16 = vld [vmem:[%s8645_s14 + $0x80] sm:$0xf] }
  0x17   : > { %266 = vst [vmem:[%s8650_s15 + $0x18] sm:$0xf] %v265_v6  ;;  %v287_v17 = vld [vmem:[%s8645_s14 + $0x88] sm:$0xf]  ;;  %v289_v18 = vld [vmem:[%s8645_s14 + $0x90] sm:$0xf] }
  0x18   : > { %268 = vst [vmem:[%s8650_s15 + $0x1c] sm:$0xf] %v267_v7  ;;  %v291_v19 = vld [vmem:[%s8645_s14 + $0x98] sm:$0xf]  ;;  %v293_v20 = vld [vmem:[%s8645_s14 + $0xa0] sm:$0xf] }
  0x19   : > { %270 = vst [vmem:[%s8650_s15 + $0x20] sm:$0xf] %v269_v8  ;;  %v295_v21 = vld [vmem:[%s8645_s14 + $0xa8] sm:$0xf]  ;;  %v297_v22 = vld [vmem:[%s8645_s14 + $0xb0] sm:$0xf] }
  0x1a   : > { %272 = vst [vmem:[%s8650_s15 + $0x24] sm:$0xf] %v271_v9  ;;  %v299_v23 = vld [vmem:[%s8645_s14 + $0xb8] sm:$0xf]  ;;  %v301_v24 = vld [vmem:[%s8645_s14 + $0xc0] sm:$0xf] }
  0x1b   : > { %274 = vst [vmem:[%s8650_s15 + $0x28] sm:$0xf] %v273_v10  ;;  %v303_v25 = vld [vmem:[%s8645_s14 + $0xc8] sm:$0xf]  ;;  %v305_v26 = vld [vmem:[%s8645_s14 + $0xd0] sm:$0xf] }
  0x1c   : > { %276 = vst [vmem:[%s8650_s15 + $0x2c] sm:$0xf] %v275_v11  ;;  %v307_v27 = vld [vmem:[%s8645_s14 + $0xd8] sm:$0xf]  ;;  %v309_v28 = vld [vmem:[%s8645_s14 + $0xe0] sm:$0xf] }
  0x1d   : > { %278 = vst [vmem:[%s8650_s15 + $0x30] sm:$0xf] %v277_v12  ;;  %v311_v29 = vld [vmem:[%s8645_s14 + $0xe8] sm:$0xf]  ;;  %v313_v30 = vld [vmem:[%s8645_s14 + $0xf0] sm:$0xf] }
  0x1e   : > { %280 = vst [vmem:[%s8650_s15 + $0x34] sm:$0xf] %v279_v13  ;;  %v315_v31 = vld [vmem:[%s8645_s14 + $0xf8] sm:$0xf]  ;;  %v317_v32 = vld [vmem:[%s8645_s14 + $0x100] sm:$0xf] }
  0x1f   : > { %282 = vst [vmem:[%s8650_s15 + $0x38] sm:$0xf] %v281_v14  ;;  %v319_v33 = vld [vmem:[%s8645_s14 + $0x108] sm:$0xf]  ;;  %v321_v34 = vld [vmem:[%s8645_s14 + $0x110] sm:$0xf] }
  0x20   : > { %284 = vst [vmem:[%s8650_s15 + $0x3c] sm:$0xf] %v283_v15 }
  0x21   : > { %286 = vst [vmem:[%s8650_s15 + $0x40] sm:$0xf] %v285_v16 }
  0x22   : > { %288 = vst [vmem:[%s8650_s15 + $0x44] sm:$0xf] %v287_v17 }
  0x23   : > { %290 = vst [vmem:[%s8650_s15 + $0x48] sm:$0xf] %v289_v18 }
  0x24   : > { %292 = vst [vmem:[%s8650_s15 + $0x4c] sm:$0xf] %v291_v19 }
  0x25   : > { %294 = vst [vmem:[%s8650_s15 + $0x50] sm:$0xf] %v293_v20 }
  0x26   : > { %296 = vst [vmem:[%s8650_s15 + $0x54] sm:$0xf] %v295_v21 }
  0x27   : > { %298 = vst [vmem:[%s8650_s15 + $0x58] sm:$0xf] %v297_v22 }
  0x28   : > { %300 = vst [vmem:[%s8650_s15 + $0x5c] sm:$0xf] %v299_v23 }
  0x29   : > { %302 = vst [vmem:[%s8650_s15 + $0x60] sm:$0xf] %v301_v24 }
  0x2a   : > { %304 = vst [vmem:[%s8650_s15 + $0x64] sm:$0xf] %v303_v25 }
  0x2b   : > { %306 = vst [vmem:[%s8650_s15 + $0x68] sm:$0xf] %v305_v26 }
  0x2c   : > { %308 = vst [vmem:[%s8650_s15 + $0x6c] sm:$0xf] %v307_v27 }
  0x2d   : > { %310 = vst [vmem:[%s8650_s15 + $0x70] sm:$0xf] %v309_v28 }
  0x2e   : > { %312 = vst [vmem:[%s8650_s15 + $0x74] sm:$0xf] %v311_v29 }
  0x2f   : > { %314 = vst [vmem:[%s8650_s15 + $0x78] sm:$0xf] %v313_v30 }
  0x30   : > { %316 = vst [vmem:[%s8650_s15 + $0x7c] sm:$0xf] %v315_v31 }
  0x31   : > { %318 = vst [vmem:[%s8650_s15 + $0x80] sm:$0xf] %v317_v32 }
  0x32   : > { %320 = vst [vmem:[%s8650_s15 + $0x84] sm:$0xf] %v319_v33 }
  0x33   : > { %322 = vst [vmem:[%s8650_s15 + $0x88] sm:$0xf] %v321_v34 }
  0x34 PF: > { %p5609_p5 = scmp.ge.s32.totalorder %s8569_s26, 1  ;;  %p415_p6 = scmp.lt.s32.totalorder %s8569_s26, 3 }
  0x36   : > { %p416_p7 = pnand %p5609_p5, %p415_p6 }
  0x37   : > { %s422_s13 = sand.u32 (!%p416_p7), 1, %s8561_s24   ;;  %p452_p8 = scmp.lt.s32.totalorder (!%p416_p7), %s5604_s27, 1 }
  0x38   : > { %419 = sbr.rel (%p416_p7) target bundleno = 852 (0x354), region = 85 }
  0x39   : > { %s8518_s24 = smul.u32 (!%p416_p7), 140, %s422_s13 }
  0x3b   : > { %s8833_s23 = scalar_lea.vmem (!%p416_p7), [#allocation4], %s8518_s24 }
  0x3d   : > { %v8088_v35 = vld [vmem:[%s10232_s1 + $0x78] sm:$0xff]  ;;  %v8087_v39 = vld [vmem:[%s10232_s1 + $0x70] sm:$0xff]  ;;  %v8086_v43 = vld [vmem:[%s10232_s1 + $0x68] sm:$0xff]  ;;  %vm703_vm0 = vcmask 125952   ;;  %vm4591_vm1 = vcmask 130048   ;;  %vm4690_vm2 = vcmask 257024  }
  0x3e   : > { %v8080_v36 = vld [vmem:[%s10232_s1 + $0x38] sm:$0xff]  ;;  %542 = vmatpush.bf16.msra.mxu0 %v8088_v35  ;;  %v8079_v40 = vld [vmem:[%s10232_s1 + $0x30] sm:$0xff]  ;;  %v8078_v44 = vld [vmem:[%s10232_s1 + $0x28] sm:$0xff]  ;;  %vm5358_vm3 = vcmask 261120   ;;  %s10243_s27 = smov (!%p452_p8, %s5604_s27), 1  ;;  %vm5543_vm4 = vcmask 523264  }
  0x3f   : > { %v8096_v37 = vld [vmem:[%s10232_s1 + $0xb8] sm:$0xff]  ;;  %603 = vmatpush.bf16.msra.mxu1 %v8080_v36  ;;  %v8095_v41 = vld [vmem:[%s10232_s1 + $0xb0] sm:$0xff]  ;;  %v8094_v45 = vld [vmem:[%s10232_s1 + $0xa8] sm:$0xff]  ;;  %s5610_s9 = sshll.u32 %s10243_s27, 3 }
  0x40   : > { %v8112_v38 = vld [vmem:[%s10232_s1 + $0x78] sm:$0xff]  ;;  %683 = vmatpush.bf16.msra.mxu2 %v8096_v37  ;;  %v8111_v42 = vld [vmem:[%s10232_s1 + $0x70] sm:$0xff]  ;;  %v8110_v46 = vld [vmem:[%s10232_s1 + $0x68] sm:$0xff]  ;;  %s455_s11 = scalar_lea.vmem %s10238_s7, %s5610_s9 }
  0x41   : > { %788 = vmatpush.bf16.msra.mxu3 %v8112_v38  ;;  %v8085_v47 = vld [vmem:[%s10232_s1 + $0x60] sm:$0xff]  ;;  %v8084_v51 = vld [vmem:[%s10232_s1 + $0x58] sm:$0xff]  ;;  %v8083_v55 = vld [vmem:[%s10232_s1 + $0x50] sm:$0xff] }
  0x42   : > { %543 = vmatpush.bf16.msra.mxu0 %v8087_v39  ;;  %v8077_v48 = vld [vmem:[%s10232_s1 + $0x20] sm:$0xff]  ;;  %v8076_v52 = vld [vmem:[%s10232_s1 + $0x18] sm:$0xff]  ;;  %v8075_v56 = vld [vmem:[%s10232_s1 + $0x10] sm:$0xff] }
  0x43   : > { %604 = vmatpush.bf16.msra.mxu1 %v8079_v40  ;;  %v8093_v49 = vld [vmem:[%s10232_s1 + $0xa0] sm:$0xff]  ;;  %v8092_v53 = vld [vmem:[%s10232_s1 + $0x98] sm:$0xff]  ;;  %v8091_v57 = vld [vmem:[%s10232_s1 + $0x90] sm:$0xff] }
  0x44   : > { %684 = vmatpush.bf16.msra.mxu2 %v8095_v41  ;;  %v8109_v50 = vld [vmem:[%s10232_s1 + $0x60] sm:$0xff]  ;;  %v8108_v54 = vld [vmem:[%s10232_s1 + $0x58] sm:$0xff]  ;;  %v8107_v58 = vld [vmem:[%s10232_s1 + $0x50] sm:$0xff] }
  0x45   : > { %789 = vmatpush.bf16.msra.mxu3 %v8111_v42  ;;  %v8082_v59 = vld [vmem:[%s10232_s1 + $0x48] sm:$0xff]  ;;  %v8081_v63 = vld [vmem:[%s10232_s1 + $0x40] sm:$0xff]  ;;  %v8104_v3 = vld [vmem:[%s10232_s1 + $0x38] sm:$0xff] }
  0x46   : > { %544 = vmatpush.bf16.msra.mxu0 %v8086_v43  ;;  %v8074_v60 = vld [vmem:[%s10232_s1 + $0x8] sm:$0xff]  ;;  %v8073_v0 = vld [vmem:[%s10232_s1] sm:$0xff]  ;;  %v8120_v4 = vld [vmem:[%s10232_s1 + $0xb8] sm:$0xff] }
  0x47   : > { %605 = vmatpush.bf16.msra.mxu1 %v8078_v44  ;;  %v8090_v61 = vld [vmem:[%s10232_s1 + $0x88] sm:$0xff]  ;;  %v8089_v1 = vld [vmem:[%s10232_s1 + $0x80] sm:$0xff]  ;;  %v8136_v5 = vld [vmem:[%s10232_s1 + $0x78] sm:$0xff] }
  0x48   : > { %685 = vmatpush.bf16.msra.mxu2 %v8094_v45  ;;  %v8106_v62 = vld [vmem:[%s10232_s1 + $0x48] sm:$0xff]  ;;  %v8105_v2 = vld [vmem:[%s10232_s1 + $0x40] sm:$0xff]  ;;  %v8128_v6 = vld [vmem:[%s10232_s1 + $0x38] sm:$0xff] }
  0x49   : > { %790 = vmatpush.bf16.msra.mxu3 %v8110_v46  ;;  %v8103_v7 = vld [vmem:[%s10232_s1 + $0x30] sm:$0xff]  ;;  %v458_v9 = vld [vmem:[%s8833_s23] sm:$0xf]  ;;  %v5742_v12 = vld [vmem:[%s8833_s23 + $0xc] sm:$0xf] }
  0x4a   : > { %545 = vmatpush.bf16.msra.mxu0 %v8085_v47  ;;  %v5611_v8 = vld [vmem:[%s8833_s23 + $0x4] sm:$0xf]  ;;  %v5692_v11 = vld [vmem:[%s8833_s23 + $0x8] sm:$0xf]  ;;  %v8100_v23 = vld [vmem:[%s10232_s1 + $0x18] sm:$0xff] }
  0x4b   : > { %606 = vmatpush.bf16.msra.mxu1 %v8077_v48  ;;  %v8119_v10 = vld [vmem:[%s10232_s1 + $0xb0] sm:$0xff]  ;;  %v8102_v15 = vld [vmem:[%s10232_s1 + $0x28] sm:$0xff]  ;;  %v8101_v19 = vld [vmem:[%s10232_s1 + $0x20] sm:$0xff] }
  0x4c   : > { %686 = vmatpush.bf16.msra.mxu2 %v8093_v49  ;;  %v8135_v13 = vld [vmem:[%s10232_s1 + $0x70] sm:$0xff]  ;;  %v8118_v16 = vld [vmem:[%s10232_s1 + $0xa8] sm:$0xff]  ;;  %v8117_v20 = vld [vmem:[%s10232_s1 + $0xa0] sm:$0xff] }
  0x4d   : > { %791 = vmatpush.bf16.msra.mxu3 %v8109_v50  ;;  %v8127_v14 = vld [vmem:[%s10232_s1 + $0x30] sm:$0xff]  ;;  %v8134_v17 = vld [vmem:[%s10232_s1 + $0x68] sm:$0xff]  ;;  %v8133_v21 = vld [vmem:[%s10232_s1 + $0x60] sm:$0xff] }
  0x4e   : > { %546 = vmatpush.bf16.msra.mxu0 %v8084_v51  ;;  %v8126_v18 = vld [vmem:[%s10232_s1 + $0x28] sm:$0xff]  ;;  %v8125_v22 = vld [vmem:[%s10232_s1 + $0x20] sm:$0xff]  ;;  %v8116_v24 = vld [vmem:[%s10232_s1 + $0x98] sm:$0xff] }
  0x4f   : > { %607 = vmatpush.bf16.msra.mxu1 %v8076_v52  ;;  %v8132_v25 = vld [vmem:[%s10232_s1 + $0x58] sm:$0xff]  ;;  %v8099_v27 = vld [vmem:[%s10232_s1 + $0x10] sm:$0xff]  ;;  %v8098_v31 = vld [vmem:[%s10232_s1 + $0x8] sm:$0xff] }
  0x50   : > { %687 = vmatpush.bf16.msra.mxu2 %v8092_v53  ;;  %v8124_v26 = vld [vmem:[%s10232_s1 + $0x18] sm:$0xff]  ;;  %v8115_v28 = vld [vmem:[%s10232_s1 + $0x90] sm:$0xff]  ;;  %v8114_v32 = vld [vmem:[%s10232_s1 + $0x88] sm:$0xff] }
  0x51   : > { %792 = vmatpush.bf16.msra.mxu3 %v8108_v54  ;;  %v8131_v29 = vld [vmem:[%s10232_s1 + $0x50] sm:$0xff]  ;;  %v8130_v33 = vld [vmem:[%s10232_s1 + $0x48] sm:$0xff]  ;;  %v8097_v35 = vld [vmem:[%s10232_s1] sm:$0xff] }
  0x52   : > { %547 = vmatpush.bf16.msra.mxu0 %v8083_v55  ;;  %v8123_v30 = vld [vmem:[%s10232_s1 + $0x10] sm:$0xff]  ;;  %v8122_v34 = vld [vmem:[%s10232_s1 + $0x8] sm:$0xff]  ;;  %v8113_v36 = vld [vmem:[%s10232_s1 + $0x80] sm:$0xff] }
  0x53   : > { %608 = vmatpush.bf16.msra.mxu1 %v8075_v56  ;;  %v8129_v37 = vld [vmem:[%s10232_s1 + $0x40] sm:$0xff]  ;;  %v8144_v39 = vld [vmem:[%s10232_s1 + $0xb8] sm:$0xff]  ;;  %v8143_v43 = vld [vmem:[%s10232_s1 + $0xb0] sm:$0xff] }
  0x54   : > { %688 = vmatpush.bf16.msra.mxu2 %v8091_v57  ;;  %v8121_v38 = vld [vmem:[%s10232_s1] sm:$0xff]  ;;  %v8160_v40 = vld [vmem:[%s10232_s1 + $0x78] sm:$0xff]  ;;  %v5741_v44 = vld [vmem:[%s8833_s23 + $0x8] sm:$0xf] }
  0x55   : > { %793 = vmatpush.bf16.msra.mxu3 %v8107_v58  ;;  %v8152_v41 = vld [vmem:[%s10232_s1 + $0x38] sm:$0xff]  ;;  %v8159_v46 = vld [vmem:[%s10232_s1 + $0x70] sm:$0xff]  ;;  %v8142_v51 = vld [vmem:[%s10232_s1 + $0xa8] sm:$0xff] }
  0x56   : > { %548 = vmatpush.bf16.msra.mxu0 %v8082_v59  ;;  %v8168_v42 = vld [vmem:[%s10232_s1 + $0xb8] sm:$0xff]  ;;  %v5873_v48 = vld [vmem:[%s8833_s23 + $0x14] sm:$0xf]  ;;  %v8158_v52 = vld [vmem:[%s10232_s1 + $0x68] sm:$0xff] }
  0x57   : > { %609 = vmatpush.bf16.msra.mxu1 %v8074_v60  ;;  %v5823_v45 = vld [vmem:[%s8833_s23 + $0x10] sm:$0xf]  ;;  %v8150_v53 = vld [vmem:[%s10232_s1 + $0x28] sm:$0xff]  ;;  %v8141_v55 = vld [vmem:[%s10232_s1 + $0xa0] sm:$0xff] }
  0x58   : > { %689 = vmatpush.bf16.msra.mxu2 %v8090_v61  ;;  %v5872_v47 = vld [vmem:[%s8833_s23 + $0x10] sm:$0xf]  ;;  %v8166_v54 = vld [vmem:[%s10232_s1 + $0xa8] sm:$0xff]  ;;  %v8157_v56 = vld [vmem:[%s10232_s1 + $0x60] sm:$0xff] }
  0x59   : > { %794 = vmatpush.bf16.msra.mxu3 %v8106_v62  ;;  %v8151_v49 = vld [vmem:[%s10232_s1 + $0x30] sm:$0xff]  ;;  %v8149_v57 = vld [vmem:[%s10232_s1 + $0x20] sm:$0xff]  ;;  %v8140_v59 = vld [vmem:[%s10232_s1 + $0x98] sm:$0xff] }
  0x5a   : > { %549 = vmatpush.bf16.msra.mxu0 %v8081_v63  ;;  %v8167_v50 = vld [vmem:[%s10232_s1 + $0xb0] sm:$0xff]  ;;  %v8165_v58 = vld [vmem:[%s10232_s1 + $0xa0] sm:$0xff]  ;;  %v8156_v60 = vld [vmem:[%s10232_s1 + $0x58] sm:$0xff] }
  0x5b   : > { %610 = vmatpush.bf16.msra.mxu1 %v8073_v0  ;;  %v8148_v61 = vld [vmem:[%s10232_s1 + $0x18] sm:$0xff]  ;;  %v8139_v63 = vld [vmem:[%s10232_s1 + $0x90] sm:$0xff] }
  0x5c   : > { %690 = vmatpush.bf16.msra.mxu2 %v8089_v1  ;;  %v8164_v62 = vld [vmem:[%s10232_s1 + $0x98] sm:$0xff]  ;;  %v8155_v0 = vld [vmem:[%s10232_s1 + $0x50] sm:$0xff] }
  0x5d   : > { %795 = vmatpush.bf16.msra.mxu3 %v8105_v2  ;;  %550 = vmatmul.bf16.vlgmr.msra.gmra.mxu0 %v5611_v8  ;;  %v8147_v1 = vld [vmem:[%s10232_s1 + $0x10] sm:$0xff]  ;;  %v8153_v8 = vld [vmem:[%s10232_s1 + $0x40] sm:$0xff] }
  0x5e   : > { %849 = vmatpush.bf16.msrb.mxu0 %v8104_v3  ;;  %611 = vmatmul.bf16.vlgmr.msra.gmra.mxu1 %v458_v9  ;;  %v8163_v2 = vld [vmem:[%s10232_s1 + $0x90] sm:$0xff]  ;;  %v8138_v3 = vld [vmem:[%s10232_s1 + $0x88] sm:$0xff]  ;;  %v8145_v9 = vld [vmem:[%s10232_s1] sm:$0xff] }
  0x5f   : > { %928 = vmatpush.bf16.msrb.mxu1 %v8120_v4  ;;  %691 = vmatmul.bf16.vlgmr.msra.gmra.mxu2 %v5692_v11  ;;  %v8154_v4 = vld [vmem:[%s10232_s1 + $0x48] sm:$0xff]  ;;  %v8184_v11 = vld [vmem:[%s10232_s1 + $0x78] sm:$0xff] }
  0x60   : > { %1030 = vmatpush.bf16.msrb.mxu2 %v8136_v5  ;;  %796 = vmatmul.bf16.vlgmr.msra.gmra.mxu3 %v5742_v12  ;;  %v8146_v5 = vld [vmem:[%s10232_s1 + $0x8] sm:$0xff]  ;;  %v8176_v12 = vld [vmem:[%s10232_s1 + $0x38] sm:$0xff] }
  0x61   : > { %1091 = vmatpush.bf16.msrb.mxu3 %v8128_v6  ;;  %v8162_v6 = vld [vmem:[%s10232_s1 + $0x88] sm:$0xff] }
  0x62   : > { %850 = vmatpush.bf16.msrb.mxu0 %v8103_v7  ;;  %v8137_v7 = vld [vmem:[%s10232_s1 + $0x80] sm:$0xff] }
  0x63   : > { %929 = vmatpush.bf16.msrb.mxu1 %v8119_v10  ;;  %v8161_v10 = vld [vmem:[%s10232_s1 + $0x80] sm:$0xff] }
  0x64   : > { %1031 = vmatpush.bf16.msrb.mxu2 %v8135_v13  ;;  %v8192_v13 = vld [vmem:[%s10232_s1 + $0xb8] sm:$0xff] }
  0x65   : > { %1092 = vmatpush.bf16.msrb.mxu3 %v8127_v14  ;;  %v8208_v14 = vld [vmem:[%s10232_s1 + $0x78] sm:$0xff] }
  0x66   : > { %851 = vmatpush.bf16.msrb.mxu0 %v8102_v15  ;;  %v8183_v15 = vld [vmem:[%s10232_s1 + $0x70] sm:$0xff] }
  0x67   : > { %930 = vmatpush.bf16.msrb.mxu1 %v8118_v16  ;;  %v5954_v16 = vld [vmem:[%s8833_s23 + $0x18] sm:$0xf] }
  0x68   : > { %1032 = vmatpush.bf16.msrb.mxu2 %v8134_v17  ;;  %v6004_v17 = vld [vmem:[%s8833_s23 + $0x1c] sm:$0xf] }
  0x69   : > { %1093 = vmatpush.bf16.msrb.mxu3 %v8126_v18  ;;  %v8175_v18 = vld [vmem:[%s10232_s1 + $0x30] sm:$0xff] }
  0x6a   : > { %852 = vmatpush.bf16.msrb.mxu0 %v8101_v19  ;;  %v6003_v19 = vld [vmem:[%s8833_s23 + $0x18] sm:$0xf] }
  0x6b   : > { %931 = vmatpush.bf16.msrb.mxu1 %v8117_v20  ;;  %v6085_v20 = vld [vmem:[%s8833_s23 + $0x20] sm:$0xf] }
  0x6c   : > { %1033 = vmatpush.bf16.msrb.mxu2 %v8133_v21  ;;  %v8191_v21 = vld [vmem:[%s10232_s1 + $0xb0] sm:$0xff] }
  0x6d   : > { %1094 = vmatpush.bf16.msrb.mxu3 %v8125_v22  ;;  %v8207_v22 = vld [vmem:[%s10232_s1 + $0x70] sm:$0xff] }
  0x6e   : > { %853 = vmatpush.bf16.msrb.mxu0 %v8100_v23  ;;  %v8182_v23 = vld [vmem:[%s10232_s1 + $0x68] sm:$0xff] }
  0x6f   : > { %932 = vmatpush.bf16.msrb.mxu1 %v8116_v24  ;;  %v8174_v24 = vld [vmem:[%s10232_s1 + $0x28] sm:$0xff] }
  0x70   : > { %1034 = vmatpush.bf16.msrb.mxu2 %v8132_v25  ;;  %v8190_v25 = vld [vmem:[%s10232_s1 + $0xa8] sm:$0xff] }
  0x71   : > { %1095 = vmatpush.bf16.msrb.mxu3 %v8124_v26  ;;  %v8206_v26 = vld [vmem:[%s10232_s1 + $0x68] sm:$0xff] }
  0x72   : > { %854 = vmatpush.bf16.msrb.mxu0 %v8099_v27  ;;  %v8181_v27 = vld [vmem:[%s10232_s1 + $0x60] sm:$0xff] }
  0x73   : > { %933 = vmatpush.bf16.msrb.mxu1 %v8115_v28  ;;  %v8173_v28 = vld [vmem:[%s10232_s1 + $0x20] sm:$0xff] }
  0x74   : > { %1035 = vmatpush.bf16.msrb.mxu2 %v8131_v29  ;;  %v8189_v29 = vld [vmem:[%s10232_s1 + $0xa0] sm:$0xff] }
  0x75   : > { %1096 = vmatpush.bf16.msrb.mxu3 %v8123_v30  ;;  %v8205_v30 = vld [vmem:[%s10232_s1 + $0x60] sm:$0xff] }
  0x76   : > { %855 = vmatpush.bf16.msrb.mxu0 %v8098_v31  ;;  %v8180_v31 = vld [vmem:[%s10232_s1 + $0x58] sm:$0xff] }
  0x77   : > { %934 = vmatpush.bf16.msrb.mxu1 %v8114_v32  ;;  %v8172_v32 = vld [vmem:[%s10232_s1 + $0x18] sm:$0xff] }
  0x78   : > { %1036 = vmatpush.bf16.msrb.mxu2 %v8130_v33  ;;  %v8188_v33 = vld [vmem:[%s10232_s1 + $0x98] sm:$0xff] }
  0x79   : > { %1097 = vmatpush.bf16.msrb.mxu3 %v8122_v34  ;;  %v8204_v34 = vld [vmem:[%s10232_s1 + $0x58] sm:$0xff] }
  0x7a   : > { %856 = vmatpush.bf16.msrb.mxu0 %v8097_v35  ;;  %v8179_v35 = vld [vmem:[%s10232_s1 + $0x50] sm:$0xff] }
  0x7b   : > { %935 = vmatpush.bf16.msrb.mxu1 %v8113_v36  ;;  %v8171_v36 = vld [vmem:[%s10232_s1 + $0x10] sm:$0xff] }
  0x7c   : > { %1037 = vmatpush.bf16.msrb.mxu2 %v8129_v37  ;;  %v8187_v37 = vld [vmem:[%s10232_s1 + $0x90] sm:$0xff] }
  0x7d   : > { %1098 = vmatpush.bf16.msrb.mxu3 %v8121_v38  ;;  %857 = vmatmul.bf16.vlgmr.msrb.gmra.mxu0 %v5741_v44  ;;  %v8203_v38 = vld [vmem:[%s10232_s1 + $0x50] sm:$0xff]  ;;  %v8169_v44 = vld [vmem:[%s10232_s1] sm:$0xff] }
  0x7e   : > { %1170 = vmatpush.bf16.msra.mxu0 %v8144_v39  ;;  %936 = vmatmul.bf16.vlgmr.msrb.gmra.mxu1 %v5823_v45  ;;  %v8178_v39 = vld [vmem:[%s10232_s1 + $0x48] sm:$0xff]  ;;  %v8185_v45 = vld [vmem:[%s10232_s1 + $0x80] sm:$0xff] }
  0x7f   : > { %1272 = vmatpush.bf16.msra.mxu1 %v8160_v40  ;;  %1038 = vmatmul.bf16.vlgmr.msrb.gmra.mxu2 %v5873_v48  ;;  %v8170_v40 = vld [vmem:[%s10232_s1 + $0x8] sm:$0xff]  ;;  %v8216_v48 = vld [vmem:[%s10232_s1 + $0xb8] sm:$0xff] }
  0x80   : > { %1333 = vmatpush.bf16.msra.mxu2 %v8152_v41  ;;  %1099 = vmatmul.bf16.vlgmr.msrb.gmra.mxu3 %v5872_v47  ;;  %v8186_v41 = vld [vmem:[%s10232_s1 + $0x88] sm:$0xff]  ;;  %v8200_v47 = vld [vmem:[%s10232_s1 + $0x38] sm:$0xff] }
  0x81   : > { %1412 = vmatpush.bf16.msra.mxu3 %v8168_v42  ;;  %v8202_v42 = vld [vmem:[%s10232_s1 + $0x48] sm:$0xff] }
  0x82   : > { %1171 = vmatpush.bf16.msra.mxu0 %v8143_v43  ;;  %v8177_v43 = vld [vmem:[%s10232_s1 + $0x40] sm:$0xff] }
  0x83   : > { %1273 = vmatpush.bf16.msra.mxu1 %v8159_v46  ;;  %v8201_v46 = vld [vmem:[%s10232_s1 + $0x40] sm:$0xff] }
  0x84   : > { %1334 = vmatpush.bf16.msra.mxu2 %v8151_v49  ;;  %v8232_v49 = vld [vmem:[%s10232_s1 + $0x78] sm:$0xff] }
  0x85   : > { %1413 = vmatpush.bf16.msra.mxu3 %v8167_v50  ;;  %v8224_v50 = vld [vmem:[%s10232_s1 + $0x38] sm:$0xff] }
  0x86   : > { %1172 = vmatpush.bf16.msra.mxu0 %v8142_v51  ;;  %v8199_v51 = vld [vmem:[%s10232_s1 + $0x30] sm:$0xff] }
  0x87   : > { %1274 = vmatpush.bf16.msra.mxu1 %v8158_v52  ;;  %v6135_v52 = vld [vmem:[%s8833_s23 + $0x24] sm:$0xf] }
  0x88   : > { %1335 = vmatpush.bf16.msra.mxu2 %v8150_v53  ;;  %v6134_v53 = vld [vmem:[%s8833_s23 + $0x20] sm:$0xf] }
  0x89   : > { %1414 = vmatpush.bf16.msra.mxu3 %v8166_v54  ;;  %v8215_v54 = vld [vmem:[%s10232_s1 + $0xb0] sm:$0xff] }
  0x8a   : > { %1173 = vmatpush.bf16.msra.mxu0 %v8141_v55  ;;  %v6216_v55 = vld [vmem:[%s8833_s23 + $0x28] sm:$0xf] }
  0x8b   : > { %1275 = vmatpush.bf16.msra.mxu1 %v8157_v56  ;;  %v6266_v56 = vld [vmem:[%s8833_s23 + $0x2c] sm:$0xf] }
  0x8c   : > { %1336 = vmatpush.bf16.msra.mxu2 %v8149_v57  ;;  %v8231_v57 = vld [vmem:[%s10232_s1 + $0x70] sm:$0xff] }
  0x8d   : > { %1415 = vmatpush.bf16.msra.mxu3 %v8165_v58  ;;  %v8223_v58 = vld [vmem:[%s10232_s1 + $0x30] sm:$0xff] }
  0x8e   : > { %1174 = vmatpush.bf16.msra.mxu0 %v8140_v59  ;;  %v8198_v59 = vld [vmem:[%s10232_s1 + $0x28] sm:$0xff] }
  0x8f   : > { %1276 = vmatpush.bf16.msra.mxu1 %v8156_v60  ;;  %v8214_v60 = vld [vmem:[%s10232_s1 + $0xa8] sm:$0xff] }
  0x90   : > { %1337 = vmatpush.bf16.msra.mxu2 %v8148_v61  ;;  %v8230_v61 = vld [vmem:[%s10232_s1 + $0x68] sm:$0xff] }
  0x91   : > { %1416 = vmatpush.bf16.msra.mxu3 %v8164_v62  ;;  %v8222_v62 = vld [vmem:[%s10232_s1 + $0x28] sm:$0xff] }
  0x92   : > { %1175 = vmatpush.bf16.msra.mxu0 %v8139_v63  ;;  %v8197_v63 = vld [vmem:[%s10232_s1 + $0x20] sm:$0xff] }
  0x93   : > { %1277 = vmatpush.bf16.msra.mxu1 %v8155_v0  ;;  %v8213_v0 = vld [vmem:[%s10232_s1 + $0xa0] sm:$0xff] }
  0x94   : > { %1338 = vmatpush.bf16.msra.mxu2 %v8147_v1  ;;  %v8229_v1 = vld [vmem:[%s10232_s1 + $0x60] sm:$0xff] }
  0x95   : > { %1417 = vmatpush.bf16.msra.mxu3 %v8163_v2  ;;  %v8221_v2 = vld [vmem:[%s10232_s1 + $0x20] sm:$0xff] }
  0x96   : > { %1176 = vmatpush.bf16.msra.mxu0 %v8138_v3  ;;  %v8196_v3 = vld [vmem:[%s10232_s1 + $0x18] sm:$0xff] }
  0x97   : > { %1278 = vmatpush.bf16.msra.mxu1 %v8154_v4  ;;  %v8212_v4 = vld [vmem:[%s10232_s1 + $0x98] sm:$0xff] }
  0x98   : > { %1339 = vmatpush.bf16.msra.mxu2 %v8146_v5  ;;  %v8228_v5 = vld [vmem:[%s10232_s1 + $0x58] sm:$0xff] }
  0x99   : > { %1418 = vmatpush.bf16.msra.mxu3 %v8162_v6  ;;  %v8220_v6 = vld [vmem:[%s10232_s1 + $0x18] sm:$0xff] }
  0x9a   : > { %1177 = vmatpush.bf16.msra.mxu0 %v8137_v7  ;;  %v8195_v7 = vld [vmem:[%s10232_s1 + $0x10] sm:$0xff] }
  0x9b   : > { %1279 = vmatpush.bf16.msra.mxu1 %v8153_v8  ;;  %v8211_v8 = vld [vmem:[%s10232_s1 + $0x90] sm:$0xff] }
  0x9c   : > { %1340 = vmatpush.bf16.msra.mxu2 %v8145_v9  ;;  %v8227_v9 = vld [vmem:[%s10232_s1 + $0x50] sm:$0xff] }
  0x9d   : > { %1419 = vmatpush.bf16.msra.mxu3 %v8161_v10  ;;  %1178 = vmatmul.bf16.vlgmr.msra.gmra.mxu0 %v5954_v16  ;;  %v8219_v10 = vld [vmem:[%s10232_s1 + $0x10] sm:$0xff]  ;;  %v8209_v16 = vld [vmem:[%s10232_s1 + $0x80] sm:$0xff] }
  0x9e   : > { %1514 = vmatpush.bf16.msrb.mxu0 %v8184_v11  ;;  %1280 = vmatmul.bf16.vlgmr.msra.gmra.mxu1 %v6004_v17  ;;  %v8194_v11 = vld [vmem:[%s10232_s1 + $0x8] sm:$0xff]  ;;  %v8225_v17 = vld [vmem:[%s10232_s1 + $0x40] sm:$0xff] }
  0x9f   : > { %1575 = vmatpush.bf16.msrb.mxu1 %v8176_v12  ;;  %1341 = vmatmul.bf16.vlgmr.msra.gmra.mxu2 %v6003_v19  ;;  %v8210_v12 = vld [vmem:[%s10232_s1 + $0x88] sm:$0xff]  ;;  %v8240_v19 = vld [vmem:[%s10232_s1 + $0xb8] sm:$0xff] }
  0xa0   : > { %1654 = vmatpush.bf16.msrb.mxu2 %v8192_v13  ;;  %1420 = vmatmul.bf16.vlgmr.msra.gmra.mxu3 %v6085_v20  ;;  %v8226_v13 = vld [vmem:[%s10232_s1 + $0x48] sm:$0xff]  ;;  %v8256_v20 = vld [vmem:[%s10232_s1 + $0x78] sm:$0xff] }
  0xa1   : > { %1756 = vmatpush.bf16.msrb.mxu3 %v8208_v14  ;;  %v8218_v14 = vld [vmem:[%s10232_s1 + $0x8] sm:$0xff] }
  0xa2   : > { %1515 = vmatpush.bf16.msrb.mxu0 %v8183_v15  ;;  %v8193_v15 = vld [vmem:[%s10232_s1] sm:$0xff] }
  0xa3   : > { %1576 = vmatpush.bf16.msrb.mxu1 %v8175_v18  ;;  %v8217_v18 = vld [vmem:[%s10232_s1] sm:$0xff] }
  0xa4   : > { %1655 = vmatpush.bf16.msrb.mxu2 %v8191_v21  ;;  %v8248_v21 = vld [vmem:[%s10232_s1 + $0x38] sm:$0xff] }
  0xa5   : > { %1757 = vmatpush.bf16.msrb.mxu3 %v8207_v22  ;;  %v8264_v22 = vld [vmem:[%s10232_s1 + $0xb8] sm:$0xff] }
  0xa6   : > { %1516 = vmatpush.bf16.msrb.mxu0 %v8182_v23  ;;  %v8239_v23 = vld [vmem:[%s10232_s1 + $0xb0] sm:$0xff] }
  0xa7   : > { %1577 = vmatpush.bf16.msrb.mxu1 %v8174_v24  ;;  %v6265_v24 = vld [vmem:[%s8833_s23 + $0x28] sm:$0xf] }
  0xa8   : > { %1656 = vmatpush.bf16.msrb.mxu2 %v8190_v25  ;;  %v6347_v25 = vld [vmem:[%s8833_s23 + $0x30] sm:$0xf] }
  0xa9   : > { %1758 = vmatpush.bf16.msrb.mxu3 %v8206_v26  ;;  %v8255_v26 = vld [vmem:[%s10232_s1 + $0x70] sm:$0xff] }
  0xaa   : > { %1517 = vmatpush.bf16.msrb.mxu0 %v8181_v27  ;;  %v6396_v27 = vld [vmem:[%s8833_s23 + $0x30] sm:$0xf] }
  0xab   : > { %1578 = vmatpush.bf16.msrb.mxu1 %v8173_v28  ;;  %v6397_v28 = vld [vmem:[%s8833_s23 + $0x34] sm:$0xf] }
  0xac   : > { %1657 = vmatpush.bf16.msrb.mxu2 %v8189_v29  ;;  %v8247_v29 = vld [vmem:[%s10232_s1 + $0x30] sm:$0xff] }
  0xad   : > { %1759 = vmatpush.bf16.msrb.mxu3 %v8205_v30  ;;  %v8263_v30 = vld [vmem:[%s10232_s1 + $0xb0] sm:$0xff] }
  0xae   : > { %1518 = vmatpush.bf16.msrb.mxu0 %v8180_v31  ;;  %v8238_v31 = vld [vmem:[%s10232_s1 + $0xa8] sm:$0xff] }
  0xaf   : > { %1579 = vmatpush.bf16.msrb.mxu1 %v8172_v32  ;;  %v8254_v32 = vld [vmem:[%s10232_s1 + $0x68] sm:$0xff] }
  0xb0   : > { %1658 = vmatpush.bf16.msrb.mxu2 %v8188_v33  ;;  %v8246_v33 = vld [vmem:[%s10232_s1 + $0x28] sm:$0xff] }
  0xb1   : > { %1760 = vmatpush.bf16.msrb.mxu3 %v8204_v34  ;;  %v8262_v34 = vld [vmem:[%s10232_s1 + $0xa8] sm:$0xff] }
  0xb2   : > { %1519 = vmatpush.bf16.msrb.mxu0 %v8179_v35 }
  0xb3   : > { %1580 = vmatpush.bf16.msrb.mxu1 %v8171_v36 }
  0xb4   : > { %1659 = vmatpush.bf16.msrb.mxu2 %v8187_v37  ;;  %v8237_v37 = vld [vmem:[%s10232_s1 + $0xa0] sm:$0xff] }
  0xb5   : > { %1761 = vmatpush.bf16.msrb.mxu3 %v8203_v38  ;;  %v8253_v38 = vld [vmem:[%s10232_s1 + $0x60] sm:$0xff] }
  0xb6   : > { %1520 = vmatpush.bf16.msrb.mxu0 %v8178_v39  ;;  %v8245_v39 = vld [vmem:[%s10232_s1 + $0x20] sm:$0xff] }
  0xb7   : > { %1581 = vmatpush.bf16.msrb.mxu1 %v8170_v40  ;;  %v8261_v40 = vld [vmem:[%s10232_s1 + $0xa0] sm:$0xff] }
  0xb8   : > { %1660 = vmatpush.bf16.msrb.mxu2 %v8186_v41 }
  0xb9   : > { %1762 = vmatpush.bf16.msrb.mxu3 %v8202_v42  ;;  %v8236_v42 = vld [vmem:[%s10232_s1 + $0x98] sm:$0xff] }
  0xba   : > { %1521 = vmatpush.bf16.msrb.mxu0 %v8177_v43  ;;  %v8252_v43 = vld [vmem:[%s10232_s1 + $0x58] sm:$0xff] }
  0xbb   : > { %1582 = vmatpush.bf16.msrb.mxu1 %v8169_v44  ;;  %v8244_v44 = vld [vmem:[%s10232_s1 + $0x18] sm:$0xff] }
  0xbc   : > { %1661 = vmatpush.bf16.msrb.mxu2 %v8185_v45  ;;  %v8260_v45 = vld [vmem:[%s10232_s1 + $0x98] sm:$0xff] }
  0xbd   : > { %1763 = vmatpush.bf16.msrb.mxu3 %v8201_v46  ;;  %1522 = vmatmul.bf16.vlgmr.msrb.gmra.mxu0 %v6135_v52  ;;  %v9287_v46 = vld [vmem:[%s10235_s4] ss:$0 sm:$0xff]  ;;  %v8235_v52 = vld [vmem:[%s10232_s1 + $0x90] sm:$0xff] }
  0xbe   : > { %1817 = vmatpush.bf16.msra.mxu0 %v8200_v47  ;;  %1583 = vmatmul.bf16.vlgmr.msrb.gmra.mxu1 %v6134_v53  ;;  %v8251_v53 = vld [vmem:[%s10232_s1 + $0x50] sm:$0xff] }
  0xbf   : > { %1896 = vmatpush.bf16.msra.mxu1 %v8216_v48  ;;  %1662 = vmatmul.bf16.vlgmr.msrb.gmra.mxu2 %v6216_v55  ;;  %v8259_v55 = vld [vmem:[%s10232_s1 + $0x90] sm:$0xff] }
  0xc0   : > { %1998 = vmatpush.bf16.msra.mxu2 %v8232_v49  ;;  %1764 = vmatmul.bf16.vlgmr.msrb.gmra.mxu3 %v6266_v56 }
  0xc1   : > { %2059 = vmatpush.bf16.msra.mxu3 %v8224_v50 }
  0xc2   : > { %1818 = vmatpush.bf16.msra.mxu0 %v8199_v51 }
  0xc3   : > { %1897 = vmatpush.bf16.msra.mxu1 %v8215_v54  ;;  %v8243_v54 = vld [vmem:[%s10232_s1 + $0x10] sm:$0xff] }
  0xc4   : > { %1999 = vmatpush.bf16.msra.mxu2 %v8231_v57 }
  0xc5   : > { %2060 = vmatpush.bf16.msra.mxu3 %v8223_v58  ;;  %v8234_v58 = vld [vmem:[%s10232_s1 + $0x88] sm:$0xff] }
  0xc6   : > { %1819 = vmatpush.bf16.msra.mxu0 %v8198_v59  ;;  %v8250_v59 = vld [vmem:[%s10232_s1 + $0x48] sm:$0xff] }
  0xc7   : > { %1898 = vmatpush.bf16.msra.mxu1 %v8214_v60  ;;  %v8242_v60 = vld [vmem:[%s10232_s1 + $0x8] sm:$0xff] }
  0xc8   : > { %2000 = vmatpush.bf16.msra.mxu2 %v8230_v61  ;;  %v8258_v61 = vld [vmem:[%s10232_s1 + $0x88] sm:$0xff] }
  0xc9   : > { %2061 = vmatpush.bf16.msra.mxu3 %v8222_v62 }
  0xca   : > { %1820 = vmatpush.bf16.msra.mxu0 %v8197_v63 }
  0xcb   : > { %1899 = vmatpush.bf16.msra.mxu1 %v8213_v0 }
  0xcc   : > { %2001 = vmatpush.bf16.msra.mxu2 %v8229_v1  ;;  %v8233_v1 = vld [vmem:[%s10232_s1 + $0x80] sm:$0xff] }
  0xcd   : > { %2062 = vmatpush.bf16.msra.mxu3 %v8221_v2  ;;  %v8249_v2 = vld [vmem:[%s10232_s1 + $0x40] sm:$0xff] }
  0xce   : > { %1821 = vmatpush.bf16.msra.mxu0 %v8196_v3  ;;  %v8241_v3 = vld [vmem:[%s10232_s1] sm:$0xff] }
  0xcf   : > { %1900 = vmatpush.bf16.msra.mxu1 %v8212_v4  ;;  %v8257_v4 = vld [vmem:[%s10232_s1 + $0x80] sm:$0xff] }
  0xd0   : > { %2002 = vmatpush.bf16.msra.mxu2 %v8228_v5  ;;  %v8280_v5 = vld [vmem:[%s10232_s1 + $0x78] sm:$0xff] }
  0xd1   : > { %2063 = vmatpush.bf16.msra.mxu3 %v8220_v6  ;;  %v8272_v6 = vld [vmem:[%s10232_s1 + $0x38] sm:$0xff] }
  0xd2   : > { %1822 = vmatpush.bf16.msra.mxu0 %v8195_v7  ;;  %v8288_v7 = vld [vmem:[%s10232_s1 + $0xb8] sm:$0xff] }
  0xd3   : > { %1901 = vmatpush.bf16.msra.mxu1 %v8211_v8  ;;  %v8304_v8 = vld [vmem:[%s10232_s1 + $0x78] sm:$0xff] }
  0xd4   : > { %2003 = vmatpush.bf16.msra.mxu2 %v8227_v9  ;;  %v8279_v9 = vld [vmem:[%s10232_s1 + $0x70] sm:$0xff] }
  0xd5   : > { %2064 = vmatpush.bf16.msra.mxu3 %v8219_v10  ;;  %v6478_v10 = vld [vmem:[%s8833_s23 + $0x38] sm:$0xf] }
  0xd6   : > { %1823 = vmatpush.bf16.msra.mxu0 %v8194_v11  ;;  %v6528_v11 = vld [vmem:[%s8833_s23 + $0x3c] sm:$0xf] }
  0xd7   : > { %1902 = vmatpush.bf16.msra.mxu1 %v8210_v12  ;;  %v8271_v12 = vld [vmem:[%s10232_s1 + $0x30] sm:$0xff] }
  0xd8   : > { %2004 = vmatpush.bf16.msra.mxu2 %v8226_v13  ;;  %v6527_v13 = vld [vmem:[%s8833_s23 + $0x38] sm:$0xf] }
  0xd9   : > { %2065 = vmatpush.bf16.msra.mxu3 %v8218_v14  ;;  %v6609_v14 = vld [vmem:[%s8833_s23 + $0x40] sm:$0xf] }
  0xda   : > { %1824 = vmatpush.bf16.msra.mxu0 %v8193_v15  ;;  %v551_v35 = vpop.f32.mrf.mxu0  ;;  %v8287_v15 = vld [vmem:[%s10232_s1 + $0xb0] sm:$0xff] }
  0xdb   : > { %1903 = vmatpush.bf16.msra.mxu1 %v8209_v16  ;;  %v612_v36 = vpop.f32.mrf.mxu1  ;;  %v8303_v16 = vld [vmem:[%s10232_s1 + $0x70] sm:$0xff] }
  0xdc   : > { %2005 = vmatpush.bf16.msra.mxu2 %v8225_v17  ;;  %v613_v41 = vadd.f32 %v612_v36, %v551_v35  ;;  %v8278_v17 = vld [vmem:[%s10232_s1 + $0x68] sm:$0xff] }
  0xdd   : > { %2066 = vmatpush.bf16.msra.mxu3 %v8217_v18  ;;  %1825 = vmatmul.bf16.vlgmr.msra.gmra.mxu0 %v6265_v24  ;;  %v8270_v18 = vld [vmem:[%s10232_s1 + $0x28] sm:$0xff]  ;;  %v8269_v24 = vld [vmem:[%s10232_s1 + $0x20] sm:$0xff] }
  0xde   : > { %2138 = vmatpush.bf16.msrb.mxu0 %v8240_v19  ;;  %1904 = vmatmul.bf16.vlgmr.msra.gmra.mxu1 %v6347_v25  ;;  %v8286_v19 = vld [vmem:[%s10232_s1 + $0xa8] sm:$0xff] }
  0xdf   : > { %2240 = vmatpush.bf16.msrb.mxu1 %v8256_v20  ;;  %2006 = vmatmul.bf16.vlgmr.msra.gmra.mxu2 %v6397_v28  ;;  %v8302_v20 = vld [vmem:[%s10232_s1 + $0x68] sm:$0xff] }
  0xe0   : > { %2301 = vmatpush.bf16.msrb.mxu2 %v8248_v21  ;;  %2067 = vmatmul.bf16.vlgmr.msra.gmra.mxu3 %v6396_v27  ;;  %v8301_v27 = vld [vmem:[%s10232_s1 + $0x60] sm:$0xff] }
  0xe1   : > { %2380 = vmatpush.bf16.msrb.mxu3 %v8264_v22 }
  0xe2   : > { %2139 = vmatpush.bf16.msrb.mxu0 %v8239_v23  ;;  %v692_v47 = vpop.f32.mrf.mxu2  ;;  %v553_v49 = vpop.f32.mrf.mxu0  ;;  %v8277_v23 = vld [vmem:[%s10232_s1 + $0x60] sm:$0xff] }
  0xe3   : > { %2241 = vmatpush.bf16.msrb.mxu1 %v8255_v26  ;;  %v9289_v48 = vpop.f32.mrf.mxu3  ;;  %v614_v50 = vpop.f32.mrf.mxu1  ;;  %v696_v51 = vadd.f32 %v692_v47, %v613_v41  ;;  %v8285_v26 = vld [vmem:[%s10232_s1 + $0xa0] sm:$0xff]  ;;  %v8282_v47 = vld [vmem:[%s10232_s1 + $0x88] sm:$0xff] }
  0xe4   : > { %2302 = vmatpush.bf16.msrb.mxu2 %v8247_v29  ;;  %v8276_v29 = vld [vmem:[%s10232_s1 + $0x58] sm:$0xff] }
  0xe5   : > { %2381 = vmatpush.bf16.msrb.mxu3 %v8263_v30  ;;  %v700_v56 = vadd.f32 %v9287_v46, %v696_v51  ;;  %v8268_v30 = vld [vmem:[%s10232_s1 + $0x18] sm:$0xff]  ;;  %v8273_v51 = vld [vmem:[%s10232_s1 + $0x40] sm:$0xff] }
  0xe6   : > { %2140 = vmatpush.bf16.msrb.mxu0 %v8238_v31 }
  0xe7   : > { %2242 = vmatpush.bf16.msrb.mxu1 %v8254_v32  ;;  %v701_v57 = vmax.f32 %v700_v56, 0.0  ;;  %v8284_v32 = vld [vmem:[%s10232_s1 + $0x98] sm:$0xff] }
  0xe8   : > { %2303 = vmatpush.bf16.msrb.mxu2 %v8246_v33  ;;  %v8300_v33 = vld [vmem:[%s10232_s1 + $0x58] sm:$0xff] }
  0xe9   : > { %2382 = vmatpush.bf16.msrb.mxu3 %v8262_v34  ;;  %v702_v62 = vpack.c.bf16 %v701_v57, %v701_v57  ;;  %v8312_v56 = vld [vmem:[%s10232_s1 + $0xb8] sm:$0xff] }
  0xea   : > { %2141 = vmatpush.bf16.msrb.mxu0 %v8237_v37  ;;  %v694_v0 = vpop.f32.mrf.mxu2  ;;  %v8328_v57 = vld [vmem:[%s10232_s1 + $0x78] sm:$0xff] }
  0xeb   : > { %2243 = vmatpush.bf16.msrb.mxu1 %v8253_v38  ;;  %v799_v63 = vpop.f32.mrf.mxu3  ;;  %704 = vst.msk [vmem:[#allocation2] sm:$0xf] %vm703_vm0, %v702_v62  ;;  %v8311_v62 = vld [vmem:[%s10232_s1 + $0xb0] sm:$0xff]  ;;  %v6790_v0 = vld [vmem:[%s8833_s23 + $0x4c] sm:$0xf] }
  0xec   : > { %2304 = vmatpush.bf16.msrb.mxu2 %v8245_v39  ;;  %v8275_v39 = vld [vmem:[%s10232_s1 + $0x50] sm:$0xff] }
  0xed   : > { %2383 = vmatpush.bf16.msrb.mxu3 %v8261_v40  ;;  %v8267_v40 = vld [vmem:[%s10232_s1 + $0x10] sm:$0xff] }
  0xee   : > { %2142 = vmatpush.bf16.msrb.mxu0 %v8236_v42  ;;  %v8283_v42 = vld [vmem:[%s10232_s1 + $0x90] sm:$0xff] }
  0xef   : > { %2244 = vmatpush.bf16.msrb.mxu1 %v8252_v43  ;;  %v8299_v43 = vld [vmem:[%s10232_s1 + $0x50] sm:$0xff] }
  0xf0   : > { %2305 = vmatpush.bf16.msrb.mxu2 %v8244_v44  ;;  %v8274_v44 = vld [vmem:[%s10232_s1 + $0x48] sm:$0xff] }
  0xf1   : > { %2384 = vmatpush.bf16.msrb.mxu3 %v8260_v45  ;;  %v8266_v45 = vld [vmem:[%s10232_s1 + $0x8] sm:$0xff] }
  0xf2   : > { %2143 = vmatpush.bf16.msrb.mxu0 %v8235_v52  ;;  %v8265_v52 = vld [vmem:[%s10232_s1] sm:$0xff]  ;;  %v6740_v63 = vld [vmem:[%s8833_s23 + $0x48] sm:$0xf] }
  0xf3   : > { %2245 = vmatpush.bf16.msrb.mxu1 %v8251_v53  ;;  %v8281_v53 = vld [vmem:[%s10232_s1 + $0x80] sm:$0xff] }
  0xf4   : > { %2306 = vmatpush.bf16.msrb.mxu2 %v8243_v54  ;;  %v8297_v54 = vld [vmem:[%s10232_s1 + $0x40] sm:$0xff] }
  0xf5   : > { %2385 = vmatpush.bf16.msrb.mxu3 %v8259_v55  ;;  %v8296_v55 = vld [vmem:[%s10232_s1 + $0x38] sm:$0xff] }
  0xf6   : > { %2144 = vmatpush.bf16.msrb.mxu0 %v8234_v58  ;;  %v8320_v58 = vld [vmem:[%s10232_s1 + $0x38] sm:$0xff] }
  0xf7   : > { %2246 = vmatpush.bf16.msrb.mxu1 %v8250_v59  ;;  %v8295_v59 = vld [vmem:[%s10232_s1 + $0x30] sm:$0xff] }
  0xf8   : > { %2307 = vmatpush.bf16.msrb.mxu2 %v8242_v60  ;;  %v6659_v60 = vld [vmem:[%s8833_s23 + $0x44] sm:$0xf] }
  0xf9   : > { %2386 = vmatpush.bf16.msrb.mxu3 %v8258_v61  ;;  %v6658_v61 = vld [vmem:[%s8833_s23 + $0x40] sm:$0xf] }
  0xfa   : > { %2145 = vmatpush.bf16.msrb.mxu0 %v8233_v1  ;;  %v858_v21 = vpop.f32.mrf.mxu0  ;;  %v8327_v1 = vld [vmem:[%s10232_s1 + $0x70] sm:$0xff] }
  0xfb   : > { %2247 = vmatpush.bf16.msrb.mxu1 %v8249_v2  ;;  %v937_v22 = vpop.f32.mrf.mxu1  ;;  %v859_v25 = vadd.f32 %v858_v21, %v9289_v48  ;;  %v8298_v48 = vld [vmem:[%s10232_s1 + $0x48] sm:$0xff]  ;;  %v8319_v2 = vld [vmem:[%s10232_s1 + $0x30] sm:$0xff] }
  0xfc   : > { %2308 = vmatpush.bf16.msrb.mxu2 %v8241_v3  ;;  %v8294_v3 = vld [vmem:[%s10232_s1 + $0x28] sm:$0xff] }
  0xfd   : > { %2387 = vmatpush.bf16.msrb.mxu3 %v8257_v4  ;;  %2146 = vmatmul.bf16.vlgmr.msrb.gmra.mxu0 %v6478_v10  ;;  %v941_v28 = vadd.f32 %v937_v22, %v859_v25  ;;  %v8310_v4 = vld [vmem:[%s10232_s1 + $0xa8] sm:$0xff]  ;;  %v8293_v10 = vld [vmem:[%s10232_s1 + $0x20] sm:$0xff] }
  0xfe   : > { %2482 = vmatpush.bf16.msra.mxu0 %v8280_v5  ;;  %2248 = vmatmul.bf16.vlgmr.msrb.gmra.mxu1 %v6528_v11  ;;  %v8309_v11 = vld [vmem:[%s10232_s1 + $0xa0] sm:$0xff] }
  0xff   : > { %2543 = vmatpush.bf16.msra.mxu1 %v8272_v6  ;;  %2309 = vmatmul.bf16.vlgmr.msrb.gmra.mxu2 %v6527_v13  ;;  %v942_v31 = vadd.f32 %v9287_v46, %v941_v28  ;;  %v8326_v6 = vld [vmem:[%s10232_s1 + $0x68] sm:$0xff]  ;;  %v8325_v13 = vld [vmem:[%s10232_s1 + $0x60] sm:$0xff]  ;;  %v8307_v28 = vld [vmem:[%s10232_s1 + $0x90] sm:$0xff] }
 0x100   : > { %2622 = vmatpush.bf16.msra.mxu2 %v8288_v7  ;;  %2388 = vmatmul.bf16.vlgmr.msrb.gmra.mxu3 %v6609_v14  ;;  %v8318_v7 = vld [vmem:[%s10232_s1 + $0x28] sm:$0xff]  ;;  %v8317_v14 = vld [vmem:[%s10232_s1 + $0x20] sm:$0xff] }
 0x101   : > { %2724 = vmatpush.bf16.msra.mxu3 %v8304_v8  ;;  %v943_v34 = vmax.f32 %v942_v31, 0.0 }
 0x102   : > { %2483 = vmatpush.bf16.msra.mxu0 %v8279_v9  ;;  %v1039_v36 = vpop.f32.mrf.mxu2  ;;  %v860_v37 = vpop.f32.mrf.mxu0 }
 0x103   : > { %2544 = vmatpush.bf16.msra.mxu1 %v8271_v12  ;;  %v1100_v35 = vpop.f32.mrf.mxu3  ;;  %v939_v38 = vpop.f32.mrf.mxu1  ;;  %v944_v41 = vpack.c.bf16 %v943_v34, %v943_v34  ;;  %v8306_v34 = vld [vmem:[%s10232_s1 + $0x88] sm:$0xff] }
 0x104   : > { %2623 = vmatpush.bf16.msra.mxu2 %v8287_v15  ;;  %v1101_v5 = vadd.f32 %v1100_v35, %v1039_v36  ;;  %v8322_v35 = vld [vmem:[%s10232_s1 + $0x48] sm:$0xff] }
 0x105   : > { %2725 = vmatpush.bf16.msra.mxu3 %v8303_v16  ;;  %946 = vst.msk [vmem:[#allocation2 + $0x4] sm:$0xf] %vm703_vm0, %v944_v41  ;;  %v8292_v16 = vld [vmem:[%s10232_s1 + $0x18] sm:$0xff]  ;;  %v8314_v36 = vld [vmem:[%s10232_s1 + $0x8] sm:$0xff]  ;;  %v8289_v41 = vld [vmem:[%s10232_s1] sm:$0xff] }
 0x106   : > { %2484 = vmatpush.bf16.msra.mxu0 %v8278_v17  ;;  %v8308_v17 = vld [vmem:[%s10232_s1 + $0x98] sm:$0xff] }
 0x107   : > { %2545 = vmatpush.bf16.msra.mxu1 %v8270_v18 }
 0x108   : > { %2624 = vmatpush.bf16.msra.mxu2 %v8286_v19  ;;  %v8324_v19 = vld [vmem:[%s10232_s1 + $0x58] sm:$0xff] }
 0x109   : > { %2726 = vmatpush.bf16.msra.mxu3 %v8302_v20  ;;  %v8316_v20 = vld [vmem:[%s10232_s1 + $0x18] sm:$0xff] }
 0x10a   : > { %2485 = vmatpush.bf16.msra.mxu0 %v8277_v23  ;;  %v1041_v50 = vpop.f32.mrf.mxu2 }
 0x10b   : > { %2546 = vmatpush.bf16.msra.mxu1 %v8269_v24  ;;  %v1102_v49 = vpop.f32.mrf.mxu3  ;;  %v8335_v50 = vld [vmem:[%s10232_s1 + $0xb0] sm:$0xff] }
 0x10c   : > { %2625 = vmatpush.bf16.msra.mxu2 %v8285_v26  ;;  %v8360_v49 = vld [vmem:[%s10232_s1 + $0xb8] sm:$0xff] }
 0x10d   : > { %2727 = vmatpush.bf16.msra.mxu3 %v8301_v27  ;;  %v8291_v27 = vld [vmem:[%s10232_s1 + $0x10] sm:$0xff] }
 0x10e   : > { %2486 = vmatpush.bf16.msra.mxu0 %v8276_v29  ;;  %v8323_v29 = vld [vmem:[%s10232_s1 + $0x50] sm:$0xff] }
 0x10f   : > { %2547 = vmatpush.bf16.msra.mxu1 %v8268_v30  ;;  %v8315_v30 = vld [vmem:[%s10232_s1 + $0x10] sm:$0xff] }
 0x110   : > { %2626 = vmatpush.bf16.msra.mxu2 %v8284_v32 }
 0x111   : > { %2728 = vmatpush.bf16.msra.mxu3 %v8300_v33  ;;  %v8290_v33 = vld [vmem:[%s10232_s1 + $0x8] sm:$0xff] }
 0x112   : > { %2487 = vmatpush.bf16.msra.mxu0 %v8275_v39 }
 0x113   : > { %2548 = vmatpush.bf16.msra.mxu1 %v8267_v40 }
 0x114   : > { %2627 = vmatpush.bf16.msra.mxu2 %v8283_v42  ;;  %v8305_v42 = vld [vmem:[%s10232_s1 + $0x80] sm:$0xff] }
 0x115   : > { %2729 = vmatpush.bf16.msra.mxu3 %v8299_v43  ;;  %v8321_v43 = vld [vmem:[%s10232_s1 + $0x40] sm:$0xff] }
 0x116   : > { %2488 = vmatpush.bf16.msra.mxu0 %v8274_v44  ;;  %v8313_v44 = vld [vmem:[%s10232_s1] sm:$0xff] }
 0x117   : > { %2549 = vmatpush.bf16.msra.mxu1 %v8266_v45  ;;  %v8336_v45 = vld [vmem:[%s10232_s1 + $0xb8] sm:$0xff] }
 0x118   : > { %2628 = vmatpush.bf16.msra.mxu2 %v8282_v47  ;;  %v8352_v47 = vld [vmem:[%s10232_s1 + $0x78] sm:$0xff] }
 0x119   : > { %2730 = vmatpush.bf16.msra.mxu3 %v8298_v48  ;;  %v8344_v48 = vld [vmem:[%s10232_s1 + $0x38] sm:$0xff] }
 0x11a   : > { %2489 = vmatpush.bf16.msra.mxu0 %v8273_v51  ;;  %v1179_v8 = vpop.f32.mrf.mxu0  ;;  %v6789_v51 = vld [vmem:[%s8833_s23 + $0x48] sm:$0xf] }
 0x11b   : > { %2550 = vmatpush.bf16.msra.mxu1 %v8265_v52  ;;  %v1281_v9 = vpop.f32.mrf.mxu1  ;;  %v1183_v12 = vadd.f32 %v1179_v8, %v1101_v5  ;;  %v6871_v52 = vld [vmem:[%s8833_s23 + $0x50] sm:$0xf] }
 0x11c   : > { %2629 = vmatpush.bf16.msra.mxu2 %v8281_v53  ;;  %v8351_v53 = vld [vmem:[%s10232_s1 + $0x70] sm:$0xff]  ;;  %v8332_v5 = vld [vmem:[%s10232_s1 + $0x98] sm:$0xff] }
 0x11d   : > { %2731 = vmatpush.bf16.msra.mxu3 %v8297_v54  ;;  %2490 = vmatmul.bf16.vlgmr.msra.gmra.mxu0 %v6659_v60  ;;  %v1184_v15 = vadd.f32 %v9287_v46, %v1183_v12  ;;  %v6920_v54 = vld [vmem:[%s8833_s23 + $0x50] sm:$0xf]  ;;  %v8342_v60 = vld [vmem:[%s10232_s1 + $0x28] sm:$0xff] }
 0x11e   : > { %2785 = vmatpush.bf16.msrb.mxu0 %v8296_v55  ;;  %2551 = vmatmul.bf16.vlgmr.msra.gmra.mxu1 %v6658_v61  ;;  %v6921_v55 = vld [vmem:[%s8833_s23 + $0x54] sm:$0xf]  ;;  %v8358_v61 = vld [vmem:[%s10232_s1 + $0xa8] sm:$0xff]  ;;  %v8356_v8 = vld [vmem:[%s10232_s1 + $0x98] sm:$0xff] }
 0x11f   : > { %2864 = vmatpush.bf16.msrb.mxu1 %v8312_v56  ;;  %2630 = vmatmul.bf16.vlgmr.msra.gmra.mxu2 %v6740_v63  ;;  %v1185_v18 = vmax.f32 %v1184_v15, 0.0  ;;  %v8343_v56 = vld [vmem:[%s10232_s1 + $0x30] sm:$0xff] }
 0x120   : > { %2966 = vmatpush.bf16.msrb.mxu2 %v8328_v57  ;;  %2732 = vmatmul.bf16.vlgmr.msra.gmra.mxu3 %v6790_v0  ;;  %v8359_v57 = vld [vmem:[%s10232_s1 + $0xb0] sm:$0xff]  ;;  %v8333_v0 = vld [vmem:[%s10232_s1 + $0xa0] sm:$0xff] }
 0x121   : > { %3027 = vmatpush.bf16.msrb.mxu3 %v8320_v58  ;;  %v1186_v21 = vpack.c.bf16 %v1185_v18, %v1185_v18  ;;  %v8334_v58 = vld [vmem:[%s10232_s1 + $0xa8] sm:$0xff]  ;;  %v8347_v15 = vld [vmem:[%s10232_s1 + $0x50] sm:$0xff] }
 0x122   : > { %2786 = vmatpush.bf16.msrb.mxu0 %v8295_v59  ;;  %v1342_v22 = vpop.f32.mrf.mxu2  ;;  %v1181_v24 = vpop.f32.mrf.mxu0  ;;  %v8350_v59 = vld [vmem:[%s10232_s1 + $0x68] sm:$0xff] }
 0x123   : > { %2865 = vmatpush.bf16.msrb.mxu1 %v8311_v62  ;;  %v1421_v23 = vpop.f32.mrf.mxu3  ;;  %v1283_v25 = vpop.f32.mrf.mxu1  ;;  %v1343_v26 = vadd.f32 %v1342_v22, %v1281_v9  ;;  %1188 = vst.msk [vmem:[#allocation2 + $0x8] sm:$0xf] %vm703_vm0, %v1186_v21  ;;  %v8346_v21 = vld [vmem:[%s10232_s1 + $0x48] sm:$0xff] }
 0x124   : > { %2967 = vmatpush.bf16.msrb.mxu2 %v8327_v1  ;;  %v8349_v1 = vld [vmem:[%s10232_s1 + $0x60] sm:$0xff]  ;;  %v8338_v22 = vld [vmem:[%s10232_s1 + $0x8] sm:$0xff] }
 0x125   : > { %3028 = vmatpush.bf16.msrb.mxu3 %v8319_v2  ;;  %v1425_v31 = vadd.f32 %v1421_v23, %v1343_v26  ;;  %v8341_v2 = vld [vmem:[%s10232_s1 + $0x20] sm:$0xff]  ;;  %v8354_v23 = vld [vmem:[%s10232_s1 + $0x88] sm:$0xff] }
 0x126   : > { %2787 = vmatpush.bf16.msrb.mxu0 %v8294_v3  ;;  %v8357_v3 = vld [vmem:[%s10232_s1 + $0xa0] sm:$0xff] }
 0x127   : > { %2866 = vmatpush.bf16.msrb.mxu1 %v8310_v4  ;;  %v1426_v32 = vadd.f32 %v9287_v46, %v1425_v31  ;;  %v8376_v31 = vld [vmem:[%s10232_s1 + $0x78] sm:$0xff] }
 0x128   : > { %2968 = vmatpush.bf16.msrb.mxu2 %v8326_v6  ;;  %v8348_v6 = vld [vmem:[%s10232_s1 + $0x58] sm:$0xff] }
 0x129   : > { %3029 = vmatpush.bf16.msrb.mxu3 %v8318_v7  ;;  %v1427_v37 = vmax.f32 %v1426_v32, 0.0  ;;  %v8340_v7 = vld [vmem:[%s10232_s1 + $0x18] sm:$0xff] }
 0x12a   : > { %2788 = vmatpush.bf16.msrb.mxu0 %v8293_v10  ;;  %v1344_v39 = vpop.f32.mrf.mxu2  ;;  %v8368_v32 = vld [vmem:[%s10232_s1 + $0x38] sm:$0xff] }
 0x12b   : > { %2867 = vmatpush.bf16.msrb.mxu1 %v8309_v11  ;;  %v1423_v38 = vpop.f32.mrf.mxu3  ;;  %v1428_v40 = vpack.c.bf16 %v1427_v37, %v1427_v37  ;;  %v7052_v37 = vld [vmem:[%s8833_s23 + $0x5c] sm:$0xf]  ;;  %v7051_v39 = vld [vmem:[%s8833_s23 + $0x58] sm:$0xf] }
 0x12c   : > { %2969 = vmatpush.bf16.msrb.mxu2 %v8325_v13  ;;  %v8367_v38 = vld [vmem:[%s10232_s1 + $0x30] sm:$0xff] }
 0x12d   : > { %3030 = vmatpush.bf16.msrb.mxu3 %v8317_v14  ;;  %1430 = vst.msk [vmem:[#allocation2 + $0xc] sm:$0xf] %vm703_vm0, %v1428_v40  ;;  %v8331_v14 = vld [vmem:[%s10232_s1 + $0x90] sm:$0xff]  ;;  %v7133_v40 = vld [vmem:[%s8833_s23 + $0x60] sm:$0xf] }
 0x12e   : > { %2789 = vmatpush.bf16.msrb.mxu0 %v8292_v16  ;;  %v8339_v16 = vld [vmem:[%s10232_s1 + $0x10] sm:$0xff] }
 0x12f   : > { %2868 = vmatpush.bf16.msrb.mxu1 %v8308_v17  ;;  %v8355_v17 = vld [vmem:[%s10232_s1 + $0x90] sm:$0xff] }
 0x130   : > { %2970 = vmatpush.bf16.msrb.mxu2 %v8324_v19 }
 0x131   : > { %3031 = vmatpush.bf16.msrb.mxu3 %v8316_v20  ;;  %v8330_v20 = vld [vmem:[%s10232_s1 + $0x88] sm:$0xff] }
 0x132   : > { %2790 = vmatpush.bf16.msrb.mxu0 %v8291_v27  ;;  %v8329_v27 = vld [vmem:[%s10232_s1 + $0x80] sm:$0xff] }
 0x133   : > { %2869 = vmatpush.bf16.msrb.mxu1 %v8307_v28  ;;  %v8345_v28 = vld [vmem:[%s10232_s1 + $0x40] sm:$0xff] }
 0x134   : > { %2971 = vmatpush.bf16.msrb.mxu2 %v8323_v29  ;;  %v8337_v29 = vld [vmem:[%s10232_s1] sm:$0xff] }
 0x135   : > { %3032 = vmatpush.bf16.msrb.mxu3 %v8315_v30  ;;  %v8353_v30 = vld [vmem:[%s10232_s1 + $0x80] sm:$0xff] }
 0x136   : > { %2791 = vmatpush.bf16.msrb.mxu0 %v8290_v33  ;;  %v8384_v33 = vld [vmem:[%s10232_s1 + $0xb8] sm:$0xff] }
 0x137   : > { %2870 = vmatpush.bf16.msrb.mxu1 %v8306_v34  ;;  %v8400_v34 = vld [vmem:[%s10232_s1 + $0x78] sm:$0xff] }
 0x138   : > { %2972 = vmatpush.bf16.msrb.mxu2 %v8322_v35  ;;  %v8375_v35 = vld [vmem:[%s10232_s1 + $0x70] sm:$0xff] }
 0x139   : > { %3033 = vmatpush.bf16.msrb.mxu3 %v8314_v36  ;;  %v7002_v36 = vld [vmem:[%s8833_s23 + $0x58] sm:$0xf] }
 0x13a   : > { %2792 = vmatpush.bf16.msrb.mxu0 %v8289_v41  ;;  %v1523_v62 = vpop.f32.mrf.mxu0  ;;  %v8383_v41 = vld [vmem:[%s10232_s1 + $0xb0] sm:$0xff] }
 0x13b   : > { %2871 = vmatpush.bf16.msrb.mxu1 %v8305_v42  ;;  %v1584_v63 = vpop.f32.mrf.mxu1  ;;  %v8399_v42 = vld [vmem:[%s10232_s1 + $0x70] sm:$0xff] }
 0x13c   : > { %2973 = vmatpush.bf16.msrb.mxu2 %v8321_v43  ;;  %v1585_v4 = vadd.f32 %v1584_v63, %v1523_v62  ;;  %v8374_v43 = vld [vmem:[%s10232_s1 + $0x68] sm:$0xff] }
 0x13d   : > { %3034 = vmatpush.bf16.msrb.mxu3 %v8313_v44  ;;  %2793 = vmatmul.bf16.vlgmr.msrb.gmra.mxu0 %v6789_v51  ;;  %v8366_v44 = vld [vmem:[%s10232_s1 + $0x28] sm:$0xff]  ;;  %v8365_v51 = vld [vmem:[%s10232_s1 + $0x20] sm:$0xff] }
 0x13e   : > { %3106 = vmatpush.bf16.msra.mxu0 %v8336_v45  ;;  %2872 = vmatmul.bf16.vlgmr.msrb.gmra.mxu1 %v6871_v52  ;;  %v8382_v45 = vld [vmem:[%s10232_s1 + $0xa8] sm:$0xff] }
 0x13f   : > { %3208 = vmatpush.bf16.msra.mxu1 %v8352_v47  ;;  %2974 = vmatmul.bf16.vlgmr.msrb.gmra.mxu2 %v6921_v55  ;;  %v8398_v47 = vld [vmem:[%s10232_s1 + $0x68] sm:$0xff] }
 0x140   : > { %3269 = vmatpush.bf16.msra.mxu2 %v8344_v48  ;;  %3035 = vmatmul.bf16.vlgmr.msrb.gmra.mxu3 %v6920_v54  ;;  %v8397_v54 = vld [vmem:[%s10232_s1 + $0x60] sm:$0xff] }
 0x141   : > { %3348 = vmatpush.bf16.msra.mxu3 %v8360_v49 }
 0x142   : > { %3107 = vmatpush.bf16.msra.mxu0 %v8335_v50  ;;  %v1663_v9 = vpop.f32.mrf.mxu2  ;;  %v1525_v11 = vpop.f32.mrf.mxu0  ;;  %v8373_v50 = vld [vmem:[%s10232_s1 + $0x60] sm:$0xff] }
 0x143   : > { %3209 = vmatpush.bf16.msra.mxu1 %v8351_v53  ;;  %v9600_v10 = vpop.f32.mrf.mxu3  ;;  %v1586_v12 = vpop.f32.mrf.mxu1  ;;  %v1667_v13 = vadd.f32 %v1663_v9, %v1585_v4  ;;  %v8381_v53 = vld [vmem:[%s10232_s1 + $0xa0] sm:$0xff]  ;;  %v8378_v9 = vld [vmem:[%s10232_s1 + $0x88] sm:$0xff] }
 0x144   : > { %3270 = vmatpush.bf16.msra.mxu2 %v8343_v56  ;;  %v8372_v56 = vld [vmem:[%s10232_s1 + $0x58] sm:$0xff] }
 0x145   : > { %3349 = vmatpush.bf16.msra.mxu3 %v8359_v57  ;;  %v1668_v18 = vadd.f32 %v9287_v46, %v1667_v13  ;;  %v8364_v57 = vld [vmem:[%s10232_s1 + $0x18] sm:$0xff]  ;;  %v8369_v13 = vld [vmem:[%s10232_s1 + $0x40] sm:$0xff] }
 0x146   : > { %3108 = vmatpush.bf16.msra.mxu0 %v8334_v58 }
 0x147   : > { %3210 = vmatpush.bf16.msra.mxu1 %v8350_v59  ;;  %v1669_v19 = vmax.f32 %v1668_v18, 0.0  ;;  %v8380_v59 = vld [vmem:[%s10232_s1 + $0x98] sm:$0xff] }
 0x148   : > { %3271 = vmatpush.bf16.msra.mxu2 %v8342_v60  ;;  %v8396_v60 = vld [vmem:[%s10232_s1 + $0x58] sm:$0xff] }
 0x149   : > { %3350 = vmatpush.bf16.msra.mxu3 %v8358_v61  ;;  %v1670_v24 = vpack.c.bf16 %v1669_v19, %v1669_v19  ;;  %v8408_v18 = vld [vmem:[%s10232_s1 + $0xb8] sm:$0xff] }
 0x14a   : > { %3109 = vmatpush.bf16.msra.mxu0 %v8333_v0  ;;  %v1665_v26 = vpop.f32.mrf.mxu2  ;;  %v8424_v19 = vld [vmem:[%s10232_s1 + $0x78] sm:$0xff] }
 0x14b   : > { %3211 = vmatpush.bf16.msra.mxu1 %v8349_v1  ;;  %v1767_v25 = vpop.f32.mrf.mxu3  ;;  %1672 = vst.msk [vmem:[#allocation2 + $0x10] sm:$0xf] %vm703_vm0, %v1670_v24  ;;  %v8407_v24 = vld [vmem:[%s10232_s1 + $0xb0] sm:$0xff]  ;;  %v7314_v26 = vld [vmem:[%s8833_s23 + $0x6c] sm:$0xf] }
 0x14c   : > { %3272 = vmatpush.bf16.msra.mxu2 %v8341_v2  ;;  %v8371_v2 = vld [vmem:[%s10232_s1 + $0x50] sm:$0xff] }
 0x14d   : > { %3351 = vmatpush.bf16.msra.mxu3 %v8357_v3  ;;  %v8363_v3 = vld [vmem:[%s10232_s1 + $0x10] sm:$0xff] }
 0x14e   : > { %3110 = vmatpush.bf16.msra.mxu0 %v8332_v5  ;;  %v8379_v5 = vld [vmem:[%s10232_s1 + $0x90] sm:$0xff] }
 0x14f   : > { %3212 = vmatpush.bf16.msra.mxu1 %v8348_v6  ;;  %v8395_v6 = vld [vmem:[%s10232_s1 + $0x50] sm:$0xff] }
 0x150   : > { %3273 = vmatpush.bf16.msra.mxu2 %v8340_v7  ;;  %v8370_v7 = vld [vmem:[%s10232_s1 + $0x48] sm:$0xff] }
 0x151   : > { %3352 = vmatpush.bf16.msra.mxu3 %v8356_v8  ;;  %v8362_v8 = vld [vmem:[%s10232_s1 + $0x8] sm:$0xff] }
 0x152   : > { %3111 = vmatpush.bf16.msra.mxu0 %v8331_v14  ;;  %v8361_v14 = vld [vmem:[%s10232_s1] sm:$0xff]  ;;  %v7264_v25 = vld [vmem:[%s8833_s23 + $0x68] sm:$0xf] }
 0x153   : > { %3213 = vmatpush.bf16.msra.mxu1 %v8347_v15  ;;  %v8377_v15 = vld [vmem:[%s10232_s1 + $0x80] sm:$0xff] }
 0x154   : > { %3274 = vmatpush.bf16.msra.mxu2 %v8339_v16  ;;  %v8393_v16 = vld [vmem:[%s10232_s1 + $0x40] sm:$0xff] }
 0x155   : > { %3353 = vmatpush.bf16.msra.mxu3 %v8355_v17  ;;  %v8392_v17 = vld [vmem:[%s10232_s1 + $0x38] sm:$0xff] }
 0x156   : > { %3112 = vmatpush.bf16.msra.mxu0 %v8330_v20  ;;  %v8416_v20 = vld [vmem:[%s10232_s1 + $0x38] sm:$0xff] }
 0x157   : > { %3214 = vmatpush.bf16.msra.mxu1 %v8346_v21  ;;  %v8391_v21 = vld [vmem:[%s10232_s1 + $0x30] sm:$0xff] }
 0x158   : > { %3275 = vmatpush.bf16.msra.mxu2 %v8338_v22  ;;  %v7183_v22 = vld [vmem:[%s8833_s23 + $0x64] sm:$0xf] }
 0x159   : > { %3354 = vmatpush.bf16.msra.mxu3 %v8354_v23  ;;  %v7182_v23 = vld [vmem:[%s8833_s23 + $0x60] sm:$0xf] }
 0x15a   : > { %3113 = vmatpush.bf16.msra.mxu0 %v8329_v27  ;;  %v1826_v48 = vpop.f32.mrf.mxu0  ;;  %v8423_v27 = vld [vmem:[%s10232_s1 + $0x70] sm:$0xff] }
 0x15b   : > { %3215 = vmatpush.bf16.msra.mxu1 %v8345_v28  ;;  %v1905_v49 = vpop.f32.mrf.mxu1  ;;  %v1827_v52 = vadd.f32 %v1826_v48, %v9600_v10  ;;  %v8394_v10 = vld [vmem:[%s10232_s1 + $0x48] sm:$0xff]  ;;  %v8415_v28 = vld [vmem:[%s10232_s1 + $0x30] sm:$0xff] }
 0x15c   : > { %3276 = vmatpush.bf16.msra.mxu2 %v8337_v29  ;;  %v8390_v29 = vld [vmem:[%s10232_s1 + $0x28] sm:$0xff] }
 0x15d   : > { %3355 = vmatpush.bf16.msra.mxu3 %v8353_v30  ;;  %3114 = vmatmul.bf16.vlgmr.msra.gmra.mxu0 %v7002_v36  ;;  %v1909_v55 = vadd.f32 %v1905_v49, %v1827_v52  ;;  %v8406_v30 = vld [vmem:[%s10232_s1 + $0xa8] sm:$0xff]  ;;  %v8389_v36 = vld [vmem:[%s10232_s1 + $0x20] sm:$0xff] }
 0x15e   : > { %3450 = vmatpush.bf16.msrb.mxu0 %v8376_v31  ;;  %3216 = vmatmul.bf16.vlgmr.msra.gmra.mxu1 %v7052_v37  ;;  %v8405_v37 = vld [vmem:[%s10232_s1 + $0xa0] sm:$0xff] }
 0x15f   : > { %3511 = vmatpush.bf16.msrb.mxu1 %v8368_v32  ;;  %3277 = vmatmul.bf16.vlgmr.msra.gmra.mxu2 %v7051_v39  ;;  %v1910_v58 = vadd.f32 %v9287_v46, %v1909_v55  ;;  %v8422_v32 = vld [vmem:[%s10232_s1 + $0x68] sm:$0xff]  ;;  %v8421_v39 = vld [vmem:[%s10232_s1 + $0x60] sm:$0xff]  ;;  %v8403_v55 = vld [vmem:[%s10232_s1 + $0x90] sm:$0xff] }
 0x160   : > { %3590 = vmatpush.bf16.msrb.mxu2 %v8384_v33  ;;  %3356 = vmatmul.bf16.vlgmr.msra.gmra.mxu3 %v7133_v40  ;;  %v8414_v33 = vld [vmem:[%s10232_s1 + $0x28] sm:$0xff]  ;;  %v8413_v40 = vld [vmem:[%s10232_s1 + $0x20] sm:$0xff] }
 0x161   : > { %3692 = vmatpush.bf16.msrb.mxu3 %v8400_v34  ;;  %v1911_v61 = vmax.f32 %v1910_v58, 0.0 }
 0x162   : > { %3451 = vmatpush.bf16.msrb.mxu0 %v8375_v35  ;;  %v2007_v63 = vpop.f32.mrf.mxu2  ;;  %v1828_v0 = vpop.f32.mrf.mxu0 }
 0x163   : > { %3512 = vmatpush.bf16.msrb.mxu1 %v8367_v38  ;;  %v2068_v62 = vpop.f32.mrf.mxu3  ;;  %v1907_v1 = vpop.f32.mrf.mxu1  ;;  %v1912_v4 = vpack.c.bf16 %v1911_v61, %v1911_v61  ;;  %v8402_v61 = vld [vmem:[%s10232_s1 + $0x88] sm:$0xff] }
 0x164   : > { %3591 = vmatpush.bf16.msrb.mxu2 %v8383_v41  ;;  %v2069_v31 = vadd.f32 %v2068_v62, %v2007_v63  ;;  %v8418_v62 = vld [vmem:[%s10232_s1 + $0x48] sm:$0xff] }
 0x165   : > { %3693 = vmatpush.bf16.msrb.mxu3 %v8399_v42  ;;  %1914 = vst.msk [vmem:[#allocation2 + $0x14] sm:$0xf] %vm703_vm0, %v1912_v4  ;;  %v8388_v42 = vld [vmem:[%s10232_s1 + $0x18] sm:$0xff]  ;;  %v8401_v4 = vld [vmem:[%s10232_s1 + $0x80] sm:$0xff] }
 0x166   : > { %3452 = vmatpush.bf16.msrb.mxu0 %v8374_v43  ;;  %v8404_v43 = vld [vmem:[%s10232_s1 + $0x98] sm:$0xff] }
 0x167   : > { %3513 = vmatpush.bf16.msrb.mxu1 %v8366_v44 }
 0x168   : > { %3592 = vmatpush.bf16.msrb.mxu2 %v8382_v45  ;;  %v8420_v45 = vld [vmem:[%s10232_s1 + $0x58] sm:$0xff] }
 0x169   : > { %3694 = vmatpush.bf16.msrb.mxu3 %v8398_v47  ;;  %v8412_v47 = vld [vmem:[%s10232_s1 + $0x18] sm:$0xff] }
 0x16a   : > { %3453 = vmatpush.bf16.msrb.mxu0 %v8373_v50  ;;  %v2009_v12 = vpop.f32.mrf.mxu2 }
 0x16b   : > { %3514 = vmatpush.bf16.msrb.mxu1 %v8365_v51  ;;  %v2070_v11 = vpop.f32.mrf.mxu3  ;;  %v7313_v12 = vld [vmem:[%s8833_s23 + $0x68] sm:$0xf] }
 0x16c   : > { %3593 = vmatpush.bf16.msrb.mxu2 %v8381_v53  ;;  %v8431_v11 = vld [vmem:[%s10232_s1 + $0xb0] sm:$0xff] }
 0x16d   : > { %3695 = vmatpush.bf16.msrb.mxu3 %v8397_v54  ;;  %v8387_v54 = vld [vmem:[%s10232_s1 + $0x10] sm:$0xff] }
 0x16e   : > { %3454 = vmatpush.bf16.msrb.mxu0 %v8372_v56  ;;  %v8419_v56 = vld [vmem:[%s10232_s1 + $0x50] sm:$0xff] }
 0x16f   : > { %3515 = vmatpush.bf16.msrb.mxu1 %v8364_v57  ;;  %v8411_v57 = vld [vmem:[%s10232_s1 + $0x10] sm:$0xff] }
 0x170   : > { %3594 = vmatpush.bf16.msrb.mxu2 %v8380_v59 }
 0x171   : > { %3696 = vmatpush.bf16.msrb.mxu3 %v8396_v60  ;;  %v8386_v60 = vld [vmem:[%s10232_s1 + $0x8] sm:$0xff] }
 0x172   : > { %3455 = vmatpush.bf16.msrb.mxu0 %v8371_v2 }
 0x173   : > { %3516 = vmatpush.bf16.msrb.mxu1 %v8363_v3  ;;  %v8385_v3 = vld [vmem:[%s10232_s1] sm:$0xff] }
 0x174   : > { %3595 = vmatpush.bf16.msrb.mxu2 %v8379_v5  ;;  %v8417_v5 = vld [vmem:[%s10232_s1 + $0x40] sm:$0xff] }
 0x175   : > { %3697 = vmatpush.bf16.msrb.mxu3 %v8395_v6  ;;  %v8409_v6 = vld [vmem:[%s10232_s1] sm:$0xff] }
 0x176   : > { %3456 = vmatpush.bf16.msrb.mxu0 %v8370_v7  ;;  %v8432_v7 = vld [vmem:[%s10232_s1 + $0xb8] sm:$0xff] }
 0x177   : > { %3517 = vmatpush.bf16.msrb.mxu1 %v8362_v8  ;;  %v8448_v8 = vld [vmem:[%s10232_s1 + $0x78] sm:$0xff] }
 0x178   : > { %3596 = vmatpush.bf16.msrb.mxu2 %v8378_v9  ;;  %v8440_v9 = vld [vmem:[%s10232_s1 + $0x38] sm:$0xff] }
 0x179   : > { %3698 = vmatpush.bf16.msrb.mxu3 %v8394_v10  ;;  %v8456_v10 = vld [vmem:[%s10232_s1 + $0xb8] sm:$0xff] }
 0x17a   : > { %3457 = vmatpush.bf16.msrb.mxu0 %v8369_v13  ;;  %v2147_v34 = vpop.f32.mrf.mxu0  ;;  %v7395_v13 = vld [vmem:[%s8833_s23 + $0x70] sm:$0xf] }
 0x17b   : > { %3518 = vmatpush.bf16.msrb.mxu1 %v8361_v14  ;;  %v2249_v35 = vpop.f32.mrf.mxu1  ;;  %v2151_v38 = vadd.f32 %v2147_v34, %v2069_v31  ;;  %v8447_v14 = vld [vmem:[%s10232_s1 + $0x70] sm:$0xff]  ;;  %v8444_v31 = vld [vmem:[%s10232_s1 + $0x58] sm:$0xff] }
 0x17c   : > { %3597 = vmatpush.bf16.msrb.mxu2 %v8377_v15  ;;  %v7444_v15 = vld [vmem:[%s8833_s23 + $0x70] sm:$0xf] }
 0x17d   : > { %3699 = vmatpush.bf16.msrb.mxu3 %v8393_v16  ;;  %3458 = vmatmul.bf16.vlgmr.msrb.gmra.mxu0 %v7183_v22  ;;  %v2152_v41 = vadd.f32 %v9287_v46, %v2151_v38  ;;  %v7445_v16 = vld [vmem:[%s8833_s23 + $0x74] sm:$0xf]  ;;  %v8454_v22 = vld [vmem:[%s10232_s1 + $0xa8] sm:$0xff] }
 0x17e   : > { %3753 = vmatpush.bf16.msra.mxu0 %v8392_v17  ;;  %3519 = vmatmul.bf16.vlgmr.msrb.gmra.mxu1 %v7182_v23  ;;  %v8439_v17 = vld [vmem:[%s10232_s1 + $0x30] sm:$0xff] }
 0x17f   : > { %3832 = vmatpush.bf16.msra.mxu1 %v8408_v18  ;;  %3598 = vmatmul.bf16.vlgmr.msrb.gmra.mxu2 %v7264_v25  ;;  %v2153_v44 = vmax.f32 %v2152_v41, 0.0  ;;  %v8455_v18 = vld [vmem:[%s10232_s1 + $0xb0] sm:$0xff]  ;;  %v8429_v25 = vld [vmem:[%s10232_s1 + $0xa0] sm:$0xff] }
 0x180   : > { %3934 = vmatpush.bf16.msra.mxu2 %v8424_v19  ;;  %3700 = vmatmul.bf16.vlgmr.msrb.gmra.mxu3 %v7314_v26  ;;  %v8430_v19 = vld [vmem:[%s10232_s1 + $0xa8] sm:$0xff]  ;;  %v8445_v26 = vld [vmem:[%s10232_s1 + $0x60] sm:$0xff]  ;;  %v8435_v41 = vld [vmem:[%s10232_s1 + $0x10] sm:$0xff] }
 0x181   : > { %3995 = vmatpush.bf16.msra.mxu3 %v8416_v20  ;;  %v2154_v48 = vpack.c.bf16 %v2153_v44, %v2153_v44  ;;  %v8446_v20 = vld [vmem:[%s10232_s1 + $0x68] sm:$0xff] }
 0x182   : > { %3754 = vmatpush.bf16.msra.mxu0 %v8391_v21  ;;  %v2310_v49 = vpop.f32.mrf.mxu2  ;;  %v2149_v51 = vpop.f32.mrf.mxu0  ;;  %v8438_v21 = vld [vmem:[%s10232_s1 + $0x28] sm:$0xff] }
 0x183   : > { %3833 = vmatpush.bf16.msra.mxu1 %v8407_v24  ;;  %v2389_v50 = vpop.f32.mrf.mxu3  ;;  %v2251_v52 = vpop.f32.mrf.mxu1  ;;  %v2311_v53 = vadd.f32 %v2310_v49, %v2249_v35  ;;  %2156 = vst.msk [vmem:[#allocation2 + $0x18] sm:$0xf] %vm703_vm0, %v2154_v48  ;;  %v8442_v48 = vld [vmem:[%s10232_s1 + $0x48] sm:$0xff] }
 0x184   : > { %3935 = vmatpush.bf16.msra.mxu2 %v8423_v27  ;;  %v8437_v27 = vld [vmem:[%s10232_s1 + $0x20] sm:$0xff]  ;;  %v8434_v49 = vld [vmem:[%s10232_s1 + $0x8] sm:$0xff] }
 0x185   : > { %3996 = vmatpush.bf16.msra.mxu3 %v8415_v28  ;;  %v2393_v58 = vadd.f32 %v2389_v50, %v2311_v53  ;;  %v8453_v28 = vld [vmem:[%s10232_s1 + $0xa0] sm:$0xff]  ;;  %v8450_v50 = vld [vmem:[%s10232_s1 + $0x88] sm:$0xff] }
 0x186   : > { %3755 = vmatpush.bf16.msra.mxu0 %v8390_v29 }
 0x187   : > { %3834 = vmatpush.bf16.msra.mxu1 %v8406_v30  ;;  %v2394_v59 = vadd.f32 %v9287_v46, %v2393_v58  ;;  %v8410_v46 = vld [vmem:[%s10232_s1 + $0x8] sm:$0xff]  ;;  %v8428_v30 = vld [vmem:[%s10232_s1 + $0x98] sm:$0xff] }
 0x188   : > { %3936 = vmatpush.bf16.msra.mxu2 %v8422_v32  ;;  %v8436_v32 = vld [vmem:[%s10232_s1 + $0x18] sm:$0xff] }
 0x189   : > { %3997 = vmatpush.bf16.msra.mxu3 %v8414_v33  ;;  %v2395_v63 = vmax.f32 %v2394_v59, 0.0  ;;  %v8452_v33 = vld [vmem:[%s10232_s1 + $0x98] sm:$0xff] }
 0x18a   : > { %3756 = vmatpush.bf16.msra.mxu0 %v8389_v36  ;;  %v2312_v1 = vpop.f32.mrf.mxu2  ;;  %v8472_v58 = vld [vmem:[%s10232_s1 + $0x78] sm:$0xff] }
 0x18b   : > { %3835 = vmatpush.bf16.msra.mxu1 %v8405_v37  ;;  %v2391_v0 = vpop.f32.mrf.mxu3  ;;  %v2396_v2 = vpack.c.bf16 %v2395_v63, %v2395_v63  ;;  %v8464_v59 = vld [vmem:[%s10232_s1 + $0x38] sm:$0xff]  ;;  %v8482_v63 = vld [vmem:[%s10233_s2 + $0x8] sm:$0xff]  ;;  %v8463_v1 = vld [vmem:[%s10232_s1 + $0x30] sm:$0xff] }
 0x18c   : > { %3937 = vmatpush.bf16.msra.mxu2 %v8421_v39  ;;  %v8427_v39 = vld [vmem:[%s10232_s1 + $0x90] sm:$0xff] }
 0x18d   : > { %3998 = vmatpush.bf16.msra.mxu3 %v8413_v40  ;;  %2398 = vst.msk [vmem:[#allocation2 + $0x1c] sm:$0xf] %vm703_vm0, %v2396_v2  ;;  %v8443_v40 = vld [vmem:[%s10232_s1 + $0x50] sm:$0xff]  ;;  %v7576_v2 = vld [vmem:[%s8833_s23 + $0x7c] sm:$0xf] }
 0x18e   : > { %3757 = vmatpush.bf16.msra.mxu0 %v8388_v42  ;;  %v8451_v42 = vld [vmem:[%s10232_s1 + $0x90] sm:$0xff] }
 0x18f   : > { %3836 = vmatpush.bf16.msra.mxu1 %v8404_v43  ;;  %v9928_v43 = vld [vmem:[%s10235_s4] ss:$0 sm:$0xff]  ;;  %v8471_v0 = vld [vmem:[%s10232_s1 + $0x70] sm:$0xff] }
 0x190   : > { %3938 = vmatpush.bf16.msra.mxu2 %v8420_v45 }
 0x191   : > { %3999 = vmatpush.bf16.msra.mxu3 %v8412_v47  ;;  %v8426_v47 = vld [vmem:[%s10232_s1 + $0x88] sm:$0xff] }
 0x192   : > { %3758 = vmatpush.bf16.msra.mxu0 %v8387_v54  ;;  %v8425_v54 = vld [vmem:[%s10232_s1 + $0x80] sm:$0xff] }
 0x193   : > { %3837 = vmatpush.bf16.msra.mxu1 %v8403_v55  ;;  %v8441_v55 = vld [vmem:[%s10232_s1 + $0x40] sm:$0xff] }
 0x194   : > { %3939 = vmatpush.bf16.msra.mxu2 %v8419_v56  ;;  %v8433_v56 = vld [vmem:[%s10232_s1] sm:$0xff] }
 0x195   : > { %4000 = vmatpush.bf16.msra.mxu3 %v8411_v57  ;;  %v8449_v57 = vld [vmem:[%s10232_s1 + $0x80] sm:$0xff] }
 0x196   : > { %3759 = vmatpush.bf16.msra.mxu0 %v8386_v60  ;;  %v8480_v60 = vld [vmem:[%s10232_s1 + $0xb8] sm:$0xff] }
 0x197   : > { %3838 = vmatpush.bf16.msra.mxu1 %v8402_v61  ;;  %v7526_v61 = vld [vmem:[%s8833_s23 + $0x78] sm:$0xf] }
 0x198   : > { %3940 = vmatpush.bf16.msra.mxu2 %v8418_v62  ;;  %v7575_v62 = vld [vmem:[%s8833_s23 + $0x78] sm:$0xf] }
 0x199   : > { %4001 = vmatpush.bf16.msra.mxu3 %v8410_v46  ;;  %v7657_v46 = vld [vmem:[%s8833_s23 + $0x80] sm:$0xf] }
 0x19a   : > { %3760 = vmatpush.bf16.msra.mxu0 %v8385_v3  ;;  %v2491_v23 = vpop.f32.mrf.mxu0  ;;  %v8479_v3 = vld [vmem:[%s10232_s1 + $0xb0] sm:$0xff] }
 0x19b   : > { %3839 = vmatpush.bf16.msra.mxu1 %v8401_v4  ;;  %v2552_v24 = vpop.f32.mrf.mxu1  ;;  %v8481_v4 = vld [vmem:[%s10233_s2] sm:$0xff] }
 0x19c   : > { %3941 = vmatpush.bf16.msra.mxu2 %v8417_v5  ;;  %v2553_v29 = vadd.f32 %v2552_v24, %v2491_v23  ;;  %v8470_v5 = vld [vmem:[%s10232_s1 + $0x68] sm:$0xff]  ;;  %v8485_v23 = vld [vmem:[%s10233_s2] sm:$0xff] }
 0x19d   : > { %4002 = vmatpush.bf16.msra.mxu3 %v8409_v6  ;;  %3761 = vmatmul.bf16.vlgmr.msra.gmra.mxu0 %v7313_v12  ;;  %v8462_v6 = vld [vmem:[%s10232_s1 + $0x28] sm:$0xff] }
 0x19e   : > { %4074 = vmatpush.bf16.msrb.mxu0 %v8432_v7  ;;  %3840 = vmatmul.bf16.vlgmr.msra.gmra.mxu1 %v7395_v13  ;;  %v8478_v7 = vld [vmem:[%s10232_s1 + $0xa8] sm:$0xff]  ;;  %v8477_v13 = vld [vmem:[%s10232_s1 + $0xa0] sm:$0xff] }
 0x19f   : > { %4176 = vmatpush.bf16.msrb.mxu1 %v8448_v8  ;;  %3942 = vmatmul.bf16.vlgmr.msra.gmra.mxu2 %v7445_v16  ;;  %v8460_v16 = vld [vmem:[%s10232_s1 + $0x18] sm:$0xff] }
 0x1a0   : > { %4237 = vmatpush.bf16.msrb.mxu2 %v8440_v9  ;;  %4003 = vmatmul.bf16.vlgmr.msra.gmra.mxu3 %v7444_v15  ;;  %v8468_v15 = vld [vmem:[%s10232_s1 + $0x58] sm:$0xff] }
 0x1a1   : > { %4316 = vmatpush.bf16.msrb.mxu3 %v8456_v10  ;;  %v8469_v10 = vld [vmem:[%s10232_s1 + $0x60] sm:$0xff] }
 0x1a2   : > { %4075 = vmatpush.bf16.msrb.mxu0 %v8431_v11  ;;  %v2631_v34 = vpop.f32.mrf.mxu2  ;;  %v2493_v36 = vpop.f32.mrf.mxu0  ;;  %v8461_v11 = vld [vmem:[%s10232_s1 + $0x20] sm:$0xff] }
 0x1a3   : > { %4177 = vmatpush.bf16.msrb.mxu1 %v8447_v14  ;;  %v9911_v35 = vpop.f32.mrf.mxu3  ;;  %v2554_v37 = vpop.f32.mrf.mxu1  ;;  %v2635_v38 = vadd.f32 %v2631_v34, %v2553_v29  ;;  %v8475_v29 = vld [vmem:[%s10232_s1 + $0x90] sm:$0xff]  ;;  %v8457_v36 = vld [vmem:[%s10232_s1] sm:$0xff] }
 0x1a4   : > { %4238 = vmatpush.bf16.msrb.mxu2 %v8439_v17  ;;  %v8473_v37 = vld [vmem:[%s10232_s1 + $0x80] sm:$0xff] }
 0x1a5   : > { %4317 = vmatpush.bf16.msrb.mxu3 %v8455_v18  ;;  %v2636_v44 = vadd.f32 %v9928_v43, %v2635_v38  ;;  %v8476_v18 = vld [vmem:[%s10232_s1 + $0x98] sm:$0xff]  ;;  %v8483_v38 = vld [vmem:[%s10233_s2 + $0x10] sm:$0xff] }
 0x1a6   : > { %4076 = vmatpush.bf16.msrb.mxu0 %v8430_v19 }
 0x1a7   : > { %4178 = vmatpush.bf16.msrb.mxu1 %v8446_v20  ;;  %v2637_v45 = vmax.f32 %v2636_v44, 0.0  ;;  %v8487_v44 = vld [vmem:[%s10233_s2 + $0x10] sm:$0xff] }
 0x1a8   : > { %4239 = vmatpush.bf16.msrb.mxu2 %v8438_v21 }
 0x1a9   : > { %4318 = vmatpush.bf16.msrb.mxu3 %v8454_v22  ;;  %v2638_v51 = vpack.c.bf16 %v2637_v45, %v2637_v45  ;;  %v7788_v45 = vld [vmem:[%s8833_s23 + $0x88] sm:$0xf] }
 0x1aa   : > { %4077 = vmatpush.bf16.msrb.mxu0 %v8429_v25  ;;  %v2633_v53 = vpop.f32.mrf.mxu2  ;;  %v8467_v25 = vld [vmem:[%s10232_s1 + $0x50] sm:$0xff] }
 0x1ab   : > { %4179 = vmatpush.bf16.msrb.mxu1 %v8445_v26  ;;  %v2735_v52 = vpop.f32.mrf.mxu3  ;;  %2640 = vst.msk [vmem:[#allocation2 + $0x20] sm:$0xf] %vm703_vm0, %v2638_v51  ;;  %v8459_v26 = vld [vmem:[%s10232_s1 + $0x10] sm:$0xff] }
 0x1ac   : > { %4240 = vmatpush.bf16.msrb.mxu2 %v8437_v27 }
 0x1ad   : > { %4319 = vmatpush.bf16.msrb.mxu3 %v8453_v28  ;;  %v4581_v28 = vld [vmem:[#allocation2 + $0x4] sm:$0xf] }
 0x1ae   : > { %4078 = vmatpush.bf16.msrb.mxu0 %v8428_v30  ;;  %v8466_v30 = vld [vmem:[%s10232_s1 + $0x48] sm:$0xff] }
 0x1af   : > { %4180 = vmatpush.bf16.msrb.mxu1 %v8444_v31  ;;  %v8458_v31 = vld [vmem:[%s10232_s1 + $0x8] sm:$0xff] }
 0x1b0   : > { %4241 = vmatpush.bf16.msrb.mxu2 %v8436_v32  ;;  %v8474_v32 = vld [vmem:[%s10232_s1 + $0x88] sm:$0xff] }
 0x1b1   : > { %4320 = vmatpush.bf16.msrb.mxu3 %v8452_v33 }
 0x1b2   : > { %4079 = vmatpush.bf16.msrb.mxu0 %v8427_v39  ;;  %v8484_v39 = vld [vmem:[%s10233_s2 + $0x18] sm:$0xff] }
 0x1b3   : > { %4181 = vmatpush.bf16.msrb.mxu1 %v8443_v40  ;;  %v8486_v40 = vld [vmem:[%s10233_s2 + $0x8] sm:$0xff] }
 0x1b4   : > { %4242 = vmatpush.bf16.msrb.mxu2 %v8435_v41  ;;  %v7707_v41 = vld [vmem:[%s8833_s23 + $0x84] sm:$0xf] }
 0x1b5   : > { %4321 = vmatpush.bf16.msrb.mxu3 %v8451_v42  ;;  %v7706_v42 = vld [vmem:[%s8833_s23 + $0x80] sm:$0xf] }
 0x1b6   : > { %4080 = vmatpush.bf16.msrb.mxu0 %v8426_v47  ;;  %v8488_v47 = vld [vmem:[%s10233_s2 + $0x18] sm:$0xff] }
 0x1b7   : > { %4182 = vmatpush.bf16.msrb.mxu1 %v8442_v48  ;;  %v8490_v48 = vld [vmem:[%s10233_s2 + $0x8] sm:$0xff] }
 0x1b8   : > { %4243 = vmatpush.bf16.msrb.mxu2 %v8434_v49  ;;  %v8489_v49 = vld [vmem:[%s10233_s2] sm:$0xff] }
 0x1b9   : > { %4322 = vmatpush.bf16.msrb.mxu3 %v8450_v50  ;;  %v4578_v50 = vld [vmem:[#allocation2] sm:$0xf] }
 0x1ba   : > { %4081 = vmatpush.bf16.msrb.mxu0 %v8425_v54  ;;  %v2794_v8 = vpop.f32.mrf.mxu0 }
 0x1bb   : > { %4183 = vmatpush.bf16.msrb.mxu1 %v8441_v55  ;;  %v2873_v9 = vpop.f32.mrf.mxu1  ;;  %v2795_v12 = vadd.f32 %v2794_v8, %v9911_v35  ;;  %v8465_v35 = vld [vmem:[%s10232_s1 + $0x40] sm:$0xff] }
 0x1bc   : > { %4244 = vmatpush.bf16.msrb.mxu2 %v8433_v56 }
 0x1bd   : > { %4323 = vmatpush.bf16.msrb.mxu3 %v8449_v57  ;;  %4082 = vmatmul.bf16.vlgmr.msrb.gmra.mxu0 %v7526_v61  ;;  %v2877_v14 = vadd.f32 %v2873_v9, %v2795_v12  ;;  %v8492_v61 = vld [vmem:[%s10233_s2 + $0x18] sm:$0xff]  ;;  %v8495_v12 = vld [vmem:[%s10233_s2 + $0x10] sm:$0xff] }
 0x1be   : > { %4418 = vmatpush.bf16.msra.mxu0 %v8472_v58  ;;  %4184 = vmatmul.bf16.vlgmr.msrb.gmra.mxu1 %v7576_v2  ;;  %v8491_v58 = vld [vmem:[%s10233_s2 + $0x10] sm:$0xff]  ;;  %v4657_v2 = vld [vmem:[#allocation2 + $0xc] sm:$0xf] }
 0x1bf   : > { %4479 = vmatpush.bf16.msra.mxu1 %v8464_v59  ;;  %4245 = vmatmul.bf16.vlgmr.msrb.gmra.mxu2 %v7575_v62  ;;  %v2878_v17 = vadd.f32 %v9928_v43, %v2877_v14  ;;  %v8498_v14 = vld [vmem:[%s10233_s2 + $0x8] sm:$0xff] }
 0x1c0   : > { %4558 = vmatpush.bf16.msra.mxu2 %v8480_v60  ;;  %4324 = vmatmul.bf16.vlgmr.msrb.gmra.mxu3 %v7657_v46 }
 0x1c1   : > { %4602 = vmatpush.bf16.msra.mxu3 %v8482_v63  ;;  %v2879_v19 = vmax.f32 %v2878_v17, 0.0  ;;  %v4802_v17 = vld [vmem:[#allocation2 + $0x14] sm:$0xf] }
 0x1c2   : > { %4419 = vmatpush.bf16.msra.mxu0 %v8471_v0  ;;  %v2975_v21 = vpop.f32.mrf.mxu2  ;;  %v2796_v22 = vpop.f32.mrf.mxu0  ;;  %v8494_v0 = vld [vmem:[%s10233_s2 + $0x8] sm:$0xff] }
 0x1c3   : > { %4480 = vmatpush.bf16.msra.mxu1 %v8463_v1  ;;  %v3036_v20 = vpop.f32.mrf.mxu3  ;;  %v2875_v24 = vpop.f32.mrf.mxu1  ;;  %v2880_v27 = vpack.c.bf16 %v2879_v19, %v2879_v19  ;;  %v4630_v1 = vld [vmem:[#allocation2 + $0x8] sm:$0xf]  ;;  %v4799_v19 = vld [vmem:[#allocation2 + $0x10] sm:$0xf] }
 0x1c4   : > { %4559 = vmatpush.bf16.msra.mxu2 %v8479_v3  ;;  %v3037_v51 = vadd.f32 %v3036_v20, %v2975_v21  ;;  %v4695_v3 = vld [vmem:[#allocation2 + $0xc] sm:$0xf] }
 0x1c5   : > { %4624 = vmatpush.bf16.msrb.mxu3 %v8481_v4  ;;  %2882 = vst.msk [vmem:[#allocation2 + $0x24] sm:$0xf] %vm703_vm0, %v2880_v27 }
 0x1c6   : > { %4420 = vmatpush.bf16.msra.mxu0 %v8470_v5  ;;  %v8493_v5 = vld [vmem:[%s10233_s2] sm:$0xff] }
 0x1c7   : > { %4481 = vmatpush.bf16.msra.mxu1 %v8462_v6  ;;  %v4692_v6 = vld [vmem:[#allocation2 + $0x8] sm:$0xf] }
 0x1c8   : > { %4560 = vmatpush.bf16.msra.mxu2 %v8478_v7 }
 0x1ca   : > { %4421 = vmatpush.bf16.msra.mxu0 %v8469_v10  ;;  %v2977_v34 = vpop.f32.mrf.mxu2 }
 0x1cb   : > { %4482 = vmatpush.bf16.msra.mxu1 %v8461_v11  ;;  %v3038_v33 = vpop.f32.mrf.mxu3  ;;  %v4909_v34 = vld [vmem:[#allocation2 + $0x1c] sm:$0xf] }
 0x1cc   : > { %4561 = vmatpush.bf16.msra.mxu2 %v8477_v13  ;;  %v8496_v13 = vld [vmem:[%s10233_s2 + $0x18] sm:$0xff] }
 0x1cd   : > { %v4875_v33 = vld [vmem:[#allocation2 + $0x1c] sm:$0xf] }
 0x1ce   : > { %4422 = vmatpush.bf16.msra.mxu0 %v8468_v15  ;;  %v4742_v15 = vld [vmem:[#allocation2 + $0x10] sm:$0xf] }
 0x1cf   : > { %4483 = vmatpush.bf16.msra.mxu1 %v8460_v16  ;;  %v4768_v16 = vld [vmem:[#allocation2 + $0x14] sm:$0xf] }
 0x1d0   : > { %4562 = vmatpush.bf16.msra.mxu2 %v8476_v18  ;;  %7843 = vmatmul.msk.bf16.vlgmr.msra.gmra.mxu3 %vm4591_vm1, %v4581_v28  ;;  %v8497_v18 = vld [vmem:[%s10233_s2] sm:$0xff]  ;;  %v8499_v28 = vld [vmem:[%s10233_s2 + $0x10] sm:$0xff] }
 0x1d1   : > { %4736 = vmatpush.bf16.msra.mxu3 %v8485_v23 }
 0x1d2   : > { %4423 = vmatpush.bf16.msra.mxu0 %v8467_v25 }
 0x1d3   : > { %4484 = vmatpush.bf16.msra.mxu1 %v8459_v26 }
 0x1d4   : > { %4563 = vmatpush.bf16.msra.mxu2 %v8475_v29 }
 0x1d6   : > { %4424 = vmatpush.bf16.msra.mxu0 %v8466_v30  ;;  %v8500_v30 = vld [vmem:[%s10233_s2 + $0x18] sm:$0xff] }
 0x1d7   : > { %4485 = vmatpush.bf16.msra.mxu1 %v8458_v31  ;;  %v8502_v31 = vld [vmem:[%s10233_s2 + $0x8] sm:$0xff] }
 0x1d8   : > { %4564 = vmatpush.bf16.msra.mxu2 %v8474_v32  ;;  %v4849_v32 = vld [vmem:[#allocation2 + $0x18] sm:$0xf] }
 0x1da   : > { %4425 = vmatpush.bf16.msra.mxu0 %v8465_v35  ;;  %v3115_v52 = vpop.f32.mrf.mxu0 }
 0x1db   : > { %4486 = vmatpush.bf16.msra.mxu1 %v8457_v36  ;;  %v3217_v53 = vpop.f32.mrf.mxu1  ;;  %v3119_v54 = vadd.f32 %v3115_v52, %v3037_v51  ;;  %v8501_v36 = vld [vmem:[%s10233_s2] sm:$0xff] }
 0x1dc   : > { %4565 = vmatpush.bf16.msra.mxu2 %v8473_v37  ;;  %v4906_v37 = vld [vmem:[#allocation2 + $0x18] sm:$0xf] }
 0x1dd   : > { %4426 = vmatmul.bf16.vlgmr.msra.gmra.mxu0 %v7707_v41  ;;  %v3120_v55 = vadd.f32 %v9928_v43, %v3119_v54  ;;  %v8503_v41 = vld [vmem:[%s10233_s2 + $0x10] sm:$0xff] }
 0x1de   : > { %4650 = vmatpush.bf16.msrb.mxu0 %v8483_v38  ;;  %4487 = vmatmul.bf16.vlgmr.msra.gmra.mxu1 %v7706_v42  ;;  %v8504_v42 = vld [vmem:[%s10233_s2 + $0x18] sm:$0xff] }
 0x1df   : > { %4677 = vmatpush.bf16.msrb.mxu1 %v8484_v39  ;;  %4566 = vmatmul.bf16.vlgmr.msra.gmra.mxu2 %v7788_v45  ;;  %v3121_v56 = vmax.f32 %v3120_v55, 0.0  ;;  %v4956_v45 = vld [vmem:[#allocation2 + $0x20] sm:$0xf] }
 0x1e0   : > { %4714 = vmatpush.bf16.msrb.mxu2 %v8486_v40  ;;  %7848 = vmatmul.msk.bf16.vlgmr.msrb.gmra.mxu3 %vm4591_vm1, %v4578_v50  ;;  %v5013_v50 = vld [vmem:[#allocation2 + $0x20] sm:$0xf] }
 0x1e1   : > { %4843 = vmatpush.bf16.msrb.mxu3 %v8489_v49  ;;  %v3122_v57 = vpack.c.bf16 %v3121_v56, %v3121_v56  ;;  %v8505_v49 = vld [vmem:[%s10233_s2] sm:$0xff] }
 0x1e2   : > { %4761 = vmatpush.bf16.msra.mxu0 %v8487_v44  ;;  %v3278_v59 = vpop.f32.mrf.mxu2  ;;  %v3117_v62 = vpop.f32.mrf.mxu0  ;;  %v8506_v44 = vld [vmem:[%s10233_s2 + $0x8] sm:$0xff] }
 0x1e3   : > { %4787 = vmatpush.bf16.msra.mxu1 %v8488_v47  ;;  %v3357_v60 = vpop.f32.mrf.mxu3  ;;  %v3219_v46 = vpop.f32.mrf.mxu1  ;;  %v3279_v63 = vadd.f32 %v3278_v59, %v3217_v53  ;;  %3124 = vst.msk [vmem:[#allocation2 + $0x28] sm:$0xf] %vm703_vm0, %v3122_v57  ;;  %v4982_v47 = vld [vmem:[#allocation2 + $0x24] sm:$0xf]  ;;  %v8507_v62 = vld [vmem:[%s10233_s2 + $0x10] sm:$0xff] }
 0x1e4   : > { %4821 = vmatpush.bf16.msra.mxu2 %v8490_v48  ;;  %v5016_v48 = vld [vmem:[#allocation2 + $0x24] sm:$0xf] }
 0x1e5   : > { %v3361_v4 = vadd.f32 %v3357_v60, %v3279_v63 }
 0x1e7   : > { %v3362_v7 = vadd.f32 %v9928_v43, %v3361_v4  ;;  %v8508_v4 = vld [vmem:[%s10233_s2 + $0x18] sm:$0xff] }
 0x1e9   : > { %v3363_v8 = vmax.f32 %v3362_v7, 0.0 }
 0x1ea   : > { %v3280_v10 = vpop.f32.mrf.mxu2  ;;  %v5063_v46 = vld [vmem:[#allocation2 + $0x28] sm:$0xf] }
 0x1eb   : > { %v3359_v9 = vpop.f32.mrf.mxu3  ;;  %v3364_v11 = vpack.c.bf16 %v3363_v8, %v3363_v8 }
 0x1ed   : > { %7855 = vmatmul.msk.bf16.vlgmr.msrb.gmra.mxu0 %vm4591_vm1, %v4630_v1  ;;  %3366 = vst.msk [vmem:[#allocation2 + $0x2c] sm:$0xf] %vm703_vm0, %v3364_v11 }
 0x1ee   : > { %7862 = vmatmul.msk.bf16.vlgmr.msrb.gmra.mxu1 %vm4591_vm1, %v4657_v2  ;;  %4868 = vmatpush.bf16.msrb.mxu0 %v8491_v58 }
 0x1ef   : > { %7869 = vmatmul.msk.bf16.vlgmr.msrb.gmra.mxu2 %vm4591_vm1, %v4695_v3  ;;  %4894 = vmatpush.bf16.msrb.mxu1 %v8492_v61  ;;  %v5120_v3 = vld [vmem:[#allocation2 + $0x28] sm:$0xf] }
 0x1f0   : > { %4928 = vmatpush.bf16.msrb.mxu2 %v8494_v0  ;;  %7874 = vmatmul.msk.bf16.vlgmr.msra.gmra.mxu3 %vm4591_vm1, %v4692_v6 }
 0x1f1   : > { %4950 = vmatpush.bf16.msra.mxu3 %v8493_v5 }
 0x1f4   : > { %v5089_v63 = vld [vmem:[#allocation2 + $0x2c] sm:$0xf] }
 0x1f5   : > { %v5123_v0 = vld [vmem:[#allocation2 + $0x2c] sm:$0xf] }
 0x1fa   : > { %v3459_v20 = vpop.f32.mrf.mxu0 }
 0x1fb   : > { %v3520_v21 = vpop.f32.mrf.mxu1 }
 0x1fc   : > { %v3521_v22 = vadd.f32 %v3520_v21, %v3459_v20 }
 0x1fd   : > { %7881 = vmatmul.msk.bf16.vlgmr.msra.gmra.mxu0 %vm4591_vm1, %v4742_v15 }
 0x1fe   : > { %7888 = vmatmul.msk.bf16.vlgmr.msra.gmra.mxu1 %vm4591_vm1, %v4768_v16  ;;  %4975 = vmatpush.bf16.msra.mxu0 %v8495_v12 }
 0x1ff   : > { %7895 = vmatmul.msk.bf16.vlgmr.msra.gmra.mxu2 %vm4591_vm1, %v4802_v17  ;;  %5001 = vmatpush.bf16.msra.mxu1 %v8496_v13 }
 0x200   : > { %5035 = vmatpush.bf16.msra.mxu2 %v8498_v14  ;;  %7900 = vmatmul.msk.bf16.vlgmr.msrb.gmra.mxu3 %vm4591_vm1, %v4799_v19 }
 0x201   : > { %5057 = vmatpush.bf16.msrb.mxu3 %v8497_v18 }
 0x202   : > { %v3599_v23 = vpop.f32.mrf.mxu2  ;;  %v3461_v25 = vpop.f32.mrf.mxu0 }
 0x203   : > { %v3701_v24 = vpop.f32.mrf.mxu3  ;;  %v3522_v26 = vpop.f32.mrf.mxu1  ;;  %v3603_v27 = vadd.f32 %v3599_v23, %v3521_v22 }
 0x205   : > { %v3604_v29 = vadd.f32 %v9928_v43, %v3603_v27 }
 0x207   : > { %v3605_v35 = vmax.f32 %v3604_v29, 0.0 }
 0x209   : > { %v3606_v38 = vpack.c.bf16 %v3605_v35, %v3605_v35 }
 0x20a   : > { %v3601_v40 = vpop.f32.mrf.mxu2 }
 0x20b   : > { %v3703_v39 = vpop.f32.mrf.mxu3  ;;  %3608 = vst.msk [vmem:[#allocation2 + $0x30] sm:$0xf] %vm703_vm0, %v3606_v38  ;;  %v8512_v38 = vld [vmem:[%s10234_s3 + $0x18] sm:$0xff] }
 0x20d   : > { %7907 = vmatmul.msk.bf16.vlgmr.msrb.gmra.mxu0 %vm4591_vm1, %v4849_v32 }
 0x20e   : > { %7914 = vmatmul.msk.bf16.vlgmr.msrb.gmra.mxu1 %vm4591_vm1, %v4875_v33  ;;  %5082 = vmatpush.bf16.msrb.mxu0 %v8499_v28 }
 0x20f   : > { %7921 = vmatmul.msk.bf16.vlgmr.msrb.gmra.mxu2 %vm4591_vm1, %v4909_v34  ;;  %5108 = vmatpush.bf16.msrb.mxu1 %v8500_v30  ;;  %v8510_v30 = vld [vmem:[%s10234_s3 + $0x8] sm:$0xff] }
 0x210   : > { %5142 = vmatpush.bf16.msrb.mxu2 %v8502_v31  ;;  %7926 = vmatmul.msk.bf16.vlgmr.msra.gmra.mxu3 %vm4591_vm1, %v4906_v37 }
 0x211   : > { %5164 = vmatpush.bf16.msra.mxu3 %v8501_v36 }
 0x212   : > { %v5170_v7 = vld [vmem:[#allocation2 + $0x30] sm:$0xf] }
 0x213   : > { %v5227_v13 = vld [vmem:[#allocation2 + $0x30] sm:$0xf] }
 0x21a   : > { %v3762_v51 = vpop.f32.mrf.mxu0 }
 0x21b   : > { %v3841_v52 = vpop.f32.mrf.mxu1  ;;  %v3763_v53 = vadd.f32 %v3762_v51, %v3701_v24 }
 0x21d   : > { %7933 = vmatmul.msk.bf16.vlgmr.msra.gmra.mxu0 %vm4591_vm1, %v4956_v45  ;;  %v3845_v54 = vadd.f32 %v3841_v52, %v3763_v53 }
 0x21e   : > { %7940 = vmatmul.msk.bf16.vlgmr.msra.gmra.mxu1 %vm4591_vm1, %v4982_v47  ;;  %5189 = vmatpush.bf16.msra.mxu0 %v8503_v41  ;;  %v8511_v41 = vld [vmem:[%s10234_s3 + $0x10] sm:$0xff]  ;;  %v10177_v47 = vld [vmem:[%s10236_s5] ss:$0 sm:$0xff] }
 0x21f   : > { %7947 = vmatmul.msk.bf16.vlgmr.msra.gmra.mxu2 %vm4591_vm1, %v5016_v48  ;;  %5215 = vmatpush.bf16.msra.mxu1 %v8504_v42  ;;  %v3846_v55 = vadd.f32 %v9928_v43, %v3845_v54 }
 0x220   : > { %5249 = vmatpush.bf16.msra.mxu2 %v8506_v44  ;;  %7952 = vmatmul.msk.bf16.vlgmr.msrb.gmra.mxu3 %vm4591_vm1, %v5013_v50 }
 0x221   : > { %5271 = vmatpush.bf16.msrb.mxu3 %v8505_v49  ;;  %v3847_v56 = vmax.f32 %v3846_v55, 0.0 }
 0x222   : > { %v3943_v58 = vpop.f32.mrf.mxu2  ;;  %v3764_v59 = vpop.f32.mrf.mxu0 }
 0x223   : > { %v4004_v57 = vpop.f32.mrf.mxu3  ;;  %v3843_v60 = vpop.f32.mrf.mxu1  ;;  %v3848_v61 = vpack.c.bf16 %v3847_v56, %v3847_v56 }
 0x224   : > { %v4005_v5 = vadd.f32 %v4004_v57, %v3943_v58  ;;  %v8514_v57 = vld [vmem:[%s10234_s3 + $0x28] sm:$0xff]  ;;  %v8513_v60 = vld [vmem:[%s10234_s3 + $0x20] sm:$0xff] }
 0x225   : > { %3850 = vst.msk [vmem:[#allocation2 + $0x34] sm:$0xf] %vm703_vm0, %v3848_v61 }
 0x22a   : > { %v3945_v2 = vpop.f32.mrf.mxu2 }
 0x22b   : > { %v4006_v1 = vpop.f32.mrf.mxu3 }
 0x22c   : > { %v5196_v8 = vld [vmem:[#allocation2 + $0x34] sm:$0xf] }
 0x22d   : > { %7959 = vmatmul.msk.bf16.vlgmr.msrb.gmra.mxu0 %vm4591_vm1, %v5063_v46  ;;  %v5230_v10 = vld [vmem:[#allocation2 + $0x34] sm:$0xf] }
 0x22e   : > { %7966 = vmatmul.msk.bf16.vlgmr.msrb.gmra.mxu1 %vm4591_vm1, %v5089_v63  ;;  %5296 = vmatpush.bf16.msrb.mxu0 %v8507_v62 }
 0x22f   : > { %7973 = vmatmul.msk.bf16.vlgmr.msrb.gmra.mxu2 %vm4591_vm1, %v5123_v0  ;;  %5322 = vmatpush.bf16.msrb.mxu1 %v8508_v4 }
 0x230   : > { %7978 = vmatmul.msk.bf16.vlgmr.msra.gmra.mxu3 %vm4591_vm1, %v5120_v3  ;;  %5368 = vmatpush.bf16.msrb.mxu2 %v8512_v38 }
 0x231   : > { %5396 = vmatpush.bf16.msra.mxu3 %v8510_v30 }
 0x234   : > { %5369 = vmatpush.bf16.msrb.mxu2 %v8511_v41 }
 0x23a   : > { %v4083_v6 = vpop.f32.mrf.mxu0 }
 0x23b   : > { %v4087_v9 = vadd.f32 %v4083_v6, %v4005_v5  ;;  %v4185_v11 = vpop.f32.mrf.mxu1 }
 0x23d   : > { %7985 = vmatmul.msk.bf16.vlgmr.msra.gmra.mxu0 %vm4591_vm1, %v5170_v7  ;;  %v4088_v12 = vadd.f32 %v9928_v43, %v4087_v9  ;;  %v8516_v9 = vld [vmem:[%s10234_s3 + $0x38] sm:$0xff] }
 0x23e   : > { %7992 = vmatmul.msk.bf16.vlgmr.msra.gmra.mxu1 %vm4591_vm1, %v5196_v8  ;;  %5430 = vmatpush.bf16.msra.mxu0 %v8514_v57 }
 0x23f   : > { %7999 = vmatmul.msk.bf16.vlgmr.msra.gmra.mxu2 %vm4591_vm1, %v5230_v10  ;;  %v4089_v14 = vmax.f32 %v4088_v12, 0.0  ;;  %5465 = vmatpush.bf16.msra.mxu1 %v8516_v9  ;;  %v8515_v12 = vld [vmem:[%s10234_s3 + $0x30] sm:$0xff] }
 0x240   : > { %8004 = vmatmul.msk.bf16.vlgmr.msrb.gmra.mxu3 %vm4591_vm1, %v5227_v13  ;;  %5484 = vmatpush.bf16.msra.mxu2 %v8512_v38 }
 0x241   : > { %v4090_v15 = vpack.c.bf16 %v4089_v14, %v4089_v14 }
 0x242   : > { %v4246_v16 = vpop.f32.mrf.mxu2  ;;  %v4085_v19 = vpop.f32.mrf.mxu0  ;;  %5431 = vmatpush.bf16.msra.mxu0 %v8513_v60 }
 0x243   : > { %v4325_v17 = vpop.f32.mrf.mxu3  ;;  %v4247_v18 = vadd.f32 %v4246_v16, %v4185_v11  ;;  %4092 = vst.msk [vmem:[#allocation2 + $0x38] sm:$0xf] %vm703_vm0, %v4090_v15  ;;  %v4187_v21 = vpop.f32.mrf.mxu1  ;;  %5466 = vmatpush.bf16.msra.mxu1 %v8515_v12 }
 0x244   : > { %5485 = vmatpush.bf16.msra.mxu2 %v8511_v41 }
 0x245   : > { %v4329_v20 = vadd.f32 %v4325_v17, %v4247_v18 }
 0x247   : > { %v4330_v22 = vadd.f32 %v9928_v43, %v4329_v20  ;;  %v8509_v43 = vld [vmem:[%s10234_s3] sm:$0xff] }
 0x248   : > { %5397 = vmatpush.bf16.msra.mxu3 %v8509_v43 }
 0x249   : > { %v4331_v23 = vmax.f32 %v4330_v22, 0.0 }
 0x24a   : > { %v4248_v25 = vpop.f32.mrf.mxu2  ;;  %v5277_v27 = vld [vmem:[#allocation2 + $0x38] sm:$0xf] }
 0x24b   : > { %v4327_v24 = vpop.f32.mrf.mxu3  ;;  %v4332_v26 = vpack.c.bf16 %v4331_v23, %v4331_v23 }
 0x24c   : > { %5497 = vmatpush.bf16.msrb.mxu3 %v8510_v30 }
 0x24d   : > { %8011 = vmatmul.msk.bf16.vlgmr.msrb.gmra.mxu0 %vm4591_vm1, %v5277_v27  ;;  %4334 = vst.msk [vmem:[#allocation2 + $0x3c] sm:$0xf] %vm703_vm0, %v4332_v26 }
 0x24e   : > { %5514 = vmatpush.bf16.msrb.mxu0 %v8514_v57 }
 0x250   : > { %5498 = vmatpush.bf16.msrb.mxu3 %v8509_v43 }
 0x252   : > { %5515 = vmatpush.bf16.msrb.mxu0 %v8513_v60 }
 0x253   : > { %v4604_v28 = vpop.f32.mrf.mxu3 }
 0x254   : > { %v5303_v29 = vld [vmem:[#allocation2 + $0x3c] sm:$0xf] }
 0x255   : > { %8018 = vmatmul.msk.bf16.vlgmr.msrb.gmra.mxu1 %vm4591_vm1, %v5303_v29 }
 0x256   : > { %5532 = vmatpush.bf16.msrb.mxu1 %v8516_v9 }
 0x25a   : > { %v4427_v31 = vpop.f32.mrf.mxu0  ;;  %5533 = vmatpush.bf16.msrb.mxu1 %v8515_v12 }
 0x25b   : > { %v4488_v32 = vpop.f32.mrf.mxu1  ;;  %v4606_v33 = vpop.f32.mrf.mxu3 }
 0x262   : > { %v4567_v34 = vpop.f32.mrf.mxu2  ;;  %v4429_v35 = vpop.f32.mrf.mxu0 }
 0x263   : > { %v4490_v36 = vpop.f32.mrf.mxu1  ;;  %v4626_v37 = vpop.f32.mrf.mxu3 }
 0x264   : > { %v4627_v39 = vadd.f32 %v4626_v37, %v4604_v28 }
 0x26a   : > { %v4569_v40 = vpop.f32.mrf.mxu2  ;;  %v4652_v42 = vpop.f32.mrf.mxu0 }
 0x26b   : > { %v4679_v44 = vpop.f32.mrf.mxu1  ;;  %v4656_v45 = vadd.f32 %v4652_v42, %v4627_v39  ;;  %v4628_v48 = vpop.f32.mrf.mxu3 }
 0x26d   : > { %v4683_v49 = vadd.f32 %v4679_v44, %v4656_v45 }
 0x26f   : > { %v4687_v50 = vadd.f32 %v10177_v47, %v4683_v49 }
 0x271   : > { %v4688_v51 = vmax.f32 %v4687_v50, 0.0 }
 0x272   : > { %v4716_v52 = vpop.f32.mrf.mxu2  ;;  %v4654_v53 = vpop.f32.mrf.mxu0 }
 0x273   : > { %v4681_v54 = vpop.f32.mrf.mxu1  ;;  %v4689_v55 = vpack.c.bf16 %v4688_v51, %v4688_v51  ;;  %v4738_v56 = vpop.f32.mrf.mxu3 }
 0x274   : > { %v4739_v58 = vadd.f32 %v4738_v56, %v4716_v52 }
 0x275   : > { %4691 = vst.msk [vmem:[#allocation3] sm:$0xf] %vm4690_vm2, %v4689_v55 }
 0x27a   : > { %v4718_v59 = vpop.f32.mrf.mxu2  ;;  %v4763_v61 = vpop.f32.mrf.mxu0 }
 0x27b   : > { %v4789_v62 = vpop.f32.mrf.mxu1  ;;  %v4767_v46 = vadd.f32 %v4763_v61, %v4739_v58  ;;  %v4740_v63 = vpop.f32.mrf.mxu3 }
 0x27c   : > { %v5335_v0 = vld [vmem:[#allocation3] sm:$0xf] }
 0x27d   : > { %v4793_v1 = vadd.f32 %v4789_v62, %v4767_v46  ;;  %8040 = vmatmul.msk.bf16.vlgmr.msra.gmra.mxu3 %vm5358_vm3, %v5335_v0 }
 0x27f   : > { %v4794_v2 = vadd.f32 %v10177_v47, %v4793_v1 }
 0x281   : > { %v4795_v3 = vmax.f32 %v4794_v2, 0.0 }
 0x282   : > { %v4823_v4 = vpop.f32.mrf.mxu2  ;;  %v4765_v5 = vpop.f32.mrf.mxu0 }
 0x283   : > { %v4791_v6 = vpop.f32.mrf.mxu1  ;;  %v4796_v7 = vpack.c.bf16 %v4795_v3, %v4795_v3  ;;  %v4845_v8 = vpop.f32.mrf.mxu3 }
 0x284   : > { %v4846_v10 = vadd.f32 %v4845_v8, %v4823_v4 }
 0x285   : > { %4798 = vst.msk [vmem:[#allocation3 + $0x4] sm:$0xf] %vm4690_vm2, %v4796_v7 }
 0x28a   : > { %v4825_v11 = vpop.f32.mrf.mxu2  ;;  %v4870_v13 = vpop.f32.mrf.mxu0 }
 0x28b   : > { %v4896_v14 = vpop.f32.mrf.mxu1  ;;  %v4874_v15 = vadd.f32 %v4870_v13, %v4846_v10  ;;  %v4847_v16 = vpop.f32.mrf.mxu3 }
 0x28c   : > { %v5340_v17 = vld [vmem:[#allocation3 + $0x4] sm:$0xf] }
 0x28d   : > { %v4900_v18 = vadd.f32 %v4896_v14, %v4874_v15  ;;  %8031 = vmatmul.msk.bf16.vlgmr.msrb.gmra.mxu2 %vm5358_vm3, %v5340_v17 }
 0x28f   : > { %v4901_v19 = vadd.f32 %v10177_v47, %v4900_v18 }
 0x291   : > { %v4902_v20 = vmax.f32 %v4901_v19, 0.0 }
 0x292   : > { %v4930_v21 = vpop.f32.mrf.mxu2  ;;  %v4872_v22 = vpop.f32.mrf.mxu0 }
 0x293   : > { %v4898_v23 = vpop.f32.mrf.mxu1  ;;  %v4903_v24 = vpack.c.bf16 %v4902_v20, %v4902_v20  ;;  %v4952_v25 = vpop.f32.mrf.mxu3 }
 0x294   : > { %v4953_v26 = vadd.f32 %v4952_v25, %v4930_v21 }
 0x295   : > { %4905 = vst.msk [vmem:[#allocation3 + $0x8] sm:$0xf] %vm4690_vm2, %v4903_v24 }
 0x29a   : > { %v4932_v27 = vpop.f32.mrf.mxu2  ;;  %v4977_v28 = vpop.f32.mrf.mxu0 }
 0x29b   : > { %v5003_v29 = vpop.f32.mrf.mxu1  ;;  %v4981_v30 = vadd.f32 %v4977_v28, %v4953_v26  ;;  %v4954_v43 = vpop.f32.mrf.mxu3 }
 0x29c   : > { %v5403_v31 = vld [vmem:[#allocation3 + $0x8] sm:$0xf]  ;;  %v8545_v43 = vld [vmem:[%s10237_s6] ss:$0 sm:$0xff] }
 0x29d   : > { %v5007_v32 = vadd.f32 %v5003_v29, %v4981_v30  ;;  %8053 = vmatmul.msk.bf16.vlgmr.msra.gmra.mxu0 %vm5358_vm3, %v5403_v31  ;;  %8068 = vmatmul.msk.bf16.vlgmr.msrb.gmra.mxu3 %vm5358_vm3, %v5403_v31 }
 0x29f   : > { %v5008_v33 = vadd.f32 %v10177_v47, %v5007_v32 }
 0x2a1   : > { %v5009_v34 = vmax.f32 %v5008_v33, 0.0 }
 0x2a2   : > { %v5037_v35 = vpop.f32.mrf.mxu2  ;;  %v4979_v36 = vpop.f32.mrf.mxu0 }
 0x2a3   : > { %v5005_v37 = vpop.f32.mrf.mxu1  ;;  %v5010_v38 = vpack.c.bf16 %v5009_v34, %v5009_v34  ;;  %v5059_v39 = vpop.f32.mrf.mxu3 }
 0x2a4   : > { %v5060_v40 = vadd.f32 %v5059_v39, %v5037_v35 }
 0x2a5   : > { %5012 = vst.msk [vmem:[#allocation3 + $0xc] sm:$0xf] %vm4690_vm2, %v5010_v38 }
 0x2aa   : > { %v5039_v41 = vpop.f32.mrf.mxu2  ;;  %v5084_v42 = vpop.f32.mrf.mxu0 }
 0x2ab   : > { %v5110_v44 = vpop.f32.mrf.mxu1  ;;  %v5088_v45 = vadd.f32 %v5084_v42, %v5060_v40  ;;  %v5061_v48 = vpop.f32.mrf.mxu3 }
 0x2ac   : > { %v5438_v49 = vld [vmem:[#allocation3 + $0xc] sm:$0xf] }
 0x2ad   : > { %v5114_v50 = vadd.f32 %v5110_v44, %v5088_v45  ;;  %8066 = vmatmul.msk.bf16.vlgmr.msra.gmra.mxu1 %vm5358_vm3, %v5438_v49  ;;  %8067 = vmatmul.msk.bf16.vlgmr.msra.gmra.mxu2 %vm5358_vm3, %v5438_v49 }
 0x2af   : > { %v5115_v51 = vadd.f32 %v10177_v47, %v5114_v50 }
 0x2b1   : > { %v5116_v52 = vmax.f32 %v5115_v51, 0.0 }
 0x2b2   : > { %v5144_v53 = vpop.f32.mrf.mxu2  ;;  %v5086_v54 = vpop.f32.mrf.mxu0 }
 0x2b3   : > { %v5112_v55 = vpop.f32.mrf.mxu1  ;;  %v5117_v56 = vpack.c.bf16 %v5116_v52, %v5116_v52  ;;  %v5166_v57 = vpop.f32.mrf.mxu3 }
 0x2b4   : > { %v5167_v58 = vadd.f32 %v5166_v57, %v5144_v53 }
 0x2b5   : > { %5119 = vst.msk [vmem:[#allocation3 + $0x10] sm:$0xf] %vm4690_vm2, %v5117_v56 }
 0x2ba   : > { %v5146_v59 = vpop.f32.mrf.mxu2  ;;  %v5191_v60 = vpop.f32.mrf.mxu0 }
 0x2bb   : > { %v5217_v61 = vpop.f32.mrf.mxu1  ;;  %v5195_v62 = vadd.f32 %v5191_v60, %v5167_v58  ;;  %v5168_v46 = vpop.f32.mrf.mxu3 }
 0x2bc   : > { %v5504_v63 = vld [vmem:[#allocation3 + $0x10] sm:$0xf] }
 0x2bd   : > { %v5221_v0 = vadd.f32 %v5217_v61, %v5195_v62  ;;  %8069 = vmatmul.msk.bf16.vlgmr.msrb.gmra.mxu0 %vm5358_vm3, %v5504_v63 }
 0x2bf   : > { %v5222_v1 = vadd.f32 %v10177_v47, %v5221_v0 }
 0x2c1   : > { %v5223_v2 = vmax.f32 %v5222_v1, 0.0 }
 0x2c2   : > { %v5251_v3 = vpop.f32.mrf.mxu2  ;;  %v5193_v4 = vpop.f32.mrf.mxu0 }
 0x2c3   : > { %v5219_v5 = vpop.f32.mrf.mxu1  ;;  %v5224_v6 = vpack.c.bf16 %v5223_v2, %v5223_v2  ;;  %v5273_v7 = vpop.f32.mrf.mxu3 }
 0x2c5   : > { %5226 = vst.msk [vmem:[#allocation3 + $0x14] sm:$0xf] %vm4690_vm2, %v5224_v6 }
 0x2ca   : > { %v5253_v8 = vpop.f32.mrf.mxu2  ;;  %v5298_v9 = vpop.f32.mrf.mxu0 }
 0x2cb   : > { %v5275_v10 = vpop.f32.mrf.mxu3 }
 0x2cc   : > { %v5522_v11 = vld [vmem:[#allocation3 + $0x14] sm:$0xf] }
 0x2cd   : > { %8070 = vmatmul.msk.bf16.vlgmr.msrb.gmra.mxu1 %vm5358_vm3, %v5522_v11 }
 0x2d2   : > { %v5300_v12 = vpop.f32.mrf.mxu0  ;;  %v5324_v13 = vpop.f32.mrf.mxu1 }
 0x2da   : > { %v5326_v14 = vpop.f32.mrf.mxu1 }
 0x300   : > { %v5399_v15 = vpop.f32.mrf.mxu3 }
 0x308   : > { %v5401_v47 = vpop.f32.mrf.mxu3 }
 0x310   : > { %v5371_v16 = vpop.f32.mrf.mxu2 }
 0x311   : > { %v5400_v28 = vadd.f32 %v5399_v15, %v5371_v16 }
 0x318   : > { %v5373_v17 = vpop.f32.mrf.mxu2 }
 0x31a   : > { %v5433_v18 = vpop.f32.mrf.mxu0 }
 0x31b   : > { %v5437_v29 = vadd.f32 %v5433_v18, %v5400_v28 }
 0x320   : > { %v5500_v19 = vpop.f32.mrf.mxu3 }
 0x322   : > { %v5435_v20 = vpop.f32.mrf.mxu0 }
 0x328   : > { %v5502_v21 = vpop.f32.mrf.mxu3 }
 0x32a   : > { %v5468_v22 = vpop.f32.mrf.mxu1 }
 0x32b   : > { %v5472_v30 = vadd.f32 %v5468_v22, %v5437_v29 }
 0x32d   : > { %v5476_v34 = vadd.f32 %v8545_v43, %v5472_v30 }
 0x32f   : > { %v5477_v37 = vmax.f32 %v5476_v34, 0.0 }
 0x330   : > { %v5487_v23 = vpop.f32.mrf.mxu2 }
 0x331   : > { %v5501_v31 = vadd.f32 %v5500_v19, %v5487_v23 }
 0x332   : > { %v5470_v24 = vpop.f32.mrf.mxu1 }
 0x338   : > { %v5489_v25 = vpop.f32.mrf.mxu2 }
 0x33a   : > { %v5517_v26 = vpop.f32.mrf.mxu0 }
 0x33b   : > { %v5521_v32 = vadd.f32 %v5517_v26, %v5501_v31 }
 0x342   : > { %v5519_v27 = vpop.f32.mrf.mxu0 }
 0x34a   : > { %v5535_v33 = vpop.f32.mrf.mxu1 }
 0x34b   : > { %v5539_v35 = vadd.f32 %v5535_v33, %v5521_v32 }
 0x34d   : > { %v5540_v36 = vadd.f32 %v8545_v43, %v5539_v35 }
 0x34f   : > { %v5541_v38 = vmax.f32 %v5540_v36, 0.0 }
 0x351   : > { %v5542_v39 = vmax.f32 %v5477_v37, %v5541_v38 }
 0x352   : > { %v5537_v40 = vpop.f32.mrf.mxu1 }
 0x353   : > { %5544 = vst.msk [vmem:[%s455_s11] sm:$0xff] %vm5543_vm4, %v5542_v39 }
 0x354 PF: > { %p14_p9 = scmp.ge.s32.totalorder %s8628_s28, 4   ;;  %s10239_s24 = smov %s8565_s25 }
 0x355   : > { %s10240_s25 = smov %s8637_s8  ;;  %s10241_s26 = smov %s8628_s28 }
 0x356   :  { %16 = sbr.rel (!%p14_p9) target bundleno = 2 (0x2), region = 188 }

</bundles_post_ra>
